<compile_context>
chip_gen: v6e
topology: v6e:2x2x1
jax: 0.10.0
libtpu: 0.0.40
codegen_flags: <defaults>
</compile_context>

<pallas_src>
import functools
import math

import jax
import jax.numpy as jnp
from jax.experimental import pallas as pl
from jax.experimental.pallas import tpu as pltpu


# ----------------------------------------------------------------------------------
# One-time hardware probes / configuration helpers (run on host, outside the kernel).
# ----------------------------------------------------------------------------------

def _pick_vmem_limit_bytes():
    """Per-generation VMEM budget: most of 128 MiB on v5e/v6e, headroom below 64 MiB
    on v7x-class parts (and as a safe default when the query fails)."""
    mib = 1024 * 1024
    try:
        phys = int(pltpu.get_tpu_info().vmem_capacity_bytes)
    except Exception:
        phys = 64 * mib
    if phys >= 128 * mib:
        return 96 * mib
    return 48 * mib


@functools.lru_cache(maxsize=None)
def _rel_shift_roll_supported(T, L):
    """Verify (once per shape) that a single strided pltpu.roll implements the
    Transformer-XL rel-shift  out[i, j] = x[i, (T-1) - i + j]  on this backend.
    The strided-roll rotation convention isn't spelled out in the docs, so we probe
    it with an iota and fall back to a slice-based shift if it doesn't match."""
    if T < 2:
        return False

    def probe(x_ref, o_ref):
        o_ref[...] = pltpu.roll(x_ref[...], T, axis=1, stride=1, stride_axis=0)

    x = jnp.broadcast_to(jnp.arange(L, dtype=jnp.float32)[None, :], (T, L))
    try:
        y = pl.pallas_call(
            probe, out_shape=jax.ShapeDtypeStruct((T, L), jnp.float32)
        )(x)
        want = ((T - 1) - jnp.arange(T)[:, None] + jnp.arange(T)[None, :]).astype(
            jnp.float32
        )
        return bool(jnp.all(y[:, :T] == want))
    except Exception:
        return False


def _rel_shift(bd_full, T, use_strided_roll):
    """bd_full: (T, 2T-1) -> (T, T) with out[i, j] = bd_full[i, (T-1) - i + j]."""
    if use_strided_roll:
        # One XLU op: row i rotated by (T + i) mod (2T-1) == left-shift by (T-1-i).
        return pltpu.roll(bd_full, T, axis=1, stride=1, stride_axis=0)[:, :T]
    # Fallback: per-row static slices (always correct; O(T) relayout ops).
    rows = [bd_full[i:i + 1, T - 1 - i: 2 * T - 1 - i] for i in range(T)]
    return jnp.concatenate(rows, axis=0)


# ----------------------------------------------------------------------------------
# Kernel: one batch element per grid step; weights resident, activations streamed.
# ----------------------------------------------------------------------------------

def _encoder_layer_kernel(src_ref, p_ref,
                          wqkv_ref, bqkv_ref, pbu_ref, pbv_ref,
                          wo_ref, bo_ref,
                          w1_ref, b1_ref, w2_ref, b2_ref,
                          out_ref,
                          *, use_strided_roll, approx_recip):
    T, D = src_ref.shape
    H, L, dk = p_ref.shape
    f32, bf16 = jnp.float32, jnp.bfloat16

    x = src_ref[...]                                   # (T, D) f32, kept for residuals
    x_b = x.astype(bf16)

    # Fused q,k,v projection (bf16 MXU, f32 accumulate).  The 1/sqrt(dk) score scale
    # is folded into the q columns of wqkv / bqkv and into the pos biases (wrapper).
    qkv = jnp.dot(x_b, wqkv_ref[...], preferred_element_type=f32) + bqkv_ref[...]   # (T, 3D)

    q = qkv[:, :D]                                     # (T, D) f32 (pre-scaled)
    k_b = qkv[:, D:2 * D].astype(bf16)                 # (T, D) bf16
    v_b = qkv[:, 2 * D:].astype(bf16)                  # (T, D) bf16

    q_u = (q + pbu_ref[...]).astype(bf16)              # pos_bias_u folded flat, (1, D)
    q_v = (q + pbv_ref[...]).astype(bf16)

    # Per-head attention.  Heads are read as lane-offset column windows of the flat
    # (T, D) tensors (no stack/concat relayout of q/k/v); each head's context is a
    # natural (T, dk) slab that is re-assembled lane-dense below.
    # TODO(synk): at production sizes, a pltpu.einshape-based head relayout feeding a
    #             head-batched einsum may trade a bit of layout work for fewer MXU ops.
    ctx_heads = []
    for h in range(H):
        lo, hi = h * dk, (h + 1) * dk
        p_h = p_ref[h]                                                       # (L, dk) bf16

        ac = jnp.einsum("td,sd->ts", q_u[:, lo:hi], k_b[:, lo:hi],
                        preferred_element_type=f32)                          # (T, T)
        bd_full = jnp.einsum("td,ld->tl", q_v[:, lo:hi], p_h,
                             preferred_element_type=f32)                     # (T, L)
        bd = _rel_shift(bd_full, T, use_strided_roll)                        # (T, T)

        s = ac + bd                                    # 1/sqrt(dk) already folded in
        s = s - jnp.max(s, axis=-1, keepdims=True)
        e = jnp.exp(s)
        denom = jnp.sum(e, axis=-1, keepdims=True)
        if approx_recip:
            probs = e * pl.reciprocal(denom, approx=True)   # EUP slot, ~free
        else:
            probs = e / denom

        ctx_heads.append(jnp.dot(probs.astype(bf16), v_b[:, lo:hi],
                                 preferred_element_type=f32))                # (T, dk)

    # Lane-dense (T, D) context -> single full-depth output projection (contraction
    # over D, not dk), eliminating the (H, T, D) f32 partials + H-way reduce.
    ctx = jnp.concatenate(ctx_heads, axis=-1).astype(bf16)                   # (T, D)
    attn = jnp.dot(ctx, wo_ref[...], preferred_element_type=f32) + bo_ref[...]

    s1 = x + attn                                      # residual 1 (dropout == identity)

    # feed-forward: ScaledLinear -> (balancer = identity) -> DoubleSwish -> ScaledLinear
    h1 = jnp.dot(s1.astype(bf16), w1_ref[...], preferred_element_type=f32) + b1_ref[...]
    h1 = h1 * jax.nn.sigmoid(h1 - 1.0)                 # DoubleSwish(x) = x * sigmoid(x-1)
    ff = jnp.dot(h1.astype(bf16), w2_ref[...], preferred_element_type=f32) + b2_ref[...]

    s2 = s1 + ff                                       # residual 2

    # balancer (identity) + BasicNorm: x * (mean(x^2) + eps)^-0.5, eps = 0.25
    out_ref[...] = s2 * jax.lax.rsqrt(jnp.mean(s2 * s2, axis=-1, keepdims=True) + 0.25)


# ----------------------------------------------------------------------------------
# Wrapper.
# ----------------------------------------------------------------------------------

def transformer_encoder_layer_forward(src, pos_emb, params, *, approx_softmax_recip=True):
    """src: (T, B, D) f32; pos_emb: (1, 2T-1, D) f32 -> (T, B, D) f32."""
    T, B, D = src.shape
    L = 2 * T - 1
    assert pos_emb.shape == (1, L, D)
    H, dk = params["pos_bias_u"].shape
    assert H * dk == D
    scale = 1.0 / math.sqrt(dk)
    f32, bf16 = jnp.float32, jnp.bfloat16

    # Public API is (T, B, D) to mirror the PyTorch module; internally batch-major so
    # batch can be the (parallel) grid axis.
    src_btd = jnp.transpose(src, (1, 0, 2)).astype(f32)        # (B, T, D)

    def t(w):    # PyTorch Linear weight (out, in) -> (in, out)
        return jnp.asarray(w, f32).T

    def row(b):  # 1-D vector -> (1, n) for clean VMEM layout / broadcasting
        return jnp.asarray(b, f32).reshape(1, -1)

    # Fold the 1/sqrt(dk) attention scale into the q projection and the pos biases.
    wqkv = t(params["in_proj_w"])                              # (D, 3D)
    bqkv = row(params["in_proj_b"])                            # (1, 3D)
    wqkv = wqkv.at[:, :D].multiply(scale)
    bqkv = bqkv.at[:, :D].multiply(scale)

    # Hoisted, batch-invariant linear_pos projection + head split (done once in XLA).
    p_heads = pos_emb[0].astype(f32) @ t(params["linear_pos_w"])             # (L, D)
    p_heads = p_heads.reshape(L, H, dk).transpose(1, 0, 2).astype(bf16)      # (H, L, dk)

    pbu = row(scale * jnp.asarray(params["pos_bias_u"], f32).reshape(-1))    # (1, D)
    pbv = row(scale * jnp.asarray(params["pos_bias_v"], f32).reshape(-1))    # (1, D)

    weight_args = (
        p_heads,
        wqkv.astype(bf16), bqkv,
        pbu, pbv,
        t(params["out_proj_w"]).astype(bf16), row(params["out_proj_b"]),
        t(params["ff1_w"]).astype(bf16), row(params["ff1_b"]),
        t(params["ff2_w"]).astype(bf16), row(params["ff2_b"]),
    )
    args = (src_btd,) + weight_args

    kernel = functools.partial(
        _encoder_layer_kernel,
        use_strided_roll=_rel_shift_roll_supported(T, L),
        approx_recip=approx_softmax_recip,
    )

    def call(weight_pipeline_mode):
        in_specs = [pl.BlockSpec((None, T, D), lambda b: (b, 0, 0))]   # streamed tile
        for a in weight_args:
            in_specs.append(
                pl.BlockSpec(a.shape, (lambda b, _n=a.ndim: (0,) * _n),
                             pipeline_mode=weight_pipeline_mode))      # resident block
        return pl.pallas_call(
            kernel,
            out_shape=jax.ShapeDtypeStruct((B, T, D), f32),
            grid_spec=pltpu.PrefetchScalarGridSpec(
                num_scalar_prefetch=0,
                grid=(B,),
                in_specs=in_specs,
                out_specs=pl.BlockSpec((None, T, D), lambda b: (b, 0, 0)),
            ),
            compiler_params=pltpu.CompilerParams(
                dimension_semantics=("parallel",),
                vmem_limit_bytes=_pick_vmem_limit_bytes(),
            ),
        )(*args)

    try:
        # Grid-invariant weight blocks only need a single VMEM buffer.
        out_btd = call(pl.Buffered(1))
    except Exception:
        # If this Pallas build rejects single-buffering, fall back to the default.
        out_btd = call(None)
    return jnp.transpose(out_btd, (1, 0, 2))


# ----------------------------------------------------------------------------------
# Synthetic params + pure-JAX reference.
# ----------------------------------------------------------------------------------

def init_params(key, d_model, dim_feedforward, nhead):
    """Deterministic synthetic parameters (PyTorch (out, in) weight convention)."""
    dk = d_model // nhead
    ks = jax.random.split(key, 11)

    def rn(k, shape, scale):
        return scale * jax.random.normal(k, shape, dtype=jnp.float32)

    return {
        "in_proj_w":    rn(ks[0], (3 * d_model, d_model), 1.0 / math.sqrt(d_model)),
        "in_proj_b":    rn(ks[1], (3 * d_model,), 0.02),
        "out_proj_w":   rn(ks[2], (d_model, d_model), 0.25 / math.sqrt(d_model)),
        "out_proj_b":   rn(ks[3], (d_model,), 0.02),
        "linear_pos_w": rn(ks[4], (d_model, d_model), 1.0 / math.sqrt(d_model)),
        "pos_bias_u":   rn(ks[5], (nhead, dk), 0.1),
        "pos_bias_v":   rn(ks[6], (nhead, dk), 0.1),
        "ff1_w":        rn(ks[7], (dim_feedforward, d_model), 1.0 / math.sqrt(d_model)),
        "ff1_b":        rn(ks[8], (dim_feedforward,), 0.02),
        "ff2_w":        rn(ks[9], (d_model, dim_feedforward), 0.25 / math.sqrt(dim_feedforward)),
        "ff2_b":        rn(ks[10], (d_model,), 0.02),
    }


def reference_forward(src, pos_emb, params):
    """Pure-JAX (XLA, f32) reference mirroring the PyTorch forward semantics."""
    T, B, D = src.shape
    H, dk = params["pos_bias_u"].shape
    hi = jax.lax.Precision.HIGHEST

    qkv = jnp.einsum("tbd,ed->tbe", src, params["in_proj_w"], precision=hi) + params["in_proj_b"]
    q, k, v = jnp.split(qkv, 3, axis=-1)
    q = q.reshape(T, B, H, dk).transpose(1, 2, 0, 3)   # (B, H, T, dk)
    k = k.reshape(T, B, H, dk).transpose(1, 2, 0, 3)
    v = v.reshape(T, B, H, dk).transpose(1, 2, 0, 3)

    p = jnp.einsum("nd,ed->ne", pos_emb[0], params["linear_pos_w"], precision=hi)
    p = p.reshape(2 * T - 1, H, dk)

    q_u = q + params["pos_bias_u"][None, :, None, :]
    q_v = q + params["pos_bias_v"][None, :, None, :]

    ac = jnp.einsum("bhid,bhjd->bhij", q_u, k, precision=hi)
    bd = jnp.einsum("bhid,nhd->bhin", q_v, p, precision=hi)
    # rel_shift: out[..., i, j] = bd[..., i, (T-1) - i + j]
    idx = (T - 1) - jnp.arange(T)[:, None] + jnp.arange(T)[None, :]
    bd = bd[:, :, jnp.arange(T)[:, None], idx]

    scores = (ac + bd) * (dk ** -0.5)
    attn = jax.nn.softmax(scores, axis=-1)
    ctx = jnp.einsum("bhij,bhjd->bhid", attn, v, precision=hi)
    ctx = ctx.transpose(2, 0, 1, 3).reshape(T, B, D)
    attn_out = jnp.einsum("tbd,ed->tbe", ctx, params["out_proj_w"], precision=hi) + params["out_proj_b"]

    s1 = src + attn_out
    h1 = jnp.einsum("tbd,fd->tbf", s1, params["ff1_w"], precision=hi) + params["ff1_b"]
    h1 = h1 * jax.nn.sigmoid(h1 - 1.0)
    ff = jnp.einsum("tbf,df->tbd", h1, params["ff2_w"], precision=hi) + params["ff2_b"]
    s2 = s1 + ff

    scales = (jnp.mean(s2 ** 2, axis=-1, keepdims=True) + 0.25) ** -0.5
    return s2 * scales


if __name__ == "__main__":
    # Small but lane-dense demo shapes: D and FF multiples of 128, T a multiple of 8.
    T, B = 8, 2
    d_model, dim_feedforward, nhead = 128, 256, 4

    key = jax.random.PRNGKey(0)
    kp, kx, ke = jax.random.split(key, 3)
    params = init_params(kp, d_model, dim_feedforward, nhead)
    src = jax.random.normal(kx, (T, B, d_model), dtype=jnp.float32)
    pos_emb = jax.random.normal(ke, (1, 2 * T - 1, d_model), dtype=jnp.float32)

    out = transformer_encoder_layer_forward(src, pos_emb, params)
    out = jax.block_until_ready(out)
    assert out.shape == (T, B, d_model)

    ref = reference_forward(src, pos_emb, params)
    err = jnp.abs(out - ref)
    max_err = float(jnp.max(err))
    mean_err = float(jnp.mean(err))
    # Kernel uses bf16 MXU operands (f32 accumulate) + an approximate softmax
    # reciprocal, compared against a pure-f32 reference -> loosened tolerance.
    if not (max_err < 1e-1 and mean_err < 2.5e-2):
        raise AssertionError(
            f"mismatch vs reference: max abs err = {max_err}, mean abs err = {mean_err}")

    print("KERNEL_OK")
</pallas_src>

<mosaic_0001>
module attributes {stable_mosaic.version = 11 : i64} {
  func.func @probe(%arg0: memref<8x15xf32, #tpu.memory_space<vmem>>, %arg1: memref<8x15xf32, #tpu.memory_space<vmem>>) attributes {dimension_semantics = [], scalar_prefetch = 0 : i64, scratch_operands = 0 : i64, tpu.core_type = #tpu.core_type<tc>} {
    %c0 = arith.constant 0 : index
    %c0_0 = arith.constant 0 : index
    %0 = vector.load %arg0[%c0, %c0_0] : memref<8x15xf32, #tpu.memory_space<vmem>>, vector<8x15xf32>
    %c8_i32 = arith.constant 8 : i32
    %1 = tpu.dynamic_rotate %0 by %c8_i32 dim 1 {stride = 1 : si32, stride_dimension = 0 : si32} : vector<8x15xf32>, i32 -> vector<8x15xf32>
    %c0_1 = arith.constant 0 : index
    %c0_2 = arith.constant 0 : index
    %2 = vector.load %arg1[%c0_1, %c0_2] : memref<8x15xf32, #tpu.memory_space<vmem>>, vector<8x15xf32>
    tpu.vector_store %arg1[%c0_1, %c0_2], %1 {strides = array<i32>} : memref<8x15xf32, #tpu.memory_space<vmem>>, vector<8x15xf32>,
    return
  }
}

module attributes {stable_mosaic.version = 11 : i64} {
  func.func @_encoder_layer_kernel(%arg0: i32, %arg1: memref<1x8x128xf32, #tpu.memory_space<vmem>>, %arg2: memref<4x15x32xbf16, #tpu.memory_space<vmem>>, %arg3: memref<128x384xbf16, #tpu.memory_space<vmem>>, %arg4: memref<1x384xf32, #tpu.memory_space<vmem>>, %arg5: memref<1x128xf32, #tpu.memory_space<vmem>>, %arg6: memref<1x128xf32, #tpu.memory_space<vmem>>, %arg7: memref<128x128xbf16, #tpu.memory_space<vmem>>, %arg8: memref<1x128xf32, #tpu.memory_space<vmem>>, %arg9: memref<128x256xbf16, #tpu.memory_space<vmem>>, %arg10: memref<1x256xf32, #tpu.memory_space<vmem>>, %arg11: memref<256x128xbf16, #tpu.memory_space<vmem>>, %arg12: memref<1x128xf32, #tpu.memory_space<vmem>>, %arg13: memref<1x8x128xf32, #tpu.memory_space<vmem>>) attributes {dimension_semantics = [#tpu.dimension_semantics<parallel>], iteration_bounds = array<i64: 2>, scalar_prefetch = 0 : i64, scratch_operands = 0 : i64, tpu.core_type = #tpu.core_type<tc>, window_params = [{transform_indices = @transform_0, window_bounds = array<i64: 1, 8, 128>}, {pipeline_mode = #tpu.pipeline_mode<synchronous>, transform_indices = @transform_1, window_bounds = array<i64: 4, 15, 32>}, {pipeline_mode = #tpu.pipeline_mode<synchronous>, transform_indices = @transform_2, window_bounds = array<i64: 128, 384>}, {pipeline_mode = #tpu.pipeline_mode<synchronous>, transform_indices = @transform_3, window_bounds = array<i64: 1, 384>}, {pipeline_mode = #tpu.pipeline_mode<synchronous>, transform_indices = @transform_4, window_bounds = array<i64: 1, 128>}, {pipeline_mode = #tpu.pipeline_mode<synchronous>, transform_indices = @transform_5, window_bounds = array<i64: 1, 128>}, {pipeline_mode = #tpu.pipeline_mode<synchronous>, transform_indices = @transform_6, window_bounds = array<i64: 128, 128>}, {pipeline_mode = #tpu.pipeline_mode<synchronous>, transform_indices = @transform_7, window_bounds = array<i64: 1, 128>}, {pipeline_mode = #tpu.pipeline_mode<synchronous>, transform_indices = @transform_8, window_bounds = array<i64: 128, 256>}, {pipeline_mode = #tpu.pipeline_mode<synchronous>, transform_indices = @transform_9, window_bounds = array<i64: 1, 256>}, {pipeline_mode = #tpu.pipeline_mode<synchronous>, transform_indices = @transform_10, window_bounds = array<i64: 256, 128>}, {pipeline_mode = #tpu.pipeline_mode<synchronous>, transform_indices = @transform_11, window_bounds = array<i64: 1, 128>}, {transform_indices = @transform_12, window_bounds = array<i64: 1, 8, 128>}]} {
    %c0 = arith.constant 0 : index
    %c0_0 = arith.constant 0 : index
    %c0_1 = arith.constant 0 : index
    %0 = vector.load %arg1[%c0, %c0_0, %c0_1] : memref<1x8x128xf32, #tpu.memory_space<vmem>>, vector<1x8x128xf32>
    %1 = vector.shape_cast %0 : vector<1x8x128xf32> to vector<8x128xf32>
    %2 = arith.truncf %1 : vector<8x128xf32> to vector<8x128xbf16>
    %c0_2 = arith.constant 0 : index
    %c0_3 = arith.constant 0 : index
    %3 = vector.load %arg3[%c0_2, %c0_3] : memref<128x384xbf16, #tpu.memory_space<vmem>>, vector<128x384xbf16>
    %cst = arith.constant dense<0.000000e+00> : vector<8x384xf32>
    %4 = tpu.matmul %2, %3, %cst {dimension_numbers = #tpu.dot_dimension_numbers<[1], [0], [0], [1], [0, 0, 1, 1], [], []>} : vector<8x128xbf16>, vector<128x384xbf16>, vector<8x384xf32> -> vector<8x384xf32>
    %c0_4 = arith.constant 0 : index
    %c0_5 = arith.constant 0 : index
    %5 = vector.load %arg4[%c0_4, %c0_5] : memref<1x384xf32, #tpu.memory_space<vmem>>, vector<1x384xf32>
    %6 = vector.broadcast %5 : vector<1x384xf32> to vector<8x384xf32>
    %7 = arith.addf %4, %6 : vector<8x384xf32>
    %8 = vector.extract_strided_slice %7 {offsets = [0, 0], sizes = [8, 128], strides = [1, 1]} : vector<8x384xf32> to vector<8x128xf32>
    %9 = vector.extract_strided_slice %7 {offsets = [0, 128], sizes = [8, 128], strides = [1, 1]} : vector<8x384xf32> to vector<8x128xf32>
    %10 = arith.truncf %9 : vector<8x128xf32> to vector<8x128xbf16>
    %11 = vector.extract_strided_slice %7 {offsets = [0, 256], sizes = [8, 128], strides = [1, 1]} : vector<8x384xf32> to vector<8x128xf32>
    %12 = arith.truncf %11 : vector<8x128xf32> to vector<8x128xbf16>
    %c0_6 = arith.constant 0 : index
    %c0_7 = arith.constant 0 : index
    %13 = vector.load %arg5[%c0_6, %c0_7] : memref<1x128xf32, #tpu.memory_space<vmem>>, vector<1x128xf32>
    %14 = vector.broadcast %13 : vector<1x128xf32> to vector<8x128xf32>
    %15 = arith.addf %8, %14 : vector<8x128xf32>
    %16 = arith.truncf %15 : vector<8x128xf32> to vector<8x128xbf16>
    %c0_8 = arith.constant 0 : index
    %c0_9 = arith.constant 0 : index
    %17 = vector.load %arg6[%c0_8, %c0_9] : memref<1x128xf32, #tpu.memory_space<vmem>>, vector<1x128xf32>
    %18 = vector.broadcast %17 : vector<1x128xf32> to vector<8x128xf32>
    %19 = arith.addf %8, %18 : vector<8x128xf32>
    %20 = arith.truncf %19 : vector<8x128xf32> to vector<8x128xbf16>
    %c0_10 = arith.constant 0 : index
    %c0_11 = arith.constant 0 : index
    %c0_12 = arith.constant 0 : index
    %21 = vector.load %arg2[%c0_10, %c0_11, %c0_12] : memref<4x15x32xbf16, #tpu.memory_space<vmem>>, vector<1x15x32xbf16>
    %22 = vector.shape_cast %21 : vector<1x15x32xbf16> to vector<15x32xbf16>
    %23 = vector.extract_strided_slice %16 {offsets = [0, 0], sizes = [8, 32], strides = [1, 1]} : vector<8x128xbf16> to vector<8x32xbf16>
    %24 = vector.extract_strided_slice %10 {offsets = [0, 0], sizes = [8, 32], strides = [1, 1]} : vector<8x128xbf16> to vector<8x32xbf16>
    "tpu.trace_start"() <{level = 10 : i32, message = "td,sd->ts"}> : () -> ()
    %cst_13 = arith.constant dense<0.000000e+00> : vector<8x8xf32>
    %25 = tpu.matmul %23, %24, %cst_13 {dimension_numbers = #tpu.dot_dimension_numbers<[1], [1], [0], [0], [0, 0, 1, 0], [], []>} : vector<8x32xbf16>, vector<8x32xbf16>, vector<8x8xf32> -> vector<8x8xf32>
    "tpu.trace_stop"() : () -> ()
    %26 = vector.extract_strided_slice %20 {offsets = [0, 0], sizes = [8, 32], strides = [1, 1]} : vector<8x128xbf16> to vector<8x32xbf16>
    "tpu.trace_start"() <{level = 10 : i32, message = "td,ld->tl"}> : () -> ()
    %cst_14 = arith.constant dense<0.000000e+00> : vector<8x15xf32>
    %27 = tpu.matmul %26, %22, %cst_14 {dimension_numbers = #tpu.dot_dimension_numbers<[1], [1], [0], [0], [0, 0, 1, 0], [], []>} : vector<8x32xbf16>, vector<15x32xbf16>, vector<8x15xf32> -> vector<8x15xf32>
    "tpu.trace_stop"() : () -> ()
    %28 = vector.extract_strided_slice %27 {offsets = [0, 7], sizes = [1, 8], strides = [1, 1]} : vector<8x15xf32> to vector<1x8xf32>
    %29 = vector.extract_strided_slice %27 {offsets = [1, 6], sizes = [1, 8], strides = [1, 1]} : vector<8x15xf32> to vector<1x8xf32>
    %30 = vector.extract_strided_slice %27 {offsets = [2, 5], sizes = [1, 8], strides = [1, 1]} : vector<8x15xf32> to vector<1x8xf32>
    %31 = vector.extract_strided_slice %27 {offsets = [3, 4], sizes = [1, 8], strides = [1, 1]} : vector<8x15xf32> to vector<1x8xf32>
    %32 = vector.extract_strided_slice %27 {offsets = [4, 3], sizes = [1, 8], strides = [1, 1]} : vector<8x15xf32> to vector<1x8xf32>
    %33 = vector.extract_strided_slice %27 {offsets = [5, 2], sizes = [1, 8], strides = [1, 1]} : vector<8x15xf32> to vector<1x8xf32>
    %34 = vector.extract_strided_slice %27 {offsets = [6, 1], sizes = [1, 8], strides = [1, 1]} : vector<8x15xf32> to vector<1x8xf32>
    %35 = vector.extract_strided_slice %27 {offsets = [7, 0], sizes = [1, 8], strides = [1, 1]} : vector<8x15xf32> to vector<1x8xf32>
    %36 = tpu.concatenate %28, %29, %30, %31, %32, %33, %34, %35 in 0 : vector<1x8xf32>, vector<1x8xf32>, vector<1x8xf32>, vector<1x8xf32>, vector<1x8xf32>, vector<1x8xf32>, vector<1x8xf32>, vector<1x8xf32> -> vector<8x8xf32>
    %37 = arith.addf %25, %36 : vector<8x8xf32>
    %cst_15 = arith.constant dense<0xFF800000> : vector<8xf32>
    %38 = vector.multi_reduction <maximumf>, %37, %cst_15 [1] : vector<8x8xf32> to vector<8xf32>
    %39 = vector.shape_cast %38 : vector<8xf32> to vector<8x1xf32>
    %40 = vector.broadcast %39 : vector<8x1xf32> to vector<8x8xf32>
    %41 = arith.subf %37, %40 : vector<8x8xf32>
    %42 = math.exp %41 : vector<8x8xf32>
    %cst_16 = arith.constant dense<0.000000e+00> : vector<8xf32>
    %43 = vector.multi_reduction <add>, %42, %cst_16 [1] : vector<8x8xf32> to vector<8xf32>
    %44 = vector.shape_cast %43 : vector<8xf32> to vector<8x1xf32>
    %45 = tpu.reciprocal %44 {approx = true} : vector<8x1xf32> -> vector<8x1xf32>
    %46 = vector.broadcast %45 : vector<8x1xf32> to vector<8x8xf32>
    %47 = arith.mulf %42, %46 : vector<8x8xf32>
    %48 = arith.truncf %47 : vector<8x8xf32> to vector<8x8xbf16>
    %49 = vector.extract_strided_slice %12 {offsets = [0, 0], sizes = [8, 32], strides = [1, 1]} : vector<8x128xbf16> to vector<8x32xbf16>
    %cst_17 = arith.constant dense<0.000000e+00> : vector<8x32xf32>
    %50 = tpu.matmul %48, %49, %cst_17 {dimension_numbers = #tpu.dot_dimension_numbers<[1], [0], [0], [1], [0, 0, 1, 1], [], []>} : vector<8x8xbf16>, vector<8x32xbf16>, vector<8x32xf32> -> vector<8x32xf32>
    %c1 = arith.constant 1 : index
    %c0_18 = arith.constant 0 : index
    %c0_19 = arith.constant 0 : index
    %51 = vector.load %arg2[%c1, %c0_18, %c0_19] : memref<4x15x32xbf16, #tpu.memory_space<vmem>>, vector<1x15x32xbf16>
    %52 = vector.shape_cast %51 : vector<1x15x32xbf16> to vector<15x32xbf16>
    %53 = vector.extract_strided_slice %16 {offsets = [0, 32], sizes = [8, 32], strides = [1, 1]} : vector<8x128xbf16> to vector<8x32xbf16>
    %54 = vector.extract_strided_slice %10 {offsets = [0, 32], sizes = [8, 32], strides = [1, 1]} : vector<8x128xbf16> to vector<8x32xbf16>
    "tpu.trace_start"() <{level = 10 : i32, message = "td,sd->ts"}> : () -> ()
    %cst_20 = arith.constant dense<0.000000e+00> : vector<8x8xf32>
    %55 = tpu.matmul %53, %54, %cst_20 {dimension_numbers = #tpu.dot_dimension_numbers<[1], [1], [0], [0], [0, 0, 1, 0], [], []>} : vector<8x32xbf16>, vector<8x32xbf16>, vector<8x8xf32> -> vector<8x8xf32>
    "tpu.trace_stop"() : () -> ()
    %56 = vector.extract_strided_slice %20 {offsets = [0, 32], sizes = [8, 32], strides = [1, 1]} : vector<8x128xbf16> to vector<8x32xbf16>
    "tpu.trace_start"() <{level = 10 : i32, message = "td,ld->tl"}> : () -> ()
    %cst_21 = arith.constant dense<0.000000e+00> : vector<8x15xf32>
    %57 = tpu.matmul %56, %52, %cst_21 {dimension_numbers = #tpu.dot_dimension_numbers<[1], [1], [0], [0], [0, 0, 1, 0], [], []>} : vector<8x32xbf16>, vector<15x32xbf16>, vector<8x15xf32> -> vector<8x15xf32>
    "tpu.trace_stop"() : () -> ()
    %58 = vector.extract_strided_slice %57 {offsets = [0, 7], sizes = [1, 8], strides = [1, 1]} : vector<8x15xf32> to vector<1x8xf32>
    %59 = vector.extract_strided_slice %57 {offsets = [1, 6], sizes = [1, 8], strides = [1, 1]} : vector<8x15xf32> to vector<1x8xf32>
    %60 = vector.extract_strided_slice %57 {offsets = [2, 5], sizes = [1, 8], strides = [1, 1]} : vector<8x15xf32> to vector<1x8xf32>
    %61 = vector.extract_strided_slice %57 {offsets = [3, 4], sizes = [1, 8], strides = [1, 1]} : vector<8x15xf32> to vector<1x8xf32>
    %62 = vector.extract_strided_slice %57 {offsets = [4, 3], sizes = [1, 8], strides = [1, 1]} : vector<8x15xf32> to vector<1x8xf32>
    %63 = vector.extract_strided_slice %57 {offsets = [5, 2], sizes = [1, 8], strides = [1, 1]} : vector<8x15xf32> to vector<1x8xf32>
    %64 = vector.extract_strided_slice %57 {offsets = [6, 1], sizes = [1, 8], strides = [1, 1]} : vector<8x15xf32> to vector<1x8xf32>
    %65 = vector.extract_strided_slice %57 {offsets = [7, 0], sizes = [1, 8], strides = [1, 1]} : vector<8x15xf32> to vector<1x8xf32>
    %66 = tpu.concatenate %58, %59, %60, %61, %62, %63, %64, %65 in 0 : vector<1x8xf32>, vector<1x8xf32>, vector<1x8xf32>, vector<1x8xf32>, vector<1x8xf32>, vector<1x8xf32>, vector<1x8xf32>, vector<1x8xf32> -> vector<8x8xf32>
    %67 = arith.addf %55, %66 : vector<8x8xf32>
    %cst_22 = arith.constant dense<0xFF800000> : vector<8xf32>
    %68 = vector.multi_reduction <maximumf>, %67, %cst_22 [1] : vector<8x8xf32> to vector<8xf32>
    %69 = vector.shape_cast %68 : vector<8xf32> to vector<8x1xf32>
    %70 = vector.broadcast %69 : vector<8x1xf32> to vector<8x8xf32>
    %71 = arith.subf %67, %70 : vector<8x8xf32>
    %72 = math.exp %71 : vector<8x8xf32>
    %cst_23 = arith.constant dense<0.000000e+00> : vector<8xf32>
    %73 = vector.multi_reduction <add>, %72, %cst_23 [1] : vector<8x8xf32> to vector<8xf32>
    %74 = vector.shape_cast %73 : vector<8xf32> to vector<8x1xf32>
    %75 = tpu.reciprocal %74 {approx = true} : vector<8x1xf32> -> vector<8x1xf32>
    %76 = vector.broadcast %75 : vector<8x1xf32> to vector<8x8xf32>
    %77 = arith.mulf %72, %76 : vector<8x8xf32>
    %78 = arith.truncf %77 : vector<8x8xf32> to vector<8x8xbf16>
    %79 = vector.extract_strided_slice %12 {offsets = [0, 32], sizes = [8, 32], strides = [1, 1]} : vector<8x128xbf16> to vector<8x32xbf16>
    %cst_24 = arith.constant dense<0.000000e+00> : vector<8x32xf32>
    %80 = tpu.matmul %78, %79, %cst_24 {dimension_numbers = #tpu.dot_dimension_numbers<[1], [0], [0], [1], [0, 0, 1, 1], [], []>} : vector<8x8xbf16>, vector<8x32xbf16>, vector<8x32xf32> -> vector<8x32xf32>
    %c2 = arith.constant 2 : index
    %c0_25 = arith.constant 0 : index
    %c0_26 = arith.constant 0 : index
    %81 = vector.load %arg2[%c2, %c0_25, %c0_26] : memref<4x15x32xbf16, #tpu.memory_space<vmem>>, vector<1x15x32xbf16>
    %82 = vector.shape_cast %81 : vector<1x15x32xbf16> to vector<15x32xbf16>
    %83 = vector.extract_strided_slice %16 {offsets = [0, 64], sizes = [8, 32], strides = [1, 1]} : vector<8x128xbf16> to vector<8x32xbf16>
    %84 = vector.extract_strided_slice %10 {offsets = [0, 64], sizes = [8, 32], strides = [1, 1]} : vector<8x128xbf16> to vector<8x32xbf16>
    "tpu.trace_start"() <{level = 10 : i32, message = "td,sd->ts"}> : () -> ()
    %cst_27 = arith.constant dense<0.000000e+00> : vector<8x8xf32>
    %85 = tpu.matmul %83, %84, %cst_27 {dimension_numbers = #tpu.dot_dimension_numbers<[1], [1], [0], [0], [0, 0, 1, 0], [], []>} : vector<8x32xbf16>, vector<8x32xbf16>, vector<8x8xf32> -> vector<8x8xf32>
    "tpu.trace_stop"() : () -> ()
    %86 = vector.extract_strided_slice %20 {offsets = [0, 64], sizes = [8, 32], strides = [1, 1]} : vector<8x128xbf16> to vector<8x32xbf16>
    "tpu.trace_start"() <{level = 10 : i32, message = "td,ld->tl"}> : () -> ()
    %cst_28 = arith.constant dense<0.000000e+00> : vector<8x15xf32>
    %87 = tpu.matmul %86, %82, %cst_28 {dimension_numbers = #tpu.dot_dimension_numbers<[1], [1], [0], [0], [0, 0, 1, 0], [], []>} : vector<8x32xbf16>, vector<15x32xbf16>, vector<8x15xf32> -> vector<8x15xf32>
    "tpu.trace_stop"() : () -> ()
    %88 = vector.extract_strided_slice %87 {offsets = [0, 7], sizes = [1, 8], strides = [1, 1]} : vector<8x15xf32> to vector<1x8xf32>
    %89 = vector.extract_strided_slice %87 {offsets = [1, 6], sizes = [1, 8], strides = [1, 1]} : vector<8x15xf32> to vector<1x8xf32>
    %90 = vector.extract_strided_slice %87 {offsets = [2, 5], sizes = [1, 8], strides = [1, 1]} : vector<8x15xf32> to vector<1x8xf32>
    %91 = vector.extract_strided_slice %87 {offsets = [3, 4], sizes = [1, 8], strides = [1, 1]} : vector<8x15xf32> to vector<1x8xf32>
    %92 = vector.extract_strided_slice %87 {offsets = [4, 3], sizes = [1, 8], strides = [1, 1]} : vector<8x15xf32> to vector<1x8xf32>
    %93 = vector.extract_strided_slice %87 {offsets = [5, 2], sizes = [1, 8], strides = [1, 1]} : vector<8x15xf32> to vector<1x8xf32>
    %94 = vector.extract_strided_slice %87 {offsets = [6, 1], sizes = [1, 8], strides = [1, 1]} : vector<8x15xf32> to vector<1x8xf32>
    %95 = vector.extract_strided_slice %87 {offsets = [7, 0], sizes = [1, 8], strides = [1, 1]} : vector<8x15xf32> to vector<1x8xf32>
    %96 = tpu.concatenate %88, %89, %90, %91, %92, %93, %94, %95 in 0 : vector<1x8xf32>, vector<1x8xf32>, vector<1x8xf32>, vector<1x8xf32>, vector<1x8xf32>, vector<1x8xf32>, vector<1x8xf32>, vector<1x8xf32> -> vector<8x8xf32>
    %97 = arith.addf %85, %96 : vector<8x8xf32>
    %cst_29 = arith.constant dense<0xFF800000> : vector<8xf32>
    %98 = vector.multi_reduction <maximumf>, %97, %cst_29 [1] : vector<8x8xf32> to vector<8xf32>
    %99 = vector.shape_cast %98 : vector<8xf32> to vector<8x1xf32>
    %100 = vector.broadcast %99 : vector<8x1xf32> to vector<8x8xf32>
    %101 = arith.subf %97, %100 : vector<8x8xf32>
    %102 = math.exp %101 : vector<8x8xf32>
    %cst_30 = arith.constant dense<0.000000e+00> : vector<8xf32>
    %103 = vector.multi_reduction <add>, %102, %cst_30 [1] : vector<8x8xf32> to vector<8xf32>
    %104 = vector.shape_cast %103 : vector<8xf32> to vector<8x1xf32>
    %105 = tpu.reciprocal %104 {approx = true} : vector<8x1xf32> -> vector<8x1xf32>
    %106 = vector.broadcast %105 : vector<8x1xf32> to vector<8x8xf32>
    %107 = arith.mulf %102, %106 : vector<8x8xf32>
    %108 = arith.truncf %107 : vector<8x8xf32> to vector<8x8xbf16>
    %109 = vector.extract_strided_slice %12 {offsets = [0, 64], sizes = [8, 32], strides = [1, 1]} : vector<8x128xbf16> to vector<8x32xbf16>
    %cst_31 = arith.constant dense<0.000000e+00> : vector<8x32xf32>
    %110 = tpu.matmul %108, %109, %cst_31 {dimension_numbers = #tpu.dot_dimension_numbers<[1], [0], [0], [1], [0, 0, 1, 1], [], []>} : vector<8x8xbf16>, vector<8x32xbf16>, vector<8x32xf32> -> vector<8x32xf32>
    %c3 = arith.constant 3 : index
    %c0_32 = arith.constant 0 : index
    %c0_33 = arith.constant 0 : index
    %111 = vector.load %arg2[%c3, %c0_32, %c0_33] : memref<4x15x32xbf16, #tpu.memory_space<vmem>>, vector<1x15x32xbf16>
    %112 = vector.shape_cast %111 : vector<1x15x32xbf16> to vector<15x32xbf16>
    %113 = vector.extract_strided_slice %16 {offsets = [0, 96], sizes = [8, 32], strides = [1, 1]} : vector<8x128xbf16> to vector<8x32xbf16>
    %114 = vector.extract_strided_slice %10 {offsets = [0, 96], sizes = [8, 32], strides = [1, 1]} : vector<8x128xbf16> to vector<8x32xbf16>
    "tpu.trace_start"() <{level = 10 : i32, message = "td,sd->ts"}> : () -> ()
    %cst_34 = arith.constant dense<0.000000e+00> : vector<8x8xf32>
    %115 = tpu.matmul %113, %114, %cst_34 {dimension_numbers = #tpu.dot_dimension_numbers<[1], [1], [0], [0], [0, 0, 1, 0], [], []>} : vector<8x32xbf16>, vector<8x32xbf16>, vector<8x8xf32> -> vector<8x8xf32>
    "tpu.trace_stop"() : () -> ()
    %116 = vector.extract_strided_slice %20 {offsets = [0, 96], sizes = [8, 32], strides = [1, 1]} : vector<8x128xbf16> to vector<8x32xbf16>
    "tpu.trace_start"() <{level = 10 : i32, message = "td,ld->tl"}> : () -> ()
    %cst_35 = arith.constant dense<0.000000e+00> : vector<8x15xf32>
    %117 = tpu.matmul %116, %112, %cst_35 {dimension_numbers = #tpu.dot_dimension_numbers<[1], [1], [0], [0], [0, 0, 1, 0], [], []>} : vector<8x32xbf16>, vector<15x32xbf16>, vector<8x15xf32> -> vector<8x15xf32>
    "tpu.trace_stop"() : () -> ()
    %118 = vector.extract_strided_slice %117 {offsets = [0, 7], sizes = [1, 8], strides = [1, 1]} : vector<8x15xf32> to vector<1x8xf32>
    %119 = vector.extract_strided_slice %117 {offsets = [1, 6], sizes = [1, 8], strides = [1, 1]} : vector<8x15xf32> to vector<1x8xf32>
    %120 = vector.extract_strided_slice %117 {offsets = [2, 5], sizes = [1, 8], strides = [1, 1]} : vector<8x15xf32> to vector<1x8xf32>
    %121 = vector.extract_strided_slice %117 {offsets = [3, 4], sizes = [1, 8], strides = [1, 1]} : vector<8x15xf32> to vector<1x8xf32>
    %122 = vector.extract_strided_slice %117 {offsets = [4, 3], sizes = [1, 8], strides = [1, 1]} : vector<8x15xf32> to vector<1x8xf32>
    %123 = vector.extract_strided_slice %117 {offsets = [5, 2], sizes = [1, 8], strides = [1, 1]} : vector<8x15xf32> to vector<1x8xf32>
    %124 = vector.extract_strided_slice %117 {offsets = [6, 1], sizes = [1, 8], strides = [1, 1]} : vector<8x15xf32> to vector<1x8xf32>
    %125 = vector.extract_strided_slice %117 {offsets = [7, 0], sizes = [1, 8], strides = [1, 1]} : vector<8x15xf32> to vector<1x8xf32>
    %126 = tpu.concatenate %118, %119, %120, %121, %122, %123, %124, %125 in 0 : vector<1x8xf32>, vector<1x8xf32>, vector<1x8xf32>, vector<1x8xf32>, vector<1x8xf32>, vector<1x8xf32>, vector<1x8xf32>, vector<1x8xf32> -> vector<8x8xf32>
    %127 = arith.addf %115, %126 : vector<8x8xf32>
    %cst_36 = arith.constant dense<0xFF800000> : vector<8xf32>
    %128 = vector.multi_reduction <maximumf>, %127, %cst_36 [1] : vector<8x8xf32> to vector<8xf32>
    %129 = vector.shape_cast %128 : vector<8xf32> to vector<8x1xf32>
    %130 = vector.broadcast %129 : vector<8x1xf32> to vector<8x8xf32>
    %131 = arith.subf %127, %130 : vector<8x8xf32>
    %132 = math.exp %131 : vector<8x8xf32>
    %cst_37 = arith.constant dense<0.000000e+00> : vector<8xf32>
    %133 = vector.multi_reduction <add>, %132, %cst_37 [1] : vector<8x8xf32> to vector<8xf32>
    %134 = vector.shape_cast %133 : vector<8xf32> to vector<8x1xf32>
    %135 = tpu.reciprocal %134 {approx = true} : vector<8x1xf32> -> vector<8x1xf32>
    %136 = vector.broadcast %135 : vector<8x1xf32> to vector<8x8xf32>
    %137 = arith.mulf %132, %136 : vector<8x8xf32>
    %138 = arith.truncf %137 : vector<8x8xf32> to vector<8x8xbf16>
    %139 = vector.extract_strided_slice %12 {offsets = [0, 96], sizes = [8, 32], strides = [1, 1]} : vector<8x128xbf16> to vector<8x32xbf16>
    %cst_38 = arith.constant dense<0.000000e+00> : vector<8x32xf32>
    %140 = tpu.matmul %138, %139, %cst_38 {dimension_numbers = #tpu.dot_dimension_numbers<[1], [0], [0], [1], [0, 0, 1, 1], [], []>} : vector<8x8xbf16>, vector<8x32xbf16>, vector<8x32xf32> -> vector<8x32xf32>
    %141 = tpu.concatenate %50, %80, %110, %140 in 1 : vector<8x32xf32>, vector<8x32xf32>, vector<8x32xf32>, vector<8x32xf32> -> vector<8x128xf32>
    %142 = arith.truncf %141 : vector<8x128xf32> to vector<8x128xbf16>
    %c0_39 = arith.constant 0 : index
    %c0_40 = arith.constant 0 : index
    %143 = vector.load %arg7[%c0_39, %c0_40] : memref<128x128xbf16, #tpu.memory_space<vmem>>, vector<128x128xbf16>
    %cst_41 = arith.constant dense<0.000000e+00> : vector<8x128xf32>
    %144 = tpu.matmul %142, %143, %cst_41 {dimension_numbers = #tpu.dot_dimension_numbers<[1], [0], [0], [1], [0, 0, 1, 1], [], []>} : vector<8x128xbf16>, vector<128x128xbf16>, vector<8x128xf32> -> vector<8x128xf32>
    %c0_42 = arith.constant 0 : index
    %c0_43 = arith.constant 0 : index
    %145 = vector.load %arg8[%c0_42, %c0_43] : memref<1x128xf32, #tpu.memory_space<vmem>>, vector<1x128xf32>
    %146 = vector.broadcast %145 : vector<1x128xf32> to vector<8x128xf32>
    %147 = arith.addf %144, %146 : vector<8x128xf32>
    %148 = arith.addf %1, %147 : vector<8x128xf32>
    %149 = arith.truncf %148 : vector<8x128xf32> to vector<8x128xbf16>
    %c0_44 = arith.constant 0 : index
    %c0_45 = arith.constant 0 : index
    %150 = vector.load %arg9[%c0_44, %c0_45] : memref<128x256xbf16, #tpu.memory_space<vmem>>, vector<128x256xbf16>
    %cst_46 = arith.constant dense<0.000000e+00> : vector<8x256xf32>
    %151 = tpu.matmul %149, %150, %cst_46 {dimension_numbers = #tpu.dot_dimension_numbers<[1], [0], [0], [1], [0, 0, 1, 1], [], []>} : vector<8x128xbf16>, vector<128x256xbf16>, vector<8x256xf32> -> vector<8x256xf32>
    %c0_47 = arith.constant 0 : index
    %c0_48 = arith.constant 0 : index
    %152 = vector.load %arg10[%c0_47, %c0_48] : memref<1x256xf32, #tpu.memory_space<vmem>>, vector<1x256xf32>
    %153 = vector.broadcast %152 : vector<1x256xf32> to vector<8x256xf32>
    %154 = arith.addf %151, %153 : vector<8x256xf32>
    %cst_49 = arith.constant 1.000000e+00 : f32
    %155 = vector.broadcast %cst_49 : f32 to vector<8x256xf32>
    %156 = arith.subf %154, %155 : vector<8x256xf32>
    %157 = arith.negf %156 : vector<8x256xf32>
    %158 = math.exp %157 : vector<8x256xf32>
    %cst_50 = arith.constant 1.000000e+00 : f32
    %159 = vector.broadcast %cst_50 : f32 to vector<8x256xf32>
    %160 = arith.addf %159, %158 : vector<8x256xf32>
    %161 = arith.divf %159, %160 : vector<8x256xf32>
    %162 = arith.mulf %154, %161 : vector<8x256xf32>
    %163 = arith.truncf %162 : vector<8x256xf32> to vector<8x256xbf16>
    %c0_51 = arith.constant 0 : index
    %c0_52 = arith.constant 0 : index
    %164 = vector.load %arg11[%c0_51, %c0_52] : memref<256x128xbf16, #tpu.memory_space<vmem>>, vector<256x128xbf16>
    %cst_53 = arith.constant dense<0.000000e+00> : vector<8x128xf32>
    %165 = tpu.matmul %163, %164, %cst_53 {dimension_numbers = #tpu.dot_dimension_numbers<[1], [0], [0], [1], [0, 0, 1, 1], [], []>} : vector<8x256xbf16>, vector<256x128xbf16>, vector<8x128xf32> -> vector<8x128xf32>
    %c0_54 = arith.constant 0 : index
    %c0_55 = arith.constant 0 : index
    %166 = vector.load %arg12[%c0_54, %c0_55] : memref<1x128xf32, #tpu.memory_space<vmem>>, vector<1x128xf32>
    %167 = vector.broadcast %166 : vector<1x128xf32> to vector<8x128xf32>
    %168 = arith.addf %165, %167 : vector<8x128xf32>
    %169 = arith.addf %148, %168 : vector<8x128xf32>
    %170 = arith.mulf %169, %169 : vector<8x128xf32>
    %cst_56 = arith.constant dense<0.000000e+00> : vector<8xf32>
    %171 = vector.multi_reduction <add>, %170, %cst_56 [1] : vector<8x128xf32> to vector<8xf32>
    %172 = vector.shape_cast %171 : vector<8xf32> to vector<8x1xf32>
    %cst_57 = arith.constant 1.280000e+02 : f32
    %173 = vector.broadcast %cst_57 : f32 to vector<8x1xf32>
    %174 = arith.divf %172, %173 : vector<8x1xf32>
    %cst_58 = arith.constant 2.500000e-01 : f32
    %175 = vector.broadcast %cst_58 : f32 to vector<8x1xf32>
    %176 = arith.addf %174, %175 : vector<8x1xf32>
    %177 = math.rsqrt %176 : vector<8x1xf32>
    %178 = vector.broadcast %177 : vector<8x1xf32> to vector<8x128xf32>
    %179 = arith.mulf %169, %178 : vector<8x128xf32>
    %c0_59 = arith.constant 0 : index
    %c0_60 = arith.constant 0 : index
    %c0_61 = arith.constant 0 : index
    %180 = vector.load %arg13[%c0_59, %c0_60, %c0_61] : memref<1x8x128xf32, #tpu.memory_space<vmem>>, vector<1x8x128xf32>
    %181 = vector.shape_cast %180 : vector<1x8x128xf32> to vector<8x128xf32>
    %182 = vector.shape_cast %179 : vector<8x128xf32> to vector<1x8x128xf32>
    tpu.vector_store %arg13[%c0_59, %c0_60, %c0_61], %182 {strides = array<i32>} : memref<1x8x128xf32, #tpu.memory_space<vmem>>, vector<1x8x128xf32>,
    return
  }
  func.func @transform_0(%arg0: i32) -> (i32, i32, i32) {
    %c0_i32 = arith.constant 0 : i32
    %c0_i32_0 = arith.constant 0 : i32
    %c0_i32_1 = arith.constant 0 : i32
    return %arg0, %c0_i32, %c0_i32_0 : i32, i32, i32
  }
  func.func @transform_1(%arg0: i32) -> (i32, i32, i32) {
    %c0_i32 = arith.constant 0 : i32
    %c0_i32_0 = arith.constant 0 : i32
    %c0_i32_1 = arith.constant 0 : i32
    %c0_i32_2 = arith.constant 0 : i32
    return %c0_i32, %c0_i32_0, %c0_i32_1 : i32, i32, i32
  }
  func.func @transform_2(%arg0: i32) -> (i32, i32) {
    %c0_i32 = arith.constant 0 : i32
    %c0_i32_0 = arith.constant 0 : i32
    %c0_i32_1 = arith.constant 0 : i32
    return %c0_i32, %c0_i32_0 : i32, i32
  }
  func.func @transform_3(%arg0: i32) -> (i32, i32) {
    %c0_i32 = arith.constant 0 : i32
    %c0_i32_0 = arith.constant 0 : i32
    %c0_i32_1 = arith.constant 0 : i32
    return %c0_i32, %c0_i32_0 : i32, i32
  }
  func.func @transform_4(%arg0: i32) -> (i32, i32) {
    %c0_i32 = arith.constant 0 : i32
    %c0_i32_0 = arith.constant 0 : i32
    %c0_i32_1 = arith.constant 0 : i32
    return %c0_i32, %c0_i32_0 : i32, i32
  }
  func.func @transform_5(%arg0: i32) -> (i32, i32) {
    %c0_i32 = arith.constant 0 : i32
    %c0_i32_0 = arith.constant 0 : i32
    %c0_i32_1 = arith.constant 0 : i32
    return %c0_i32, %c0_i32_0 : i32, i32
  }
  func.func @transform_6(%arg0: i32) -> (i32, i32) {
    %c0_i32 = arith.constant 0 : i32
    %c0_i32_0 = arith.constant 0 : i32
    %c0_i32_1 = arith.constant 0 : i32
    return %c0_i32, %c0_i32_0 : i32, i32
  }
  func.func @transform_7(%arg0: i32) -> (i32, i32) {
    %c0_i32 = arith.constant 0 : i32
    %c0_i32_0 = arith.constant 0 : i32
    %c0_i32_1 = arith.constant 0 : i32
    return %c0_i32, %c0_i32_0 : i32, i32
  }
  func.func @transform_8(%arg0: i32) -> (i32, i32) {
    %c0_i32 = arith.constant 0 : i32
    %c0_i32_0 = arith.constant 0 : i32
    %c0_i32_1 = arith.constant 0 : i32
    return %c0_i32, %c0_i32_0 : i32, i32
  }
  func.func @transform_9(%arg0: i32) -> (i32, i32) {
    %c0_i32 = arith.constant 0 : i32
    %c0_i32_0 = arith.constant 0 : i32
    %c0_i32_1 = arith.constant 0 : i32
    return %c0_i32, %c0_i32_0 : i32, i32
  }
  func.func @transform_10(%arg0: i32) -> (i32, i32) {
    %c0_i32 = arith.constant 0 : i32
    %c0_i32_0 = arith.constant 0 : i32
    %c0_i32_1 = arith.constant 0 : i32
    return %c0_i32, %c0_i32_0 : i32, i32
  }
  func.func @transform_11(%arg0: i32) -> (i32, i32) {
    %c0_i32 = arith.constant 0 : i32
    %c0_i32_0 = arith.constant 0 : i32
    %c0_i32_1 = arith.constant 0 : i32
    return %c0_i32, %c0_i32_0 : i32, i32
  }
  func.func @transform_12(%arg0: i32) -> (i32, i32, i32) {
    %c0_i32 = arith.constant 0 : i32
    %c0_i32_0 = arith.constant 0 : i32
    %c0_i32_1 = arith.constant 0 : i32
    return %arg0, %c0_i32, %c0_i32_0 : i32, i32, i32
  }
}

module attributes {stable_mosaic.version = 11 : i64} {
  func.func @_encoder_layer_kernel(%arg0: i32, %arg1: memref<1x8x128xf32, #tpu.memory_space<vmem>>, %arg2: memref<4x15x32xbf16, #tpu.memory_space<vmem>>, %arg3: memref<128x384xbf16, #tpu.memory_space<vmem>>, %arg4: memref<1x384xf32, #tpu.memory_space<vmem>>, %arg5: memref<1x128xf32, #tpu.memory_space<vmem>>, %arg6: memref<1x128xf32, #tpu.memory_space<vmem>>, %arg7: memref<128x128xbf16, #tpu.memory_space<vmem>>, %arg8: memref<1x128xf32, #tpu.memory_space<vmem>>, %arg9: memref<128x256xbf16, #tpu.memory_space<vmem>>, %arg10: memref<1x256xf32, #tpu.memory_space<vmem>>, %arg11: memref<256x128xbf16, #tpu.memory_space<vmem>>, %arg12: memref<1x128xf32, #tpu.memory_space<vmem>>, %arg13: memref<1x8x128xf32, #tpu.memory_space<vmem>>) attributes {dimension_semantics = [#tpu.dimension_semantics<parallel>], iteration_bounds = array<i64: 2>, scalar_prefetch = 0 : i64, scratch_operands = 0 : i64, tpu.core_type = #tpu.core_type<tc>, window_params = [{transform_indices = @transform_0, window_bounds = array<i64: 1, 8, 128>}, {pipeline_mode = #tpu.pipeline_mode<synchronous>, transform_indices = @transform_1, window_bounds = array<i64: 4, 15, 32>}, {pipeline_mode = #tpu.pipeline_mode<synchronous>, transform_indices = @transform_2, window_bounds = array<i64: 128, 384>}, {pipeline_mode = #tpu.pipeline_mode<synchronous>, transform_indices = @transform_3, window_bounds = array<i64: 1, 384>}, {pipeline_mode = #tpu.pipeline_mode<synchronous>, transform_indices = @transform_4, window_bounds = array<i64: 1, 128>}, {pipeline_mode = #tpu.pipeline_mode<synchronous>, transform_indices = @transform_5, window_bounds = array<i64: 1, 128>}, {pipeline_mode = #tpu.pipeline_mode<synchronous>, transform_indices = @transform_6, window_bounds = array<i64: 128, 128>}, {pipeline_mode = #tpu.pipeline_mode<synchronous>, transform_indices = @transform_7, window_bounds = array<i64: 1, 128>}, {pipeline_mode = #tpu.pipeline_mode<synchronous>, transform_indices = @transform_8, window_bounds = array<i64: 128, 256>}, {pipeline_mode = #tpu.pipeline_mode<synchronous>, transform_indices = @transform_9, window_bounds = array<i64: 1, 256>}, {pipeline_mode = #tpu.pipeline_mode<synchronous>, transform_indices = @transform_10, window_bounds = array<i64: 256, 128>}, {pipeline_mode = #tpu.pipeline_mode<synchronous>, transform_indices = @transform_11, window_bounds = array<i64: 1, 128>}, {transform_indices = @transform_12, window_bounds = array<i64: 1, 8, 128>}]} {
    %c0 = arith.constant 0 : index
    %c0_0 = arith.constant 0 : index
    %c0_1 = arith.constant 0 : index
    %0 = vector.load %arg1[%c0, %c0_0, %c0_1] : memref<1x8x128xf32, #tpu.memory_space<vmem>>, vector<1x8x128xf32>
    %1 = vector.shape_cast %0 : vector<1x8x128xf32> to vector<8x128xf32>
    %2 = arith.truncf %1 : vector<8x128xf32> to vector<8x128xbf16>
    %c0_2 = arith.constant 0 : index
    %c0_3 = arith.constant 0 : index
    %3 = vector.load %arg3[%c0_2, %c0_3] : memref<128x384xbf16, #tpu.memory_space<vmem>>, vector<128x384xbf16>
    %cst = arith.constant dense<0.000000e+00> : vector<8x384xf32>
    %4 = tpu.matmul %2, %3, %cst {dimension_numbers = #tpu.dot_dimension_numbers<[1], [0], [0], [1], [0, 0, 1, 1], [], []>} : vector<8x128xbf16>, vector<128x384xbf16>, vector<8x384xf32> -> vector<8x384xf32>
    %c0_4 = arith.constant 0 : index
    %c0_5 = arith.constant 0 : index
    %5 = vector.load %arg4[%c0_4, %c0_5] : memref<1x384xf32, #tpu.memory_space<vmem>>, vector<1x384xf32>
    %6 = vector.broadcast %5 : vector<1x384xf32> to vector<8x384xf32>
    %7 = arith.addf %4, %6 : vector<8x384xf32>
    %8 = vector.extract_strided_slice %7 {offsets = [0, 0], sizes = [8, 128], strides = [1, 1]} : vector<8x384xf32> to vector<8x128xf32>
    %9 = vector.extract_strided_slice %7 {offsets = [0, 128], sizes = [8, 128], strides = [1, 1]} : vector<8x384xf32> to vector<8x128xf32>
    %10 = arith.truncf %9 : vector<8x128xf32> to vector<8x128xbf16>
    %11 = vector.extract_strided_slice %7 {offsets = [0, 256], sizes = [8, 128], strides = [1, 1]} : vector<8x384xf32> to vector<8x128xf32>
    %12 = arith.truncf %11 : vector<8x128xf32> to vector<8x128xbf16>
    %c0_6 = arith.constant 0 : index
    %c0_7 = arith.constant 0 : index
    %13 = vector.load %arg5[%c0_6, %c0_7] : memref<1x128xf32, #tpu.memory_space<vmem>>, vector<1x128xf32>
    %14 = vector.broadcast %13 : vector<1x128xf32> to vector<8x128xf32>
    %15 = arith.addf %8, %14 : vector<8x128xf32>
    %16 = arith.truncf %15 : vector<8x128xf32> to vector<8x128xbf16>
    %c0_8 = arith.constant 0 : index
    %c0_9 = arith.constant 0 : index
    %17 = vector.load %arg6[%c0_8, %c0_9] : memref<1x128xf32, #tpu.memory_space<vmem>>, vector<1x128xf32>
    %18 = vector.broadcast %17 : vector<1x128xf32> to vector<8x128xf32>
    %19 = arith.addf %8, %18 : vector<8x128xf32>
    %20 = arith.truncf %19 : vector<8x128xf32> to vector<8x128xbf16>
    %c0_10 = arith.constant 0 : index
    %c0_11 = arith.constant 0 : index
    %c0_12 = arith.constant 0 : index
    %21 = vector.load %arg2[%c0_10, %c0_11, %c0_12] : memref<4x15x32xbf16, #tpu.memory_space<vmem>>, vector<1x15x32xbf16>
    %22 = vector.shape_cast %21 : vector<1x15x32xbf16> to vector<15x32xbf16>
    %23 = vector.extract_strided_slice %16 {offsets = [0, 0], sizes = [8, 32], strides = [1, 1]} : vector<8x128xbf16> to vector<8x32xbf16>
    %24 = vector.extract_strided_slice %10 {offsets = [0, 0], sizes = [8, 32], strides = [1, 1]} : vector<8x128xbf16> to vector<8x32xbf16>
    "tpu.trace_start"() <{level = 10 : i32, message = "td,sd->ts"}> : () -> ()
    %cst_13 = arith.constant dense<0.000000e+00> : vector<8x8xf32>
    %25 = tpu.matmul %23, %24, %cst_13 {dimension_numbers = #tpu.dot_dimension_numbers<[1], [1], [0], [0], [0, 0, 1, 0], [], []>} : vector<8x32xbf16>, vector<8x32xbf16>, vector<8x8xf32> -> vector<8x8xf32>
    "tpu.trace_stop"() : () -> ()
    %26 = vector.extract_strided_slice %20 {offsets = [0, 0], sizes = [8, 32], strides = [1, 1]} : vector<8x128xbf16> to vector<8x32xbf16>
    "tpu.trace_start"() <{level = 10 : i32, message = "td,ld->tl"}> : () -> ()
    %cst_14 = arith.constant dense<0.000000e+00> : vector<8x15xf32>
    %27 = tpu.matmul %26, %22, %cst_14 {dimension_numbers = #tpu.dot_dimension_numbers<[1], [1], [0], [0], [0, 0, 1, 0], [], []>} : vector<8x32xbf16>, vector<15x32xbf16>, vector<8x15xf32> -> vector<8x15xf32>
    "tpu.trace_stop"() : () -> ()
    %28 = vector.extract_strided_slice %27 {offsets = [0, 7], sizes = [1, 8], strides = [1, 1]} : vector<8x15xf32> to vector<1x8xf32>
    %29 = vector.extract_strided_slice %27 {offsets = [1, 6], sizes = [1, 8], strides = [1, 1]} : vector<8x15xf32> to vector<1x8xf32>
    %30 = vector.extract_strided_slice %27 {offsets = [2, 5], sizes = [1, 8], strides = [1, 1]} : vector<8x15xf32> to vector<1x8xf32>
    %31 = vector.extract_strided_slice %27 {offsets = [3, 4], sizes = [1, 8], strides = [1, 1]} : vector<8x15xf32> to vector<1x8xf32>
    %32 = vector.extract_strided_slice %27 {offsets = [4, 3], sizes = [1, 8], strides = [1, 1]} : vector<8x15xf32> to vector<1x8xf32>
    %33 = vector.extract_strided_slice %27 {offsets = [5, 2], sizes = [1, 8], strides = [1, 1]} : vector<8x15xf32> to vector<1x8xf32>
    %34 = vector.extract_strided_slice %27 {offsets = [6, 1], sizes = [1, 8], strides = [1, 1]} : vector<8x15xf32> to vector<1x8xf32>
    %35 = vector.extract_strided_slice %27 {offsets = [7, 0], sizes = [1, 8], strides = [1, 1]} : vector<8x15xf32> to vector<1x8xf32>
    %36 = tpu.concatenate %28, %29, %30, %31, %32, %33, %34, %35 in 0 : vector<1x8xf32>, vector<1x8xf32>, vector<1x8xf32>, vector<1x8xf32>, vector<1x8xf32>, vector<1x8xf32>, vector<1x8xf32>, vector<1x8xf32> -> vector<8x8xf32>
    %37 = arith.addf %25, %36 : vector<8x8xf32>
    %cst_15 = arith.constant dense<0xFF800000> : vector<8xf32>
    %38 = vector.multi_reduction <maximumf>, %37, %cst_15 [1] : vector<8x8xf32> to vector<8xf32>
    %39 = vector.shape_cast %38 : vector<8xf32> to vector<8x1xf32>
    %40 = vector.broadcast %39 : vector<8x1xf32> to vector<8x8xf32>
    %41 = arith.subf %37, %40 : vector<8x8xf32>
    %42 = math.exp %41 : vector<8x8xf32>
    %cst_16 = arith.constant dense<0.000000e+00> : vector<8xf32>
    %43 = vector.multi_reduction <add>, %42, %cst_16 [1] : vector<8x8xf32> to vector<8xf32>
    %44 = vector.shape_cast %43 : vector<8xf32> to vector<8x1xf32>
    %45 = tpu.reciprocal %44 {approx = true} : vector<8x1xf32> -> vector<8x1xf32>
    %46 = vector.broadcast %45 : vector<8x1xf32> to vector<8x8xf32>
    %47 = arith.mulf %42, %46 : vector<8x8xf32>
    %48 = arith.truncf %47 : vector<8x8xf32> to vector<8x8xbf16>
    %49 = vector.extract_strided_slice %12 {offsets = [0, 0], sizes = [8, 32], strides = [1, 1]} : vector<8x128xbf16> to vector<8x32xbf16>
    %cst_17 = arith.constant dense<0.000000e+00> : vector<8x32xf32>
    %50 = tpu.matmul %48, %49, %cst_17 {dimension_numbers = #tpu.dot_dimension_numbers<[1], [0], [0], [1], [0, 0, 1, 1], [], []>} : vector<8x8xbf16>, vector<8x32xbf16>, vector<8x32xf32> -> vector<8x32xf32>
    %c1 = arith.constant 1 : index
    %c0_18 = arith.constant 0 : index
    %c0_19 = arith.constant 0 : index
    %51 = vector.load %arg2[%c1, %c0_18, %c0_19] : memref<4x15x32xbf16, #tpu.memory_space<vmem>>, vector<1x15x32xbf16>
    %52 = vector.shape_cast %51 : vector<1x15x32xbf16> to vector<15x32xbf16>
    %53 = vector.extract_strided_slice %16 {offsets = [0, 32], sizes = [8, 32], strides = [1, 1]} : vector<8x128xbf16> to vector<8x32xbf16>
    %54 = vector.extract_strided_slice %10 {offsets = [0, 32], sizes = [8, 32], strides = [1, 1]} : vector<8x128xbf16> to vector<8x32xbf16>
    "tpu.trace_start"() <{level = 10 : i32, message = "td,sd->ts"}> : () -> ()
    %cst_20 = arith.constant dense<0.000000e+00> : vector<8x8xf32>
    %55 = tpu.matmul %53, %54, %cst_20 {dimension_numbers = #tpu.dot_dimension_numbers<[1], [1], [0], [0], [0, 0, 1, 0], [], []>} : vector<8x32xbf16>, vector<8x32xbf16>, vector<8x8xf32> -> vector<8x8xf32>
    "tpu.trace_stop"() : () -> ()
    %56 = vector.extract_strided_slice %20 {offsets = [0, 32], sizes = [8, 32], strides = [1, 1]} : vector<8x128xbf16> to vector<8x32xbf16>
    "tpu.trace_start"() <{level = 10 : i32, message = "td,ld->tl"}> : () -> ()
    %cst_21 = arith.constant dense<0.000000e+00> : vector<8x15xf32>
    %57 = tpu.matmul %56, %52, %cst_21 {dimension_numbers = #tpu.dot_dimension_numbers<[1], [1], [0], [0], [0, 0, 1, 0], [], []>} : vector<8x32xbf16>, vector<15x32xbf16>, vector<8x15xf32> -> vector<8x15xf32>
    "tpu.trace_stop"() : () -> ()
    %58 = vector.extract_strided_slice %57 {offsets = [0, 7], sizes = [1, 8], strides = [1, 1]} : vector<8x15xf32> to vector<1x8xf32>
    %59 = vector.extract_strided_slice %57 {offsets = [1, 6], sizes = [1, 8], strides = [1, 1]} : vector<8x15xf32> to vector<1x8xf32>
    %60 = vector.extract_strided_slice %57 {offsets = [2, 5], sizes = [1, 8], strides = [1, 1]} : vector<8x15xf32> to vector<1x8xf32>
    %61 = vector.extract_strided_slice %57 {offsets = [3, 4], sizes = [1, 8], strides = [1, 1]} : vector<8x15xf32> to vector<1x8xf32>
    %62 = vector.extract_strided_slice %57 {offsets = [4, 3], sizes = [1, 8], strides = [1, 1]} : vector<8x15xf32> to vector<1x8xf32>
    %63 = vector.extract_strided_slice %57 {offsets = [5, 2], sizes = [1, 8], strides = [1, 1]} : vector<8x15xf32> to vector<1x8xf32>
    %64 = vector.extract_strided_slice %57 {offsets = [6, 1], sizes = [1, 8], strides = [1, 1]} : vector<8x15xf32> to vector<1x8xf32>
    %65 = vector.extract_strided_slice %57 {offsets = [7, 0], sizes = [1, 8], strides = [1, 1]} : vector<8x15xf32> to vector<1x8xf32>
    %66 = tpu.concatenate %58, %59, %60, %61, %62, %63, %64, %65 in 0 : vector<1x8xf32>, vector<1x8xf32>, vector<1x8xf32>, vector<1x8xf32>, vector<1x8xf32>, vector<1x8xf32>, vector<1x8xf32>, vector<1x8xf32> -> vector<8x8xf32>
    %67 = arith.addf %55, %66 : vector<8x8xf32>
    %cst_22 = arith.constant dense<0xFF800000> : vector<8xf32>
    %68 = vector.multi_reduction <maximumf>, %67, %cst_22 [1] : vector<8x8xf32> to vector<8xf32>
    %69 = vector.shape_cast %68 : vector<8xf32> to vector<8x1xf32>
    %70 = vector.broadcast %69 : vector<8x1xf32> to vector<8x8xf32>
    %71 = arith.subf %67, %70 : vector<8x8xf32>
    %72 = math.exp %71 : vector<8x8xf32>
    %cst_23 = arith.constant dense<0.000000e+00> : vector<8xf32>
    %73 = vector.multi_reduction <add>, %72, %cst_23 [1] : vector<8x8xf32> to vector<8xf32>
    %74 = vector.shape_cast %73 : vector<8xf32> to vector<8x1xf32>
    %75 = tpu.reciprocal %74 {approx = true} : vector<8x1xf32> -> vector<8x1xf32>
    %76 = vector.broadcast %75 : vector<8x1xf32> to vector<8x8xf32>
    %77 = arith.mulf %72, %76 : vector<8x8xf32>
    %78 = arith.truncf %77 : vector<8x8xf32> to vector<8x8xbf16>
    %79 = vector.extract_strided_slice %12 {offsets = [0, 32], sizes = [8, 32], strides = [1, 1]} : vector<8x128xbf16> to vector<8x32xbf16>
    %cst_24 = arith.constant dense<0.000000e+00> : vector<8x32xf32>
    %80 = tpu.matmul %78, %79, %cst_24 {dimension_numbers = #tpu.dot_dimension_numbers<[1], [0], [0], [1], [0, 0, 1, 1], [], []>} : vector<8x8xbf16>, vector<8x32xbf16>, vector<8x32xf32> -> vector<8x32xf32>
    %c2 = arith.constant 2 : index
    %c0_25 = arith.constant 0 : index
    %c0_26 = arith.constant 0 : index
    %81 = vector.load %arg2[%c2, %c0_25, %c0_26] : memref<4x15x32xbf16, #tpu.memory_space<vmem>>, vector<1x15x32xbf16>
    %82 = vector.shape_cast %81 : vector<1x15x32xbf16> to vector<15x32xbf16>
    %83 = vector.extract_strided_slice %16 {offsets = [0, 64], sizes = [8, 32], strides = [1, 1]} : vector<8x128xbf16> to vector<8x32xbf16>
    %84 = vector.extract_strided_slice %10 {offsets = [0, 64], sizes = [8, 32], strides = [1, 1]} : vector<8x128xbf16> to vector<8x32xbf16>
    "tpu.trace_start"() <{level = 10 : i32, message = "td,sd->ts"}> : () -> ()
    %cst_27 = arith.constant dense<0.000000e+00> : vector<8x8xf32>
    %85 = tpu.matmul %83, %84, %cst_27 {dimension_numbers = #tpu.dot_dimension_numbers<[1], [1], [0], [0], [0, 0, 1, 0], [], []>} : vector<8x32xbf16>, vector<8x32xbf16>, vector<8x8xf32> -> vector<8x8xf32>
    "tpu.trace_stop"() : () -> ()
    %86 = vector.extract_strided_slice %20 {offsets = [0, 64], sizes = [8, 32], strides = [1, 1]} : vector<8x128xbf16> to vector<8x32xbf16>
    "tpu.trace_start"() <{level = 10 : i32, message = "td,ld->tl"}> : () -> ()
    %cst_28 = arith.constant dense<0.000000e+00> : vector<8x15xf32>
    %87 = tpu.matmul %86, %82, %cst_28 {dimension_numbers = #tpu.dot_dimension_numbers<[1], [1], [0], [0], [0, 0, 1, 0], [], []>} : vector<8x32xbf16>, vector<15x32xbf16>, vector<8x15xf32> -> vector<8x15xf32>
    "tpu.trace_stop"() : () -> ()
    %88 = vector.extract_strided_slice %87 {offsets = [0, 7], sizes = [1, 8], strides = [1, 1]} : vector<8x15xf32> to vector<1x8xf32>
    %89 = vector.extract_strided_slice %87 {offsets = [1, 6], sizes = [1, 8], strides = [1, 1]} : vector<8x15xf32> to vector<1x8xf32>
    %90 = vector.extract_strided_slice %87 {offsets = [2, 5], sizes = [1, 8], strides = [1, 1]} : vector<8x15xf32> to vector<1x8xf32>
    %91 = vector.extract_strided_slice %87 {offsets = [3, 4], sizes = [1, 8], strides = [1, 1]} : vector<8x15xf32> to vector<1x8xf32>
    %92 = vector.extract_strided_slice %87 {offsets = [4, 3], sizes = [1, 8], strides = [1, 1]} : vector<8x15xf32> to vector<1x8xf32>
    %93 = vector.extract_strided_slice %87 {offsets = [5, 2], sizes = [1, 8], strides = [1, 1]} : vector<8x15xf32> to vector<1x8xf32>
    %94 = vector.extract_strided_slice %87 {offsets = [6, 1], sizes = [1, 8], strides = [1, 1]} : vector<8x15xf32> to vector<1x8xf32>
    %95 = vector.extract_strided_slice %87 {offsets = [7, 0], sizes = [1, 8], strides = [1, 1]} : vector<8x15xf32> to vector<1x8xf32>
    %96 = tpu.concatenate %88, %89, %90, %91, %92, %93, %94, %95 in 0 : vector<1x8xf32>, vector<1x8xf32>, vector<1x8xf32>, vector<1x8xf32>, vector<1x8xf32>, vector<1x8xf32>, vector<1x8xf32>, vector<1x8xf32> -> vector<8x8xf32>
    %97 = arith.addf %85, %96 : vector<8x8xf32>
    %cst_29 = arith.constant dense<0xFF800000> : vector<8xf32>
    %98 = vector.multi_reduction <maximumf>, %97, %cst_29 [1] : vector<8x8xf32> to vector<8xf32>
    %99 = vector.shape_cast %98 : vector<8xf32> to vector<8x1xf32>
    %100 = vector.broadcast %99 : vector<8x1xf32> to vector<8x8xf32>
    %101 = arith.subf %97, %100 : vector<8x8xf32>
    %102 = math.exp %101 : vector<8x8xf32>
    %cst_30 = arith.constant dense<0.000000e+00> : vector<8xf32>
    %103 = vector.multi_reduction <add>, %102, %cst_30 [1] : vector<8x8xf32> to vector<8xf32>
    %104 = vector.shape_cast %103 : vector<8xf32> to vector<8x1xf32>
    %105 = tpu.reciprocal %104 {approx = true} : vector<8x1xf32> -> vector<8x1xf32>
    %106 = vector.broadcast %105 : vector<8x1xf32> to vector<8x8xf32>
    %107 = arith.mulf %102, %106 : vector<8x8xf32>
    %108 = arith.truncf %107 : vector<8x8xf32> to vector<8x8xbf16>
    %109 = vector.extract_strided_slice %12 {offsets = [0, 64], sizes = [8, 32], strides = [1, 1]} : vector<8x128xbf16> to vector<8x32xbf16>
    %cst_31 = arith.constant dense<0.000000e+00> : vector<8x32xf32>
    %110 = tpu.matmul %108, %109, %cst_31 {dimension_numbers = #tpu.dot_dimension_numbers<[1], [0], [0], [1], [0, 0, 1, 1], [], []>} : vector<8x8xbf16>, vector<8x32xbf16>, vector<8x32xf32> -> vector<8x32xf32>
    %c3 = arith.constant 3 : index
    %c0_32 = arith.constant 0 : index
    %c0_33 = arith.constant 0 : index
    %111 = vector.load %arg2[%c3, %c0_32, %c0_33] : memref<4x15x32xbf16, #tpu.memory_space<vmem>>, vector<1x15x32xbf16>
    %112 = vector.shape_cast %111 : vector<1x15x32xbf16> to vector<15x32xbf16>
    %113 = vector.extract_strided_slice %16 {offsets = [0, 96], sizes = [8, 32], strides = [1, 1]} : vector<8x128xbf16> to vector<8x32xbf16>
    %114 = vector.extract_strided_slice %10 {offsets = [0, 96], sizes = [8, 32], strides = [1, 1]} : vector<8x128xbf16> to vector<8x32xbf16>
    "tpu.trace_start"() <{level = 10 : i32, message = "td,sd->ts"}> : () -> ()
    %cst_34 = arith.constant dense<0.000000e+00> : vector<8x8xf32>
    %115 = tpu.matmul %113, %114, %cst_34 {dimension_numbers = #tpu.dot_dimension_numbers<[1], [1], [0], [0], [0, 0, 1, 0], [], []>} : vector<8x32xbf16>, vector<8x32xbf16>, vector<8x8xf32> -> vector<8x8xf32>
    "tpu.trace_stop"() : () -> ()
    %116 = vector.extract_strided_slice %20 {offsets = [0, 96], sizes = [8, 32], strides = [1, 1]} : vector<8x128xbf16> to vector<8x32xbf16>
    "tpu.trace_start"() <{level = 10 : i32, message = "td,ld->tl"}> : () -> ()
    %cst_35 = arith.constant dense<0.000000e+00> : vector<8x15xf32>
    %117 = tpu.matmul %116, %112, %cst_35 {dimension_numbers = #tpu.dot_dimension_numbers<[1], [1], [0], [0], [0, 0, 1, 0], [], []>} : vector<8x32xbf16>, vector<15x32xbf16>, vector<8x15xf32> -> vector<8x15xf32>
    "tpu.trace_stop"() : () -> ()
    %118 = vector.extract_strided_slice %117 {offsets = [0, 7], sizes = [1, 8], strides = [1, 1]} : vector<8x15xf32> to vector<1x8xf32>
    %119 = vector.extract_strided_slice %117 {offsets = [1, 6], sizes = [1, 8], strides = [1, 1]} : vector<8x15xf32> to vector<1x8xf32>
    %120 = vector.extract_strided_slice %117 {offsets = [2, 5], sizes = [1, 8], strides = [1, 1]} : vector<8x15xf32> to vector<1x8xf32>
    %121 = vector.extract_strided_slice %117 {offsets = [3, 4], sizes = [1, 8], strides = [1, 1]} : vector<8x15xf32> to vector<1x8xf32>
    %122 = vector.extract_strided_slice %117 {offsets = [4, 3], sizes = [1, 8], strides = [1, 1]} : vector<8x15xf32> to vector<1x8xf32>
    %123 = vector.extract_strided_slice %117 {offsets = [5, 2], sizes = [1, 8], strides = [1, 1]} : vector<8x15xf32> to vector<1x8xf32>
    %124 = vector.extract_strided_slice %117 {offsets = [6, 1], sizes = [1, 8], strides = [1, 1]} : vector<8x15xf32> to vector<1x8xf32>
    %125 = vector.extract_strided_slice %117 {offsets = [7, 0], sizes = [1, 8], strides = [1, 1]} : vector<8x15xf32> to vector<1x8xf32>
    %126 = tpu.concatenate %118, %119, %120, %121, %122, %123, %124, %125 in 0 : vector<1x8xf32>, vector<1x8xf32>, vector<1x8xf32>, vector<1x8xf32>, vector<1x8xf32>, vector<1x8xf32>, vector<1x8xf32>, vector<1x8xf32> -> vector<8x8xf32>
    %127 = arith.addf %115, %126 : vector<8x8xf32>
    %cst_36 = arith.constant dense<0xFF800000> : vector<8xf32>
    %128 = vector.multi_reduction <maximumf>, %127, %cst_36 [1] : vector<8x8xf32> to vector<8xf32>
    %129 = vector.shape_cast %128 : vector<8xf32> to vector<8x1xf32>
    %130 = vector.broadcast %129 : vector<8x1xf32> to vector<8x8xf32>
    %131 = arith.subf %127, %130 : vector<8x8xf32>
    %132 = math.exp %131 : vector<8x8xf32>
    %cst_37 = arith.constant dense<0.000000e+00> : vector<8xf32>
    %133 = vector.multi_reduction <add>, %132, %cst_37 [1] : vector<8x8xf32> to vector<8xf32>
    %134 = vector.shape_cast %133 : vector<8xf32> to vector<8x1xf32>
    %135 = tpu.reciprocal %134 {approx = true} : vector<8x1xf32> -> vector<8x1xf32>
    %136 = vector.broadcast %135 : vector<8x1xf32> to vector<8x8xf32>
    %137 = arith.mulf %132, %136 : vector<8x8xf32>
    %138 = arith.truncf %137 : vector<8x8xf32> to vector<8x8xbf16>
    %139 = vector.extract_strided_slice %12 {offsets = [0, 96], sizes = [8, 32], strides = [1, 1]} : vector<8x128xbf16> to vector<8x32xbf16>
    %cst_38 = arith.constant dense<0.000000e+00> : vector<8x32xf32>
    %140 = tpu.matmul %138, %139, %cst_38 {dimension_numbers = #tpu.dot_dimension_numbers<[1], [0], [0], [1], [0, 0, 1, 1], [], []>} : vector<8x8xbf16>, vector<8x32xbf16>, vector<8x32xf32> -> vector<8x32xf32>
    %141 = tpu.concatenate %50, %80, %110, %140 in 1 : vector<8x32xf32>, vector<8x32xf32>, vector<8x32xf32>, vector<8x32xf32> -> vector<8x128xf32>
    %142 = arith.truncf %141 : vector<8x128xf32> to vector<8x128xbf16>
    %c0_39 = arith.constant 0 : index
    %c0_40 = arith.constant 0 : index
    %143 = vector.load %arg7[%c0_39, %c0_40] : memref<128x128xbf16, #tpu.memory_space<vmem>>, vector<128x128xbf16>
    %cst_41 = arith.constant dense<0.000000e+00> : vector<8x128xf32>
    %144 = tpu.matmul %142, %143, %cst_41 {dimension_numbers = #tpu.dot_dimension_numbers<[1], [0], [0], [1], [0, 0, 1, 1], [], []>} : vector<8x128xbf16>, vector<128x128xbf16>, vector<8x128xf32> -> vector<8x128xf32>
    %c0_42 = arith.constant 0 : index
    %c0_43 = arith.constant 0 : index
    %145 = vector.load %arg8[%c0_42, %c0_43] : memref<1x128xf32, #tpu.memory_space<vmem>>, vector<1x128xf32>
    %146 = vector.broadcast %145 : vector<1x128xf32> to vector<8x128xf32>
    %147 = arith.addf %144, %146 : vector<8x128xf32>
    %148 = arith.addf %1, %147 : vector<8x128xf32>
    %149 = arith.truncf %148 : vector<8x128xf32> to vector<8x128xbf16>
    %c0_44 = arith.constant 0 : index
    %c0_45 = arith.constant 0 : index
    %150 = vector.load %arg9[%c0_44, %c0_45] : memref<128x256xbf16, #tpu.memory_space<vmem>>, vector<128x256xbf16>
    %cst_46 = arith.constant dense<0.000000e+00> : vector<8x256xf32>
    %151 = tpu.matmul %149, %150, %cst_46 {dimension_numbers = #tpu.dot_dimension_numbers<[1], [0], [0], [1], [0, 0, 1, 1], [], []>} : vector<8x128xbf16>, vector<128x256xbf16>, vector<8x256xf32> -> vector<8x256xf32>
    %c0_47 = arith.constant 0 : index
    %c0_48 = arith.constant 0 : index
    %152 = vector.load %arg10[%c0_47, %c0_48] : memref<1x256xf32, #tpu.memory_space<vmem>>, vector<1x256xf32>
    %153 = vector.broadcast %152 : vector<1x256xf32> to vector<8x256xf32>
    %154 = arith.addf %151, %153 : vector<8x256xf32>
    %cst_49 = arith.constant 1.000000e+00 : f32
    %155 = vector.broadcast %cst_49 : f32 to vector<8x256xf32>
    %156 = arith.subf %154, %155 : vector<8x256xf32>
    %157 = arith.negf %156 : vector<8x256xf32>
    %158 = math.exp %157 : vector<8x256xf32>
    %cst_50 = arith.constant 1.000000e+00 : f32
    %159 = vector.broadcast %cst_50 : f32 to vector<8x256xf32>
    %160 = arith.addf %159, %158 : vector<8x256xf32>
    %161 = arith.divf %159, %160 : vector<8x256xf32>
    %162 = arith.mulf %154, %161 : vector<8x256xf32>
    %163 = arith.truncf %162 : vector<8x256xf32> to vector<8x256xbf16>
    %c0_51 = arith.constant 0 : index
    %c0_52 = arith.constant 0 : index
    %164 = vector.load %arg11[%c0_51, %c0_52] : memref<256x128xbf16, #tpu.memory_space<vmem>>, vector<256x128xbf16>
    %cst_53 = arith.constant dense<0.000000e+00> : vector<8x128xf32>
    %165 = tpu.matmul %163, %164, %cst_53 {dimension_numbers = #tpu.dot_dimension_numbers<[1], [0], [0], [1], [0, 0, 1, 1], [], []>} : vector<8x256xbf16>, vector<256x128xbf16>, vector<8x128xf32> -> vector<8x128xf32>
    %c0_54 = arith.constant 0 : index
    %c0_55 = arith.constant 0 : index
    %166 = vector.load %arg12[%c0_54, %c0_55] : memref<1x128xf32, #tpu.memory_space<vmem>>, vector<1x128xf32>
    %167 = vector.broadcast %166 : vector<1x128xf32> to vector<8x128xf32>
    %168 = arith.addf %165, %167 : vector<8x128xf32>
    %169 = arith.addf %148, %168 : vector<8x128xf32>
    %170 = arith.mulf %169, %169 : vector<8x128xf32>
    %cst_56 = arith.constant dense<0.000000e+00> : vector<8xf32>
    %171 = vector.multi_reduction <add>, %170, %cst_56 [1] : vector<8x128xf32> to vector<8xf32>
    %172 = vector.shape_cast %171 : vector<8xf32> to vector<8x1xf32>
    %cst_57 = arith.constant 1.280000e+02 : f32
    %173 = vector.broadcast %cst_57 : f32 to vector<8x1xf32>
    %174 = arith.divf %172, %173 : vector<8x1xf32>
    %cst_58 = arith.constant 2.500000e-01 : f32
    %175 = vector.broadcast %cst_58 : f32 to vector<8x1xf32>
    %176 = arith.addf %174, %175 : vector<8x1xf32>
    %177 = math.rsqrt %176 : vector<8x1xf32>
    %178 = vector.broadcast %177 : vector<8x1xf32> to vector<8x128xf32>
    %179 = arith.mulf %169, %178 : vector<8x128xf32>
    %c0_59 = arith.constant 0 : index
    %c0_60 = arith.constant 0 : index
    %c0_61 = arith.constant 0 : index
    %180 = vector.load %arg13[%c0_59, %c0_60, %c0_61] : memref<1x8x128xf32, #tpu.memory_space<vmem>>, vector<1x8x128xf32>
    %181 = vector.shape_cast %180 : vector<1x8x128xf32> to vector<8x128xf32>
    %182 = vector.shape_cast %179 : vector<8x128xf32> to vector<1x8x128xf32>
    tpu.vector_store %arg13[%c0_59, %c0_60, %c0_61], %182 {strides = array<i32>} : memref<1x8x128xf32, #tpu.memory_space<vmem>>, vector<1x8x128xf32>,
    return
  }
  func.func @transform_0(%arg0: i32) -> (i32, i32, i32) {
    %c0_i32 = arith.constant 0 : i32
    %c0_i32_0 = arith.constant 0 : i32
    %c0_i32_1 = arith.constant 0 : i32
    return %arg0, %c0_i32, %c0_i32_0 : i32, i32, i32
  }
  func.func @transform_1(%arg0: i32) -> (i32, i32, i32) {
    %c0_i32 = arith.constant 0 : i32
    %c0_i32_0 = arith.constant 0 : i32
    %c0_i32_1 = arith.constant 0 : i32
    %c0_i32_2 = arith.constant 0 : i32
    return %c0_i32, %c0_i32_0, %c0_i32_1 : i32, i32, i32
  }
  func.func @transform_2(%arg0: i32) -> (i32, i32) {
    %c0_i32 = arith.constant 0 : i32
    %c0_i32_0 = arith.constant 0 : i32
    %c0_i32_1 = arith.constant 0 : i32
    return %c0_i32, %c0_i32_0 : i32, i32
  }
  func.func @transform_3(%arg0: i32) -> (i32, i32) {
    %c0_i32 = arith.constant 0 : i32
    %c0_i32_0 = arith.constant 0 : i32
    %c0_i32_1 = arith.constant 0 : i32
    return %c0_i32, %c0_i32_0 : i32, i32
  }
  func.func @transform_4(%arg0: i32) -> (i32, i32) {
    %c0_i32 = arith.constant 0 : i32
    %c0_i32_0 = arith.constant 0 : i32
    %c0_i32_1 = arith.constant 0 : i32
    return %c0_i32, %c0_i32_0 : i32, i32
  }
  func.func @transform_5(%arg0: i32) -> (i32, i32) {
    %c0_i32 = arith.constant 0 : i32
    %c0_i32_0 = arith.constant 0 : i32
    %c0_i32_1 = arith.constant 0 : i32
    return %c0_i32, %c0_i32_0 : i32, i32
  }
  func.func @transform_6(%arg0: i32) -> (i32, i32) {
    %c0_i32 = arith.constant 0 : i32
    %c0_i32_0 = arith.constant 0 : i32
    %c0_i32_1 = arith.constant 0 : i32
    return %c0_i32, %c0_i32_0 : i32, i32
  }
  func.func @transform_7(%arg0: i32) -> (i32, i32) {
    %c0_i32 = arith.constant 0 : i32
    %c0_i32_0 = arith.constant 0 : i32
    %c0_i32_1 = arith.constant 0 : i32
    return %c0_i32, %c0_i32_0 : i32, i32
  }
  func.func @transform_8(%arg0: i32) -> (i32, i32) {
    %c0_i32 = arith.constant 0 : i32
    %c0_i32_0 = arith.constant 0 : i32
    %c0_i32_1 = arith.constant 0 : i32
    return %c0_i32, %c0_i32_0 : i32, i32
  }
  func.func @transform_9(%arg0: i32) -> (i32, i32) {
    %c0_i32 = arith.constant 0 : i32
    %c0_i32_0 = arith.constant 0 : i32
    %c0_i32_1 = arith.constant 0 : i32
    return %c0_i32, %c0_i32_0 : i32, i32
  }
  func.func @transform_10(%arg0: i32) -> (i32, i32) {
    %c0_i32 = arith.constant 0 : i32
    %c0_i32_0 = arith.constant 0 : i32
    %c0_i32_1 = arith.constant 0 : i32
    return %c0_i32, %c0_i32_0 : i32, i32
  }
  func.func @transform_11(%arg0: i32) -> (i32, i32) {
    %c0_i32 = arith.constant 0 : i32
    %c0_i32_0 = arith.constant 0 : i32
    %c0_i32_1 = arith.constant 0 : i32
    return %c0_i32, %c0_i32_0 : i32, i32
  }
  func.func @transform_12(%arg0: i32) -> (i32, i32, i32) {
    %c0_i32 = arith.constant 0 : i32
    %c0_i32_0 = arith.constant 0 : i32
    %c0_i32_1 = arith.constant 0 : i32
    return %arg0, %c0_i32, %c0_i32_0 : i32, i32, i32
  }
}

</mosaic_0001>

<bundles_post_ra>
// kernel: tpu_custom_call.1
= control target key start
LH: loop header
LB: loop body
LE: loop exit
PB: predicated region body
PF: predicated region fallthrough
CT: control target
= control target key end

     0   :  { %s3372_s0 = inlined_call_operand.hbm [shape: f32[2,8,128], index: 0, kind: input, shape index: {}]   ;;  %s3373_s1 = inlined_call_operand.vmem [shape: bf16[4,15,32], index: 1, kind: input, shape index: {}]   ;;  %s3374_s2 = inlined_call_operand.hbm [shape: bf16[128,384], index: 2, kind: input, shape index: {}]   ;;  %s3375_s3 = inlined_call_operand.vmem [shape: f32[1,384], index: 3, kind: input, shape index: {}]   ;;  %s3376_s4 = inlined_call_operand.vmem [shape: f32[1,128], index: 4, kind: input, shape index: {}]   ;;  %s3377_s5 = inlined_call_operand.vmem [shape: f32[1,128], index: 5, kind: input, shape index: {}]   ;;  %s3378_s6 = inlined_call_operand.vmem [shape: bf16[128,128], index: 6, kind: input, shape index: {}]   ;;  %s3379_s7 = inlined_call_operand.vmem [shape: f32[1,128], index: 7, kind: input, shape index: {}]   ;;  %s3380_s8 = inlined_call_operand.hbm [shape: bf16[128,256], index: 8, kind: input, shape index: {}]   ;;  %s3381_s9 = inlined_call_operand.vmem [shape: f32[1,256], index: 9, kind: input, shape index: {}]   ;;  %s3382_s10 = inlined_call_operand.hbm [shape: bf16[256,128], index: 10, kind: input, shape index: {}]   ;;  %s3383_s11 = inlined_call_operand.vmem [shape: f32[1,128], index: 11, kind: input, shape index: {}]   ;;  %s3384_s12 = inlined_call_operand.hbm [shape: f32[2,8,128], index: 12, kind: output, shape index: {}]  }
   0x1   :  { %3392 = sst [smem:[#allocation19_spill]] %s3374_s2 }
   0x2   :  { %3393 = sst [smem:[#allocation20_spill]] %s3380_s8 }
   0x3   :  { %3394 = sst [smem:[#allocation21_spill]] %s3382_s10 }
   0x4   :  { %17 = vsyncpa [#allocation3], 0 }
   0x5   :  { %19 = vsyncpa [#allocation3 + $0x1], 0 }
   0x6   :  { %20 = vsyncpa [#allocation6], 0 }
   0x7   :  { %21 = vsyncpa [#allocation9], 0 }
   0x8   :  { %22 = vsyncpa [#allocation4], 0 }
   0x9   :  { %24 = vsyncpa [#allocation4 + $0x1], 0  ;;  %s2915_s21 = smov 0   ;;  %s2917_s22 = smov 0  }
   0xa   :  { %s2919_s23 = smov 0   ;;  %s2921_s24 = smov 0  }
   0xb LB: > { %3395 = sst [smem:[#allocation15_spill]] %s2811_s21  ;;  %s2936_s25 = sadd.s32 4294967295, %s2823_s24   ;;  %s2823_s24 = sphi %s2921_s24, %s3424_s24   ;;  %s2819_s23 = sphi %s2919_s23, %s3421_s23   ;;  %s2815_s22 = sphi %s2917_s22, %s3423_s22   ;;  %s2811_s21 = sphi %s2915_s21, %s3422_s21  }
   0xc   : > { %3396 = sst [smem:[#allocation16_spill]] %s2819_s23  ;;  %s2150_s26 = sadd.s32 4294967294, %s2823_s24  }
   0xd   : > { %p50_p0 = scmp.ne.s32.totalorder %s2815_s22, %s2811_s21  ;;  %p3385_p1 = scmp.eq.s32.totalorder %s2936_s25, 0 }
   0xe   : > { %p311_p3 = scmp.eq.s32.totalorder %s2150_s26, 1  ;;  %p2151_p5 = scmp.ge.s32.totalorder %s2823_s24, 1 }
   0xf   : > { %p2945_p4 = por %p3385_p1, %p50_p0  ;;  %p318_p7 = scmp.lt.s32.totalorder %s2823_s24, 3 }
  0x10   : > { %p2950_p6 = por %p311_p3, %p50_p0  ;;  %s2825_s30 = smov [#allocation5]  }
  0x11   : > { %s3397_s27 = scalar_select %p2945_p4, 1, 0 }
  0x12   : > { %s3398_s28 = scalar_select %p2950_p6, 1, 0 }
  0x13   : > { %p2955_p8 = pnand %p2151_p5, %p318_p7  ;;  %s333_s13 = sshll.u32 %s2825_s30, 4  ;;  %s334_s13 = int_to_ptr.vmem [resolvable:$true] %s333_s13 }
  0x14   : > { %3399 = sst [smem:[#allocation17_spill]] %s3398_s28  ;;  %s2826_s15 = smov [#allocation7]  }
  0x15   : > { %s3400_s29 = scalar_select %p2955_p8, 1, 0 }
  0x16   : > { %p2454_p9 = pneg %p2955_p8  ;;  %s361_s16 = sshll.u32 %s2826_s15, 4  ;;  %s362_s16 = int_to_ptr.vmem [resolvable:$true] %s361_s16 }
  0x17   : > { %s2656_s17 = scalar_lea.vmem %s334_s13, 3072  ;;  %p2664_p5 = scmp.lt.s32.totalorder %s334_s13, %s334_s13 }
  0x18   : > { %p2964_p11 = pnand %p2454_p9, %p3385_p1  ;;  %p2657_p13 = scmp.ne.s32.totalorder %s334_s13, %s2656_s17 }
  0x19   : > { %p2665_p7 = scmp.lt.s32.totalorder %s2656_s17, %s2656_s17 }
  0x1a   : > { %p2647_p12 = pneg %p2964_p11 }
  0x1b   : > { %p2666_p10 = por %p2665_p7, %p2664_p5 }
  0x1c   : > { %p2659_p0 = pnand %p2657_p13, %p2647_p12 }
  0x1e   : > { %p2660_p3 = pneg %p2659_p0 }
  0x20   : > { %p2667_p9 = pnand %p2666_p10, %p2660_p3 }
  0x22   : > { %2670 = shalt.err (!%p2667_p9)
}
  0x23   : > { %s2827_s18 = smov 192   ;;  %s2828_s19 = smov 12  }
  0x24   : > { %s3402_s2 = sld [smem:[#allocation19_spill]]  ;;  %s2682_s30 = scalar_lea.vmem %s362_s16, 2048 }
  0x25   : > { %p2683_p1 = scmp.ne.s32.totalorder %s362_s16, %s2682_s30  ;;  %p2690_p2 = scmp.lt.s32.totalorder %s362_s16, %s362_s16 }
  0x26   : > { %p2691_p6 = scmp.lt.s32.totalorder %s2682_s30, %s2682_s30 }
  0x27   : > { %p2685_p13 = pnand %p2683_p1, %p2647_p12 }
  0x28   : > { %p2692_p5 = por %p2691_p6, %p2690_p2 }
  0x29   : > { %p2686_p0 = pneg %p2685_p13 }
  0x2a   : > { %2457 = dma.hbm_to_vmem [thread:$0]  (!%p2964_p11), %s3402_s2, 3072, %s334_s13, [#allocation6], %s2827_s18, %s2827_s18, %s2828_s19  }
  0x2b   : > { %p2693_p10 = pnand %p2692_p5, %p2686_p0 }
  0x2d   : > { %2696 = shalt.err (!%p2693_p10)
}
  0x2e   : > { %s2829_s15 = smov 128   ;;  %s2830_s17 = smov 8  }
  0x2f   : > { %s3403_s8 = sld [smem:[#allocation20_spill]]  ;;  %s2831_s13 = smov [#allocation8]  }
  0x30   : > { %s377_s18 = sshll.u32 %s2831_s13, 4  ;;  %s378_s18 = int_to_ptr.vmem [resolvable:$true] %s377_s18 }
  0x31   : > { %s2708_s19 = scalar_lea.vmem %s378_s18, 2048  ;;  %p2716_p6 = scmp.lt.s32.totalorder %s378_s18, %s378_s18 }
  0x32   : > { %p2709_p1 = scmp.ne.s32.totalorder %s378_s18, %s2708_s19  ;;  %p2717_p7 = scmp.lt.s32.totalorder %s2708_s19, %s2708_s19 }
  0x34   : > { %p2711_p3 = pnand %p2709_p1, %p2647_p12  ;;  %p2718_p9 = por %p2717_p7, %p2716_p6 }
  0x35   : > { %2460 = dma.hbm_to_vmem [thread:$0]  (!%p2964_p11), %s3403_s8, 2048, %s362_s16, [#allocation6], %s2829_s15, %s2829_s15, %s2830_s17  }
  0x36   : > { %p2712_p2 = pneg %p2711_p3 }
  0x38   : > { %p2719_p13 = pnand %p2718_p9, %p2712_p2 }
  0x3a   : > { %2722 = shalt.err (!%p2719_p13)
}
  0x3b   : > { %s2832_s20 = smov 64   ;;  %s2833_s21 = smov 4  }
  0x3c   : > { %s3404_s10 = sld [smem:[#allocation21_spill]]  ;;  %s2995_s26 = sadd.s32 1, %s2823_s24  }
  0x3d   : > { %s34_s30 = ssub.s32 %s2823_s24, %s2995_s26  ;;  %s37_s15 = sadd.s32 1, %s2819_s23 }
  0x3e   : > { %p35_p12 = scmp.eq.s32.totalorder %s34_s30, 0  ;;  %p44_p0 = scmp.ne.s32.totalorder %s2819_s23, %s2815_s22 }
  0x3f   : > { %p45_p5 = scmp.eq.s32.totalorder %s2823_s24, 0  ;;  %p2475_p10 = scmp.lt.s32.totalorder %s2823_s24, 2 }
  0x40   : > { %s3005_s17 = scalar_select %p35_p12, %s2819_s23, %s37_s15  }
  0x41   : > { %p46_p1 = por %p45_p5, %p44_p0  ;;  %p3406_p3 = scmp.eq.s32.totalorder %s2936_s25, 1 }
  0x42   : > { %2463 = dma.hbm_to_vmem [thread:$0]  (!%p2964_p11), %s3404_s10, 2048, %s378_s18, [#allocation9], %s2832_s20, %s2832_s20, %s2833_s21  }
  0x43   : > { %3405 = sst [smem:[#allocation18_spill]] %s3005_s17  ;;  %p3009_p2 = por %p3406_p3, %p44_p0 }
  0x44   : > { %s394_s14 = sand.u32 1, %s2819_s23   ;;  %s2157_s19 = sshll.u32 %s2823_s24, 7 }
  0x45   : > { %s3407_s13 = scalar_select %p3009_p2, 1, 0 }
  0x46   : > { %s2156_s18 = sshll.u32 %s394_s14, 3  ;;  %s3018_s28 = scalar_lea.hbm %s3372_s0, %s2157_s19 }
  0x47   : > { %s398_s16 = scalar_lea.vmem [#allocation2], %s2156_s18  ;;  %p3020_p11 = pnand %p2475_p10, %p46_p1 }
  0x48   : > { %s405_s30 = sshll.u32 %s398_s16, 4  ;;  %s395_s2 = scalar_lea.sflag [#allocation3], %s394_s14  ;;  %s406_s30 = int_to_ptr.vmem [resolvable:$true] %s405_s30 }
  0x49   : > { %s2723_s8 = scalar_lea.hbm %s3018_s28, 128  ;;  %p2725_p7 = pneg %p3020_p11 }
  0x4a   : > { %p2724_p6 = scmp.ne.s32.totalorder %s3018_s28, %s2723_s8  ;;  %s2728_s21 = scalar_lea.hbm %s3372_s0, 256 }
  0x4b   : > { %p2729_p12 = scmp.lt.s32.totalorder %s3018_s28, %s3372_s0  ;;  %p2730_p0 = scmp.lt.s32.totalorder %s2728_s21, %s2723_s8 }
  0x4c   : > { %p2726_p9 = pnand %p2725_p7, %p2724_p6 }
  0x4d   : > { %p2731_p5 = por %p2730_p0, %p2729_p12 }
  0x4e   : > { %p2727_p13 = pneg %p2726_p9 }
  0x50   : > { %p2732_p10 = pnand %p2731_p5, %p2727_p13 }
  0x52   : > { %2735 = shalt.err (!%p2732_p10)
}
  0x53   : > { %s2736_s16 = scalar_lea.vmem %s406_s30, 128  ;;  %s2834_s14 = smov [#allocation2]  }
  0x54   : > { %p2737_p1 = scmp.ne.s32.totalorder %s406_s30, %s2736_s16  ;;  %s2741_s17 = sshll.u32 %s2834_s14, 4  ;;  %s2742_s17 = int_to_ptr.vmem [resolvable:$false] %s2741_s17 }
  0x55   : > { %s2743_s23 = scalar_lea.vmem %s2742_s17, 256  ;;  %p2744_p6 = scmp.lt.s32.totalorder %s406_s30, %s2742_s17 }
  0x56   : > { %p2739_p3 = pnand %p2737_p1, %p2725_p7  ;;  %p2745_p9 = scmp.lt.s32.totalorder %s2743_s23, %s2736_s16 }
  0x58   : > { %p2740_p2 = pneg %p2739_p3  ;;  %p2746_p4 = por %p2745_p9, %p2744_p6 }
  0x5a   : > { %p2747_p8 = pnand %p2746_p4, %p2740_p2 }
  0x5c   : > { %2750 = shalt.err (!%p2747_p8)
}
  0x5d   : > { %2467 = dma.hbm_to_vmem [thread:$0]  (!%p3020_p11), %s3018_s28, 128, %s406_s30, %s395_s2  }
  0x5e   : > { %p3409_p13 = scmp.ne.s32.totalorder %s3400_s29, 0 }
  0x5f   : > { %s3041_s8 = sand.u32 (!%p3409_p13), 1, %s2815_s22   ;;  %p3410_p4 = scmp.ne.s32.totalorder (!%p3409_p13), %s3397_s27, 0 }
  0x60   : > { %414 = sbr.rel (%p3409_p13) target bundleno = 4008 (0xfa8), region = 68  ;;  %s2159_s10 = sshll.u32 (!%p3409_p13), %s3041_s8, 3 }
  0x61   : > { %s417_s17 = scalar_lea.sflag (!%p3409_p13), [#allocation3], %s3041_s8  ;;  %s3047_s23 = scalar_lea.vmem (!%p3409_p13), [#allocation2], %s2159_s10 }
  0x65   : > { %2794 = dma.done.wait (%p3410_p4), %s417_s17, 128  }
  0x66   : > { %2796 = vsyncadd (%p3410_p4), %s417_s17, 4294967168  ;;  %p3411_p8 = scmp.eq.s32.totalorder %s2936_s25, 0 }
  0x68   : > { %2798 = dma.done.wait (%p3411_p8), [#allocation6], 5120   ;;  %p3412_p2 = pmov %p3411_p8 }
  0x6a   : > { %2800 = vsyncadd (%p3412_p2), [#allocation6], 4294962176  ;;  %p3413_p11 = pmov %p3412_p2 }
  0x6b   : > { %p3414_p7 = pmov %p3412_p2 }
  0x6c   : > { %2802 = dma.done.wait (%p3413_p11), [#allocation9], 2048  }
  0x6d   : > { %2804 = vsyncadd (%p3414_p7), [#allocation9], 4294965248  ;;  %v2835_v0 = vmov 0   ;;  %v2836_v1 = vmov 0.0   ;;  %vm2837_vm0 = vmmov 0   ;;  %v3069_v23 = vld [vmem:[%s3047_s23] sm:$0xff]  ;;  %v510_v30 = vlaneseq }
  0x6e   : > { %685 = vmatprep.mubr.bf16.mxu0 %v2835_v0  ;;  %2326 = vmatprep.subr.bf16.mxu1 %v2836_v1  ;;  %v2535_v2 = vld [vmem:[#allocation5 + $0xac] ss:$12 sps:$4 sm:$0xff]   ;;  %v2537_v3 = vld [vmem:[#allocation5 + $0xa8] ss:$12 sps:$4 sm:$0xff]   ;;  %v2540_v5 = vld [vmem:[#allocation5 + $0x90] ss:$12 sps:$4 sm:$0xff]   ;;  %v475_v26 = vpack.c.bf16 %v3069_v23, %v3069_v23 }
  0x6f   : > { %2342 = vmatprep.mubr.msk.bf16.mxu1 %vm2837_vm0, %v2836_v1  ;;  %653 = vmatprep.subr.bf16.mxu0 %v2535_v2  ;;  %v2538_v4 = vld [vmem:[#allocation5 + $0x94] ss:$12 sps:$4 sm:$0xff]   ;;  %v2541_v6 = vld [vmem:[#allocation5 + $0x7c] ss:$12 sps:$4 sm:$0xff]   ;;  %v2543_v7 = vld [vmem:[#allocation5 + $0x78] ss:$12 sps:$4 sm:$0xff]  }
  0x70   : > { %654 = vmatpush1.bf16.msra.mxu0 %v2537_v3  ;;  %v2544_v8 = vld [vmem:[#allocation5 + $0x64] ss:$12 sps:$4 sm:$0xff]   ;;  %v2546_v9 = vld [vmem:[#allocation5 + $0x60] ss:$12 sps:$4 sm:$0xff]   ;;  %v2549_v13 = vld [vmem:[#allocation5 + $0x48] ss:$12 sps:$4 sm:$0xff]  }
  0x71   : > { %655 = vmatprep.subr.bf16.mxu0 %v2538_v4  ;;  %v2559_v10 = vld [vmem:[#allocation5 + $0xb0] ss:$12 sps:$4 sm:$0xff]   ;;  %v2547_v11 = vld [vmem:[#allocation5 + $0x4c] ss:$12 sps:$4 sm:$0xff]   ;;  %v2550_v14 = vld [vmem:[#allocation5 + $0x34] ss:$12 sps:$4 sm:$0xff]  }
  0x72   : > { %2327 = vmatpush3.bf16.msra.mxu1 %v2559_v10  ;;  %v2560_v12 = vld [vmem:[#allocation5 + $0x98] ss:$12 sps:$4 sm:$0xff]   ;;  %v2561_v15 = vld [vmem:[#allocation5 + $0x80] ss:$12 sps:$4 sm:$0xff]   ;;  %v2552_v16 = vld [vmem:[#allocation5 + $0x30] ss:$12 sps:$4 sm:$0xff]  }
  0x73   : > { %2328 = vmatprep.subr.bf16.mxu1 %v2836_v1  ;;  %v2553_v17 = vld [vmem:[#allocation5 + $0x1c] ss:$12 sps:$4 sm:$0xff]   ;;  %v2555_v19 = vld [vmem:[#allocation5 + $0x18] ss:$12 sps:$4 sm:$0xff]   ;;  %v2558_v22 = vld [vmem:[#allocation5] ss:$12 sps:$4 sm:$0xff]  }
  0x74   : > { %656 = vmatpush1.bf16.msra.mxu0 %v2540_v5  ;;  %v2562_v18 = vld [vmem:[#allocation5 + $0x68] ss:$12 sps:$4 sm:$0xff]   ;;  %v2556_v20 = vld [vmem:[#allocation5 + $0x4] ss:$12 sps:$4 sm:$0xff]   ;;  %vm761_vm1 = vcmask 261120   ;;  %v3088_v31 = vshrl.u32 %v510_v30, 7 }
  0x75   : > { %657 = vmatprep.subr.bf16.mxu0 %v2541_v6  ;;  %v2563_v21 = vld [vmem:[#allocation5 + $0x50] ss:$12 sps:$4 sm:$0xff]   ;;  %v2564_v25 = vld [vmem:[#allocation5 + $0x38] ss:$12 sps:$4 sm:$0xff]   ;;  %v2565_v27 = vld [vmem:[#allocation5 + $0x20] ss:$12 sps:$4 sm:$0xff]  }
  0x76   : > { %2329 = vmatpush3.bf16.msra.mxu1 %v2560_v12  ;;  %v2567_v24 = vld [vmem:[%s3373_s1] sm:$0xff]   ;;  %v512_v32 = vsub.s32 0, %v3088_v31  ;;  %v516_v34 = vsub.s32 1, %v3088_v31  ;;  %v520_v43 = vsub.s32 2, %v3088_v31  ;;  %vm836_vm2 = vcmask 1043456   ;;  %s2838_s21 = smov 3  }
  0x77   : > { %2330 = vmatprep.subr.bf16.mxu1 %v2836_v1  ;;  %v766_v28 = vsel %vm761_vm1, %v2567_v24, 0  ;;  %v2566_v29 = vld [vmem:[#allocation5 + $0x8] ss:$12 sps:$4 sm:$0xff]   ;;  %v508_v33 = vld [vmem:[%s3375_s3] sm:$0x7]  ;;  %s2839_s18 = smov 1  }
  0x78   : > { %658 = vmatpush1.bf16.msra.mxu0 %v2543_v7  ;;  %v513_v35 = vrot.slane %v508_v33, %v512_v32  ;;  %v517_v36 = vrot.slane %v508_v33, %v516_v34  ;;  %v2189_v38 = vld [vmem:[%s3377_s5] ss:$0 sm:$0xff]  ;;  %v521_v50 = vrot.slane %v508_v33, %v520_v43  ;;  %s2840_s16 = smov 4   ;;  %s2841_s14 = smov 2   ;;  %vm830_vm3 = vcmask 1040384  }
  0x79   : > { %659 = vmatprep.subr.bf16.mxu0 %v2544_v8  ;;  %v2188_v47 = vld [vmem:[%s3376_s4] ss:$0 sm:$0xff]  ;;  %s2842_s17 = smov 6   ;;  %s2843_s23 = smov 5   ;;  %vm832_vm4 = vcmask 1041408   ;;  %vm834_vm5 = vcmask 1042432  }
  0x7a   : > { %2331 = vmatpush3.bf16.msra.mxu1 %v2561_v15  ;;  %s2844_s2 = smov 7   ;;  %vm838_vm6 = vcmask 1044480   ;;  %vm840_vm7 = vcmask 1045504   ;;  %vm842_vm8 = vcmask 1046528   ;;  %s2845_s27 = smov 121   ;;  %vm894_vm9 = vcmask 64512  }
  0x7b   : > { %2332 = vmatprep.subr.bf16.mxu1 %v2836_v1  ;;  %s2846_s29 = smov 96   ;;  %s2847_s20 = smov 64   ;;  %vm1567_vm10 = vcmask 523264   ;;  %vm1569_vm11 = vcmask 785408  }
  0x7c   : > { %660 = vmatpush1.bf16.msra.mxu0 %v2546_v9  ;;  %s2848_s15 = smov 32   ;;  %s2259_s19 = sshll.u32 %s2936_s25, 7 }
  0x7d   : > { %661 = vmatprep.subr.bf16.mxu0 %v2547_v11  ;;  %p3415_p0 = scmp.ne.s32.totalorder %s3407_s13, 0 }
  0x7e   : > { %2333 = vmatpush3.bf16.msra.mxu1 %v2562_v18 }
  0x7f   : > { %2334 = vmatprep.subr.bf16.mxu1 %v2836_v1 }
  0x80   : > { %662 = vmatpush1.bf16.msra.mxu0 %v2549_v13 }
  0x81   : > { %663 = vmatprep.subr.bf16.mxu0 %v2550_v14 }
  0x82   : > { %2335 = vmatpush3.bf16.msra.mxu1 %v2563_v21 }
  0x83   : > { %2336 = vmatprep.subr.bf16.mxu1 %v2836_v1 }
  0x84   : > { %664 = vmatpush1.bf16.msra.mxu0 %v2552_v16 }
  0x85   : > { %665 = vmatprep.subr.bf16.mxu0 %v2553_v17 }
  0x86   : > { %2337 = vmatpush3.bf16.msra.mxu1 %v2564_v25 }
  0x87   : > { %2338 = vmatprep.subr.bf16.mxu1 %v2836_v1 }
  0x88   : > { %666 = vmatpush1.bf16.msra.mxu0 %v2555_v19 }
  0x89   : > { %667 = vmatprep.subr.bf16.mxu0 %v2556_v20 }
  0x8a   : > { %2339 = vmatpush3.bf16.msra.mxu1 %v2565_v27 }
  0x8b   : > { %2340 = vmatprep.subr.bf16.mxu1 %v2836_v1 }
  0x8c   : > { %668 = vmatpush1.bf16.msra.mxu0 %v2558_v22 }
  0x8d   : > { %2370 = vmatprep.subr.bf16.mxu0 %v2836_v1 }
  0x8e   : > { %2341 = vmatpush3.bf16.msra.mxu1 %v2566_v29 }
  0x8f   : > { %686 = vmatmul.mubr.bf16.vlgmr.msra.gmra.mxu0 %v475_v26  ;;  %2346 = vmatprep.subr.bf16.mxu1 %v2836_v1 }
  0x90   : > { %2372 = vmatprep.mubr.msk.bf16.mxu0 %vm2837_vm0, %v2836_v1 }
  0x91   : > { %2343 = vmatmul.mubr.bf16.vlgmr.msra.gmra.mxu1 %v475_v26 }
  0x92   : > { %2347 = vmatpush3.bf16.xpose.msra.mxu1 %v766_v28  ;;  %2348 = vmatprep.mubr.msk.bf16.mxu1 %vm2837_vm0, %v2836_v1 }
  0x93   : > { %2352 = vmatprep.subr.bf16.mxu1 %v2836_v1 }
 0x14f   : > { %v687_v37 = vpop.f32.mrf.mxu0 }
 0x150   : > { %v688_v39 = vadd.f32 %v687_v37, %v513_v35  ;;  %v2568_v37 = vld [vmem:[%s3373_s1 + $0x8] sm:$0xff]  }
 0x151   : > { %v689_v40 = vpop.f32.mrf.mxu0  ;;  %v728_v52 = vpop.f32.mrf.mxu1 }
 0x152   : > { %v752_v41 = vadd.f32 %v2189_v38, %v688_v39  ;;  %v690_v42 = vadd.f32 %v689_v40, %v517_v36  ;;  %v743_v51 = vadd.f32 %v2188_v47, %v688_v39  ;;  %v729_v53 = vadd.f32 %v728_v52, %v521_v50 }
 0x153   : > { %v691_v44 = vpop.f32.mrf.mxu0  ;;  %v2344_v54 = vpop.f32.mrf.mxu1 }
 0x154   : > { %v3103_v45 = vpack.c.bf16 %v752_v41, %v752_v41  ;;  %v3105_v46 = vpack.c.bf16 %v690_v42, %v690_v42  ;;  %v3117_v55 = vpack.c.bf16 %v743_v51, %v743_v51  ;;  %v3119_v56 = vpack.c.bf16 %v729_v53, %v729_v53 }
 0x155   : > { %v692_v48 = vpop.f32.mrf.mxu0  ;;  %v731_v57 = vpop.f32.mrf.mxu1  ;;  %v968_v41 = vsel %vm761_vm1, %v2568_v37, 0 }
 0x156   : > { %2349 = vmatmul.mubr.msk.bf16.vlgmr.msra.gmra.mxu1 %vm761_vm1, %v3103_v45  ;;  %v852_v49 = vsel %vm761_vm1, %v3105_v46, 0  ;;  %v911_v58 = vsel %vm836_vm2, %v3119_v56, 0  ;;  %v2569_v57 = vld [vmem:[%s3373_s1 + $0x10] sm:$0xff]  }
 0x157   : > { %2353 = vmatpush3.bf16.xpose.msra.mxu1 %v852_v49  ;;  %2354 = vmatprep.mubr.msk.bf16.mxu1 %vm2837_vm0, %v2836_v1  ;;  %v2345_v59 = vpop.f32.mrf.mxu1 }
 0x158   : > { %2358 = vmatprep.subr.bf16.mxu1 %v2836_v1  ;;  %v1170_v59 = vsel %vm761_vm1, %v2569_v57, 0 }
 0x15e   : > { %2355 = vmatmul.mubr.msk.bf16.vlgmr.msra.gmra.mxu1 %vm761_vm1, %v3117_v55 }
 0x15f   : > { %2359 = vmatpush3.bf16.msra.mxu1 %v911_v58  ;;  %2360 = vmatprep.mubr.msk.bf16.mxu1 %vm2837_vm0, %v2836_v1 }
 0x160   : > { %2364 = vmatprep.subr.bf16.mxu1 %v2836_v1 }
 0x216   : > { %v802_v60 = vpop.f32.mrf.mxu1 }
 0x217   : > { %815 = vrot.lane.b32.xlu1 %v802_v60, %s2838_s21  ;;  %809 = vrot.lane.b32.xlu0 %v802_v60, %s2839_s18 }
 0x218   : > { %v2350_v61 = vpop.f32.mrf.mxu1 }
 0x21a   : > { %v805_v62 = vpop.f32.mrf.mxu1 }
 0x21b   : > { %818 = vrot.lane.b32.xlu1 %v802_v60, %s2840_s16  ;;  %812 = vrot.lane.b32.xlu0 %v802_v60, %s2841_s14 }
 0x21c   : > { %v2351_v63 = vpop.f32.mrf.mxu1 }
 0x21e   : > { %v888_v2 = vpop.f32.mrf.mxu1 }
 0x21f   : > { %824 = vrot.lane.b32.xlu1 %v802_v60, %s2842_s17  ;;  %821 = vrot.lane.b32.xlu0 %v802_v60, %s2843_s23 }
 0x220   : > { %v2356_v3 = vpop.f32.mrf.mxu1 }
 0x222   : > { %v891_v4 = vpop.f32.mrf.mxu1 }
 0x223   : > { %827 = vrot.lane.b32.xlu0 %v802_v60, %s2844_s2 }
 0x224   : > { %v2357_v5 = vpop.f32.mrf.mxu1 }
 0x289   : > { %v816_v6 = vpop.permute.xlu1 %815  ;;  %v810_v7 = vpop.permute.xlu0 %809 }
 0x28a   : > { %v831_v8 = vsel %vm830_vm3, %v802_v60, %v810_v7 }
 0x28d   : > { %v819_v9 = vpop.permute.xlu1 %818  ;;  %v813_v10 = vpop.permute.xlu0 %812 }
 0x28e   : > { %v833_v11 = vsel %vm832_vm4, %v831_v8, %v813_v10 }
 0x28f   : > { %v835_v12 = vsel %vm834_vm5, %v833_v11, %v816_v6 }
 0x290   : > { %v837_v13 = vsel %vm836_vm2, %v835_v12, %v819_v9 }
 0x291   : > { %v822_v14 = vpop.permute.xlu0 %821  ;;  %v825_v15 = vpop.permute.xlu1 %824 }
 0x292   : > { %v839_v16 = vsel %vm838_vm6, %v837_v13, %v822_v14 }
 0x293   : > { %v841_v18 = vsel %vm840_vm7, %v839_v16, %v825_v15 }
 0x295   : > { %v828_v17 = vpop.permute.xlu0 %827 }
 0x296   : > { %v843_v19 = vsel %vm842_vm8, %v841_v18, %v828_v17 }
 0x297   : > { %845 = vrot.lane.b32.xlu1 %v843_v19, %s2845_s27 }
 0x309   : > { %v846_v20 = vpop.permute.xlu1 %845 }
 0x30a   : > { %v889_v21 = vadd.f32 %v888_v2, %v846_v20 }
 0x30c   : > { %v895_v22 = vsel %vm894_vm9, %v889_v21, -inf }
 0x30d   : > { %896 = vmax.xlane.f32.xlu0 %v895_v22 }
 0x323   : > { %957 = vrot.lane.b32.xlu0 %v3103_v45, %s2846_s29 }
 0x327   : > { %1040 = vrot.lane.b32.xlu0 %v3117_v55, %s2846_s29 }
 0x396   : > { %v897_v24 = vpop.xlane.xlu0 %896 }
 0x397   : > { %v898_v25 = vsub.f32 %v889_v21, %v897_v24 }
 0x399   : > { %v899_v26 = vmul.f32 1.442695, %v898_v25 }
 0x39a   : > { %v958_v35 = vpop.permute.xlu0 %957 }
 0x39b   : > { %2619 = vpow2.f32 %v899_v26 }
 0x39e   : > { %v1041_v36 = vpop.permute.xlu0 %1040 }
 0x3a8   : > { %v2620_v27 = vpop.eup %2619 }
 0x3a9   : > { %v901_v28 = vsel %vm894_vm9, %v2620_v27, 0.0 }
 0x3aa   : > { %902 = vadd.xlane.f32.xlu1 %v901_v28 }
 0x3bb   : > { %1043 = vrot.lane.b32.xlu1 %v3105_v46, %s2846_s29 }
 0x433   : > { %v903_v29 = vpop.xlane.xlu1 %902 }
 0x434   : > { %2621 = vrcp.f32 %v903_v29 }
 0x437   : > { %v1044_v30 = vpop.permute.xlu1 %1043 }
 0x438   : > { %v1053_v33 = vsel %vm761_vm1, %v1044_v30, 0 }
 0x439   : > { %2371 = vmatpush3.bf16.xpose.msra.mxu0 %v1053_v33 }
 0x43a   : > { %2382 = vmatprep.subr.bf16.mxu0 %v2836_v1 }
 0x440   : > { %2373 = vmatmul.mubr.msk.bf16.vlgmr.msra.gmra.mxu0 %vm761_vm1, %v1041_v36 }
 0x441   : > { %v2622_v38 = vpop.eup %2621  ;;  %2384 = vmatprep.mubr.msk.bf16.mxu0 %vm2837_vm0, %v2836_v1  ;;  %2383 = vmatpush3.bf16.xpose.msra.mxu0 %v1170_v59 }
 0x442   : > { %v905_v39 = vmul.f32 %v2622_v38, %v2620_v27  ;;  %2394 = vmatprep.subr.bf16.mxu0 %v2836_v1 }
 0x444   : > { %v906_v40 = vpack.c.bf16 %v905_v39, %v905_v39 }
 0x446   : > { %2361 = vmatmul.mubr.msk.bf16.vlgmr.msra.gmra.mxu1 %vm894_vm9, %v906_v40 }
 0x447   : > { %2365 = vmatpush3.bf16.xpose.msra.mxu1 %v968_v41  ;;  %2366 = vmatprep.mubr.msk.bf16.mxu1 %vm2837_vm0, %v2836_v1 }
 0x448   : > { %2376 = vmatprep.subr.bf16.mxu1 %v2836_v1 }
 0x44e   : > { %2367 = vmatmul.mubr.msk.bf16.vlgmr.msra.gmra.mxu1 %vm761_vm1, %v958_v35 }
 0x44f   : > { %2378 = vmatprep.mubr.msk.bf16.mxu1 %vm2837_vm0, %v2836_v1 }
 0x500   : > { %v1089_v42 = vpop.f32.mrf.mxu0 }
 0x502   : > { %v2374_v43 = vpop.f32.mrf.mxu0 }
 0x504   : > { %v1092_v44 = vpop.f32.mrf.mxu0 }
 0x506   : > { %v3167_v47 = vpop.f32.mrf.mxu1  ;;  %v2375_v48 = vpop.f32.mrf.mxu0 }
 0x507   : > { %v2570_v48 = vld [vmem:[%s3373_s1 + $0x18] sm:$0xff]  }
 0x508   : > { %v2362_v49 = vpop.f32.mrf.mxu1 }
 0x50a   : > { %v950_v50 = vpop.f32.mrf.mxu1 }
 0x50c   : > { %v2363_v51 = vpop.f32.mrf.mxu1 }
 0x50e   : > { %v1004_v52 = vpop.f32.mrf.mxu1 }
 0x50f   : > { %1014 = vrot.lane.b32.xlu0 %v1004_v52, %s2841_s14  ;;  %1011 = vrot.lane.b32.xlu1 %v1004_v52, %s2839_s18 }
 0x510   : > { %v2368_v53 = vpop.f32.mrf.mxu1 }
 0x511   : > { %v1369_v53 = vsel %vm761_vm1, %v2570_v48, 0 }
 0x512   : > { %v1007_v54 = vpop.f32.mrf.mxu1 }
 0x513   : > { %1020 = vrot.lane.b32.xlu0 %v1004_v52, %s2840_s16  ;;  %1017 = vrot.lane.b32.xlu1 %v1004_v52, %s2838_s21 }
 0x514   : > { %v2369_v58 = vpop.f32.mrf.mxu1 }
 0x517   : > { %1026 = vrot.lane.b32.xlu0 %v1004_v52, %s2842_s17  ;;  %1023 = vrot.lane.b32.xlu1 %v1004_v52, %s2843_s23 }
 0x51b   : > { %1029 = vrot.lane.b32.xlu1 %v1004_v52, %s2844_s2 }
 0x581   : > { %v1015_v60 = vpop.permute.xlu0 %1014  ;;  %v1012_v61 = vpop.permute.xlu1 %1011 }
 0x582   : > { %v1032_v62 = vsel %vm830_vm3, %v1004_v52, %v1012_v61 }
 0x583   : > { %v1033_v2 = vsel %vm832_vm4, %v1032_v62, %v1015_v60 }
 0x585   : > { %v1021_v63 = vpop.permute.xlu0 %1020  ;;  %v1018_v3 = vpop.permute.xlu1 %1017 }
 0x586   : > { %v1034_v4 = vsel %vm834_vm5, %v1033_v2, %v1018_v3 }
 0x587   : > { %v1035_v5 = vsel %vm836_vm2, %v1034_v4, %v1021_v63 }
 0x589   : > { %v1024_v6 = vpop.permute.xlu1 %1023  ;;  %v1027_v7 = vpop.permute.xlu0 %1026 }
 0x58a   : > { %v1036_v8 = vsel %vm838_vm6, %v1035_v5, %v1024_v6 }
 0x58b   : > { %v1037_v10 = vsel %vm840_vm7, %v1036_v8, %v1027_v7 }
 0x58d   : > { %v1030_v9 = vpop.permute.xlu1 %1029 }
 0x58e   : > { %v1038_v11 = vsel %vm842_vm8, %v1037_v10, %v1030_v9 }
 0x58f   : > { %1046 = vrot.lane.b32.xlu0 %v1038_v11, %s2845_s27 }
 0x593   : > { %1159 = vrot.lane.b32.xlu0 %v3103_v45, %s2847_s20 }
 0x601   : > { %v1047_v12 = vpop.permute.xlu0 %1046 }
 0x602   : > { %v1090_v13 = vadd.f32 %v1089_v42, %v1047_v12 }
 0x604   : > { %v1095_v14 = vsel %vm894_vm9, %v1090_v13, -inf }
 0x605   : > { %1096 = vmax.xlane.f32.xlu1 %v1095_v14  ;;  %v1160_v15 = vpop.permute.xlu0 %1159 }
 0x606   : > { %2385 = vmatmul.mubr.msk.bf16.vlgmr.msra.gmra.mxu0 %vm761_vm1, %v1160_v15 }
 0x607   : > { %2396 = vmatprep.mubr.msk.bf16.mxu0 %vm2837_vm0, %v2836_v1 }
 0x616   : > { %1108 = vrot.lane.b32.xlu1 %v3119_v56, %s2846_s29 }
 0x61a   : > { %1241 = vrot.lane.b32.xlu1 %v3117_v55, %s2847_s20 }
 0x68e   : > { %v1097_v16 = vpop.xlane.xlu1 %1096 }
 0x68f   : > { %v1098_v17 = vsub.f32 %v1090_v13, %v1097_v16 }
 0x691   : > { %v1099_v18 = vmul.f32 1.442695, %v1098_v17 }
 0x692   : > { %v1109_v19 = vpop.permute.xlu1 %1108 }
 0x693   : > { %2623 = vpow2.f32 %v1099_v18  ;;  %v1114_v20 = vsel %vm836_vm2, %v1109_v19, 0 }
 0x694   : > { %2377 = vmatpush3.bf16.msra.mxu1 %v1114_v20 }
 0x695   : > { %2388 = vmatprep.subr.bf16.mxu1 %v2836_v1 }
 0x696   : > { %v1242_v29 = vpop.permute.xlu1 %1241 }
 0x6a0   : > { %v2624_v21 = vpop.eup %2623 }
 0x6a1   : > { %v1101_v22 = vsel %vm894_vm9, %v2624_v21, 0.0 }
 0x6a2   : > { %1102 = vadd.xlane.f32.xlu0 %v1101_v22 }
 0x6b8   : > { %1243 = vrot.lane.b32.xlu0 %v3105_v46, %s2847_s20 }
 0x6c6   : > { %v1206_v24 = vpop.f32.mrf.mxu0 }
 0x6c7   : > { %1216 = vrot.lane.b32.xlu0 %v1206_v24, %s2841_s14  ;;  %1213 = vrot.lane.b32.xlu1 %v1206_v24, %s2839_s18 }
 0x6c8   : > { %v2386_v25 = vpop.f32.mrf.mxu0 }
 0x6ca   : > { %v1209_v26 = vpop.f32.mrf.mxu0 }
 0x6cb   : > { %1222 = vrot.lane.b32.xlu0 %v1206_v24, %s2840_s16  ;;  %1219 = vrot.lane.b32.xlu1 %v1206_v24, %s2838_s21 }
 0x6cc   : > { %v2387_v27 = vpop.f32.mrf.mxu0 }
 0x6cf   : > { %1228 = vrot.lane.b32.xlu0 %v1206_v24, %s2842_s17  ;;  %1225 = vrot.lane.b32.xlu1 %v1206_v24, %s2843_s23 }
 0x6d3   : > { %1231 = vrot.lane.b32.xlu1 %v1206_v24, %s2844_s2 }
 0x72b   : > { %v1103_v28 = vpop.xlane.xlu0 %1102 }
 0x72c   : > { %2625 = vrcp.f32 %v1103_v28 }
 0x72f   : > { %v1244_v30 = vpop.permute.xlu0 %1243 }
 0x730   : > { %v1253_v43 = vsel %vm761_vm1, %v1244_v30, 0 }
 0x739   : > { %v2626_v33 = vpop.eup %2625  ;;  %v1214_v35 = vpop.permute.xlu1 %1213 }
 0x73a   : > { %v1217_v36 = vpop.permute.xlu0 %1216  ;;  %v1234_v37 = vsel %vm830_vm3, %v1206_v24, %v1214_v35  ;;  %v1105_v38 = vmul.f32 %v2626_v33, %v2624_v21 }
 0x73b   : > { %v1235_v40 = vsel %vm832_vm4, %v1234_v37, %v1217_v36 }
 0x73c   : > { %v1106_v39 = vpack.c.bf16 %v1105_v38, %v1105_v38 }
 0x73d   : > { %v1220_v41 = vpop.permute.xlu1 %1219 }
 0x73e   : > { %v1223_v42 = vpop.permute.xlu0 %1222  ;;  %v1236_v44 = vsel %vm834_vm5, %v1235_v40, %v1220_v41  ;;  %2379 = vmatmul.mubr.msk.bf16.vlgmr.msra.gmra.mxu1 %vm894_vm9, %v1106_v39 }
 0x73f   : > { %2389 = vmatpush3.bf16.xpose.msra.mxu1 %v1253_v43  ;;  %2390 = vmatprep.mubr.msk.bf16.mxu1 %vm2837_vm0, %v2836_v1  ;;  %v1237_v49 = vsel %vm836_vm2, %v1236_v44, %v1223_v42 }
 0x740   : > { %2400 = vmatprep.subr.bf16.mxu1 %v2836_v1 }
 0x741   : > { %v1226_v50 = vpop.permute.xlu1 %1225 }
 0x742   : > { %v1238_v51 = vsel %vm838_vm6, %v1237_v49, %v1226_v50  ;;  %v1229_v52 = vpop.permute.xlu0 %1228 }
 0x743   : > { %v1239_v54 = vsel %vm840_vm7, %v1238_v51, %v1229_v52 }
 0x745   : > { %v1232_v57 = vpop.permute.xlu1 %1231 }
 0x746   : > { %2391 = vmatmul.mubr.msk.bf16.vlgmr.msra.gmra.mxu1 %vm761_vm1, %v1242_v29  ;;  %v1240_v58 = vsel %vm842_vm8, %v1239_v54, %v1232_v57 }
 0x747   : > { %1246 = vrot.lane.b32.xlu0 %v1240_v58, %s2845_s27  ;;  %2401 = vmatpush3.bf16.xpose.msra.mxu1 %v1369_v53 }
 0x748   : > { %2402 = vmatprep.mubr.msk.bf16.mxu1 %vm2837_vm0, %v2836_v1  ;;  %2412 = vmatprep.subr.bf16.mxu1 %v2836_v1 }
 0x74b   : > { %1358 = vrot.lane.b32.xlu0 %v3103_v45, %s2848_s15 }
 0x7b9   : > { %v1247_v59 = vpop.permute.xlu0 %1246 }
 0x7bd   : > { %v1359_v60 = vpop.permute.xlu0 %1358 }
 0x7be   : > { %2403 = vmatmul.mubr.msk.bf16.vlgmr.msra.gmra.mxu1 %vm761_vm1, %v1359_v60 }
 0x7bf   : > { %2414 = vmatprep.mubr.msk.bf16.mxu1 %vm2837_vm0, %v2836_v1 }
 0x7fe   : > { %v3237_v61 = vpop.f32.mrf.mxu1 }
 0x800   : > { %v2380_v62 = vpop.f32.mrf.mxu1 }
 0x802   : > { %v1153_v63 = vpop.f32.mrf.mxu1 }
 0x804   : > { %v2381_v2 = vpop.f32.mrf.mxu1 }
 0x806   : > { %v1289_v3 = vpop.f32.mrf.mxu1 }
 0x807   : > { %v1290_v4 = vadd.f32 %v1289_v3, %v1247_v59 }
 0x808   : > { %v2392_v5 = vpop.f32.mrf.mxu1 }
 0x809   : > { %v1295_v6 = vsel %vm894_vm9, %v1290_v4, -inf }
 0x80a   : > { %1296 = vmax.xlane.f32.xlu1 %v1295_v6  ;;  %v1292_v7 = vpop.f32.mrf.mxu1 }
 0x80b   : > { %v2571_v7 = vld [vmem:[%s3378_s6 + $0x38] sm:$0xff]  }
 0x80c   : > { %v2393_v45 = vpop.f32.mrf.mxu1 }
 0x80d   : > { %v2573_v45 = vld [vmem:[%s3378_s6 + $0x28] sm:$0xff]  }
 0x81b   : > { %1307 = vrot.lane.b32.xlu1 %v3119_v56, %s2847_s20 }
 0x81f   : > { %1440 = vrot.lane.b32.xlu1 %v3117_v55, %s2848_s15 }
 0x87e   : > { %v1405_v8 = vpop.f32.mrf.mxu1 }
 0x87f   : > { %1412 = vrot.lane.b32.xlu1 %v1405_v8, %s2839_s18  ;;  %s2038_s18 = scalar_lea.sflag [#allocation4], %s3041_s8 }
 0x880   : > { %v2404_v9 = vpop.f32.mrf.mxu1 }
 0x881   : > { %v2576_v9 = vld [vmem:[%s3378_s6 + $0x10] sm:$0xff]  }
 0x882   : > { %v1408_v10 = vpop.f32.mrf.mxu1 }
 0x883   : > { %1418 = vrot.lane.b32.xlu1 %v1405_v8, %s2838_s21  ;;  %v2577_v10 = vld [vmem:[%s3378_s6 + $0x8] sm:$0xff]   ;;  %s2049_s21 = scalar_lea.hbm %s3384_s12, %s2259_s19 }
 0x884   : > { %v2405_v11 = vpop.f32.mrf.mxu1 }
 0x885   : > { %v2578_v11 = vld [vmem:[%s3378_s6] sm:$0xff]  }
 0x887   : > { %1424 = vrot.lane.b32.xlu1 %v1405_v8, %s2843_s23 }
 0x88b   : > { %1430 = vrot.lane.b32.xlu1 %v1405_v8, %s2844_s2 }
 0x893   : > { %v1297_v12 = vpop.xlane.xlu1 %1296 }
 0x894   : > { %v1298_v13 = vsub.f32 %v1290_v4, %v1297_v12  ;;  %v2579_v12 = vld [vmem:[#allocation7 + $0x70] ss:$8 sps:$4 sm:$0xff]  }
 0x896   : > { %v1299_v14 = vmul.f32 1.442695, %v1298_v13  ;;  %v2581_v13 = vld [vmem:[#allocation7 + $0x74] ss:$8 sps:$4 sm:$0xff]  }
 0x897   : > { %v1308_v15 = vpop.permute.xlu1 %1307 }
 0x898   : > { %2627 = vpow2.f32 %v1299_v14  ;;  %v1313_v16 = vsel %vm836_vm2, %v1308_v15, 0  ;;  %v2584_v14 = vld [vmem:[#allocation7 + $0x64] ss:$8 sps:$4 sm:$0xff]   ;;  %v2582_v15 = vld [vmem:[#allocation7 + $0x60] ss:$8 sps:$4 sm:$0xff]  }
 0x899   : > { %2395 = vmatpush3.bf16.msra.mxu0 %v1313_v16  ;;  %v2587_v16 = vld [vmem:[#allocation7 + $0x54] ss:$8 sps:$4 sm:$0xff]  }
 0x89a   : > { %2406 = vmatprep.subr.bf16.mxu0 %v2836_v1 }
 0x89b   : > { %v1441_v18 = vpop.permute.xlu1 %1440 }
 0x8a5   : > { %v2628_v55 = vpop.eup %2627 }
 0x8a6   : > { %v1301_v17 = vsel %vm894_vm9, %v2628_v55, 0.0 }
 0x8a7   : > { %1302 = vadd.xlane.f32.xlu0 %v1301_v17  ;;  %v2590_v17 = vld [vmem:[#allocation7 + $0x44] ss:$8 sps:$4 sm:$0xff]  }
 0x8bd   : > { %1442 = vrot.lane.b32.xlu0 %v3105_v46, %s2848_s15 }
 0x8c1   : > { %1415 = vrot.lane.b32.xlu0 %v1405_v8, %s2841_s14 }
 0x8c5   : > { %1421 = vrot.lane.b32.xlu0 %v1405_v8, %s2840_s16 }
 0x8c9   : > { %1427 = vrot.lane.b32.xlu0 %v1405_v8, %s2842_s17 }
 0x8f1   : > { %v1413_v19 = vpop.permute.xlu1 %1412 }
 0x8f2   : > { %v1433_v24 = vsel %vm830_vm3, %v1405_v8, %v1413_v19  ;;  %v2575_v8 = vld [vmem:[%s3378_s6 + $0x18] sm:$0xff]  }
 0x8f3   : > { %v2588_v19 = vld [vmem:[#allocation7 + $0x40] ss:$8 sps:$4 sm:$0xff]  }
 0x8f5   : > { %v1419_v22 = vpop.permute.xlu1 %1418 }
 0x8f9   : > { %v1425_v27 = vpop.permute.xlu1 %1424 }
 0x8fd   : > { %v1431_v37 = vpop.permute.xlu1 %1430 }
 0x930   : > { %v1303_v20 = vpop.xlane.xlu0 %1302 }
 0x931   : > { %2629 = vrcp.f32 %v1303_v20  ;;  %v2593_v20 = vld [vmem:[#allocation7 + $0x34] ss:$8 sps:$4 sm:$0xff]  }
 0x934   : > { %v1443_v21 = vpop.permute.xlu0 %1442 }
 0x935   : > { %v1452_v41 = vsel %vm761_vm1, %v1443_v21, 0 }
 0x938   : > { %v1416_v25 = vpop.permute.xlu0 %1415 }
 0x939   : > { %v1434_v26 = vsel %vm832_vm4, %v1433_v24, %v1416_v25  ;;  %v2591_v24 = vld [vmem:[#allocation7 + $0x30] ss:$8 sps:$4 sm:$0xff]   ;;  %v2596_v25 = vld [vmem:[#allocation7 + $0x24] ss:$8 sps:$4 sm:$0xff]  }
 0x93a   : > { %v1435_v46 = vsel %vm834_vm5, %v1434_v26, %v1419_v22  ;;  %v2594_v26 = vld [vmem:[#allocation7 + $0x20] ss:$8 sps:$4 sm:$0xff]  }
 0x93c   : > { %v1422_v28 = vpop.permute.xlu0 %1421 }
 0x93d   : > { %v1436_v29 = vsel %vm836_vm2, %v1435_v46, %v1422_v28  ;;  %v2597_v28 = vld [vmem:[#allocation7 + $0x10] ss:$8 sps:$4 sm:$0xff]  }
 0x93e   : > { %v2630_v30 = vpop.eup %2629  ;;  %v1437_v36 = vsel %vm838_vm6, %v1436_v29, %v1425_v27  ;;  %v2599_v27 = vld [vmem:[#allocation7 + $0x14] ss:$8 sps:$4 sm:$0xff]  }
 0x93f   : > { %v1305_v33 = vmul.f32 %v2630_v30, %v2628_v55  ;;  %v2585_v55 = vld [vmem:[#allocation7 + $0x50] ss:$8 sps:$4 sm:$0xff]  }
 0x940   : > { %v1428_v35 = vpop.permute.xlu0 %1427 }
 0x941   : > { %v1438_v38 = vsel %vm840_vm7, %v1437_v36, %v1428_v35  ;;  %v1306_v39 = vpack.c.bf16 %v1305_v33, %v1305_v33 }
 0x942   : > { %v1439_v40 = vsel %vm842_vm8, %v1438_v38, %v1431_v37  ;;  %v2602_v38 = vld [vmem:[#allocation7 + $0x4] ss:$8 sps:$4 sm:$0xff]  }
 0x943   : > { %2397 = vmatmul.mubr.msk.bf16.vlgmr.msra.gmra.mxu0 %vm894_vm9, %v1306_v39  ;;  %1445 = vrot.lane.b32.xlu0 %v1439_v40, %s2845_s27  ;;  %v2600_v39 = vld [vmem:[#allocation7] ss:$8 sps:$4 sm:$0xff]   ;;  %v2212_v40 = vld [vmem:[%s3379_s7] ss:$0 sm:$0xff] }
 0x944   : > { %2407 = vmatpush3.bf16.xpose.msra.mxu0 %v1452_v41  ;;  %2408 = vmatprep.mubr.msk.bf16.mxu0 %vm2837_vm0, %v2836_v1 }
 0x945   : > { %2418 = vmatprep.subr.bf16.mxu0 %v2836_v1 }
 0x94b   : > { %2409 = vmatmul.mubr.msk.bf16.vlgmr.msra.gmra.mxu0 %vm761_vm1, %v1441_v18 }
 0x94c   : > { %2434 = vmatprep.mubr.msk.bf16.mxu0 %vm2837_vm0, %v2836_v1  ;;  %2419 = vmatpush3.bf16.msra.mxu0 %v2571_v7 }
 0x94d   : > { %2420 = vmatprep.subr.bf16.mxu0 %v2836_v1 }
 0x9b5   : > { %v1446_v49 = vpop.permute.xlu0 %1445 }
 0xa03   : > { %v1349_v42 = vpop.f32.mrf.mxu0 }
 0xa05   : > { %v2398_v43 = vpop.f32.mrf.mxu0 }
 0xa07   : > { %v1352_v44 = vpop.f32.mrf.mxu0 }
 0xa09   : > { %v2399_v48 = vpop.f32.mrf.mxu0 }
 0xa0b   : > { %v1488_v50 = vpop.f32.mrf.mxu0 }
 0xa0c   : > { %v1489_v51 = vadd.f32 %v1488_v50, %v1446_v49  ;;  %v2603_v50 = vld [vmem:[#allocation8 + $0x78] sm:$0xff]  }
 0xa0d   : > { %v2410_v52 = vpop.f32.mrf.mxu0 }
 0xa0e   : > { %v1494_v53 = vsel %vm894_vm9, %v1489_v51, -inf  ;;  %v2605_v52 = vld [vmem:[#allocation8 + $0x70] sm:$0xff]  }
 0xa0f   : > { %v1491_v54 = vpop.f32.mrf.mxu0  ;;  %1495 = vmax.xlane.f32.xlu1 %v1494_v53  ;;  %v2606_v53 = vld [vmem:[#allocation8 + $0x30] sm:$0xff]  }
 0xa10   : > { %v2607_v54 = vld [vmem:[#allocation8 + $0x68] sm:$0xff]  }
 0xa11   : > { %v2411_v57 = vpop.f32.mrf.mxu0 }
 0xa12   : > { %v2608_v57 = vld [vmem:[#allocation8 + $0x28] sm:$0xff]  }
 0xa20   : > { %1555 = vrot.lane.b32.xlu1 %v3237_v61, %s2848_s15 }
 0xa24   : > { %1559 = vrot.lane.b32.xlu1 %v1349_v42, %s2847_s20  ;;  %s472_s20 = scalar_lea.vmem [#allocation10], %s2159_s10 }
 0xa25   : > { %s2051_s28 = sshll.u32 %s472_s20, 4  ;;  %s2052_s28 = int_to_ptr.vmem [resolvable:$true] %s2051_s28 }
 0xa26   : > { %s2751_s16 = scalar_lea.vmem %s2052_s28, 128 }
 0xa27   : > { %p2752_p12 = scmp.ne.s32.totalorder %s2052_s28, %s2751_s16 }
 0xa29   : > { %p2753_p5 = pnand %p2752_p12, %p3415_p0 }
 0xa2b   : > { %p2754_p10 = pneg %p2753_p5 }
 0xa98   : > { %v1496_v58 = vpop.xlane.xlu1 %1495 }
 0xa99   : > { %v1497_v59 = vsub.f32 %v1489_v51, %v1496_v58  ;;  %v2604_v51 = vld [vmem:[#allocation8 + $0x38] sm:$0xff]   ;;  %v2610_v58 = vld [vmem:[#allocation8 + $0x20] sm:$0xff]  }
 0xa9b   : > { %v1498_v60 = vmul.f32 1.442695, %v1497_v59  ;;  %v2611_v59 = vld [vmem:[#allocation8 + $0x58] sm:$0xff]  }
 0xa9c   : > { %v1556_v46 = vpop.permute.xlu1 %1555 }
 0xa9d   : > { %2631 = vpow2.f32 %v1498_v60  ;;  %v1566_v30 = vsel %vm761_vm1, %v3167_v47, %v1556_v46  ;;  %v2612_v60 = vld [vmem:[#allocation8 + $0x18] sm:$0xff]  }
 0xaa0   : > { %v1560_v29 = vpop.permute.xlu1 %1559 }
 0xaa1   : > { %v1568_v33 = vsel %vm1567_vm10, %v1566_v30, %v1560_v29 }
 0xaaa   : > { %v2632_v62 = vpop.eup %2631 }
 0xaab   : > { %v1500_v63 = vsel %vm894_vm9, %v2632_v62, 0.0 }
 0xaac   : > { %1501 = vadd.xlane.f32.xlu0 %v1500_v63  ;;  %v2614_v63 = vld [vmem:[#allocation8 + $0x10] sm:$0xff]  }
 0xac2   : > { %1506 = vrot.lane.b32.xlu0 %v3119_v56, %s2848_s15  ;;  %v2572_v56 = vld [vmem:[%s3378_s6 + $0x30] sm:$0xff]  }
 0xac3   : > { %2421 = vmatpush3.bf16.msra.mxu0 %v2572_v56 }
 0xac4   : > { %2422 = vmatprep.subr.bf16.mxu0 %v2836_v1 }
 0xac7   : > { %2423 = vmatpush3.bf16.msra.mxu0 %v2573_v45 }
 0xac8   : > { %2424 = vmatprep.subr.bf16.mxu0 %v2836_v1 }
 0xb35   : > { %v1502_v2 = vpop.xlane.xlu0 %1501 }
 0xb36   : > { %2633 = vrcp.f32 %v1502_v2  ;;  %v2615_v2 = vld [vmem:[#allocation8 + $0x48] sm:$0xff]  }
 0xb39   : > { %v1507_v3 = vpop.permute.xlu0 %1506 }
 0xb3a   : > { %v1512_v4 = vsel %vm836_vm2, %v1507_v3, 0  ;;  %v2616_v3 = vld [vmem:[#allocation8 + $0x8] sm:$0xff]  }
 0xb3b   : > { %2413 = vmatpush3.bf16.msra.mxu1 %v1512_v4  ;;  %v2617_v4 = vld [vmem:[#allocation8 + $0x40] sm:$0xff]  }
 0xb3c   : > { %1793 = vmatprep.subr.bf16.mxu1 %v2581_v13 }
 0xb43   : > { %v2634_v61 = vpop.eup %2633 }
 0xb44   : > { %v1504_v5 = vmul.f32 %v2634_v61, %v2632_v62  ;;  %v2613_v62 = vld [vmem:[#allocation8 + $0x50] sm:$0xff]   ;;  %v2618_v61 = vld [vmem:[#allocation8] sm:$0xff]  }
 0xb46   : > { %v1505_v6 = vpack.c.bf16 %v1504_v5, %v1504_v5  ;;  %v1701_v5 = vld [vmem:[%s3381_s9] sm:$0x3] }
 0xb47   : > { %v1710_v7 = vrot.slane %v1701_v5, %v516_v34 }
 0xb48   : > { %2415 = vmatmul.mubr.msk.bf16.vlgmr.msra.gmra.mxu1 %vm894_vm9, %v1505_v6  ;;  %v1706_v6 = vrot.slane %v1701_v5, %v512_v32 }
 0xb49   : > { %1825 = vmatprep.mubr.bf16.mxu1 %v2835_v0  ;;  %v2574_v0 = vld [vmem:[%s3378_s6 + $0x20] sm:$0xff]   ;;  %1794 = vmatpush1.bf16.msra.mxu1 %v2579_v12 }
 0xb4a   : > { %2425 = vmatpush3.bf16.msra.mxu0 %v2574_v0  ;;  %1795 = vmatprep.subr.bf16.mxu1 %v2584_v14 }
 0xb4b   : > { %2426 = vmatprep.subr.bf16.mxu0 %v2836_v1 }
 0xb4d   : > { %1796 = vmatpush1.bf16.msra.mxu1 %v2582_v15 }
 0xb4e   : > { %2427 = vmatpush3.bf16.msra.mxu0 %v2575_v8  ;;  %1797 = vmatprep.subr.bf16.mxu1 %v2587_v16 }
 0xb4f   : > { %2428 = vmatprep.subr.bf16.mxu0 %v2836_v1 }
 0xb51   : > { %1798 = vmatpush1.bf16.msra.mxu1 %v2585_v55 }
 0xb52   : > { %2429 = vmatpush3.bf16.msra.mxu0 %v2576_v9  ;;  %1799 = vmatprep.subr.bf16.mxu1 %v2590_v17 }
 0xb53   : > { %2430 = vmatprep.subr.bf16.mxu0 %v2836_v1 }
 0xb55   : > { %1800 = vmatpush1.bf16.msra.mxu1 %v2588_v19 }
 0xb56   : > { %2431 = vmatpush3.bf16.msra.mxu0 %v2577_v10  ;;  %1801 = vmatprep.subr.bf16.mxu1 %v2593_v20 }
 0xb57   : > { %2432 = vmatprep.subr.bf16.mxu0 %v2836_v1 }
 0xb59   : > { %1802 = vmatpush1.bf16.msra.mxu1 %v2591_v24 }
 0xb5a   : > { %2433 = vmatpush3.bf16.msra.mxu0 %v2578_v11  ;;  %1803 = vmatprep.subr.bf16.mxu1 %v2596_v25 }
 0xb5b   : > { %2304 = vmatprep.subr.bf16.mxu0 %v2603_v50 }
 0xb5d   : > { %1804 = vmatpush1.bf16.msra.mxu1 %v2594_v26 }
 0xb5e   : > { %1805 = vmatprep.subr.bf16.mxu1 %v2599_v27 }
 0xb61   : > { %1806 = vmatpush1.bf16.msra.mxu1 %v2597_v28 }
 0xb62   : > { %1807 = vmatprep.subr.bf16.mxu1 %v2602_v38 }
 0xb65   : > { %1808 = vmatpush1.bf16.msra.mxu1 %v2600_v39 }
 0xc08   : > { %v1548_v18 = vpop.f32.mrf.mxu1 }
 0xc09   : > { %1563 = vrot.lane.b32.xlu0 %v1548_v18, %s2846_s29  ;;  %s2849_s29 = smov [#allocation10]  }
 0xc0a   : > { %v2416_v1 = vpop.f32.mrf.mxu1  ;;  %s2755_s14 = sshll.u32 %s2849_s29, 4  ;;  %s2756_s14 = int_to_ptr.vmem [resolvable:$false] %s2755_s14 }
 0xc0b   : > { %s2757_s25 = scalar_lea.vmem %s2756_s14, 256  ;;  %p2758_p1 = scmp.lt.s32.totalorder %s2052_s28, %s2756_s14 }
 0xc0c   : > { %v1551_v21 = vpop.f32.mrf.mxu1  ;;  %p2759_p3 = scmp.lt.s32.totalorder %s2757_s25, %s2751_s16 }
 0xc0d   : > { %v2241_v21 = vld [vmem:[%s3383_s11] ss:$0 sm:$0xff] }
 0xc0e   : > { %v2417_v22 = vpop.f32.mrf.mxu1  ;;  %p2760_p6 = por %p2759_p3, %p2758_p1 }
 0xc10   : > { %p2761_p9 = pnand %p2760_p6, %p2754_p10 }
 0xc7b   : > { %v1564_v35 = vpop.permute.xlu0 %1563 }
 0xc7c   : > { %v1570_v36 = vsel %vm1569_vm11, %v1568_v33, %v1564_v35 }
 0xc7d   : > { %v1571_v37 = vpack.c.bf16 %v1570_v36, %v1570_v36 }
 0xc7f   : > { %2435 = vmatmul.mubr.bf16.vlgmr.msra.gmra.mxu0 %v1571_v37 }
 0xc80   : > { %2305 = vmatpush3.bf16.msra.mxu0 %v2604_v51 }
 0xc81   : > { %2306 = vmatprep.subr.bf16.mxu0 %v2605_v52 }
 0xc84   : > { %2307 = vmatpush3.bf16.msra.mxu0 %v2606_v53 }
 0xc85   : > { %2308 = vmatprep.subr.bf16.mxu0 %v2607_v54 }
 0xc88   : > { %2309 = vmatpush3.bf16.msra.mxu0 %v2608_v57 }
 0xd3f   : > { %v1677_v41 = vpop.f32.mrf.mxu0 }
 0xd40   : > { %v1678_v42 = vadd.f32 %v2212_v40, %v1677_v41 }
 0xd41   : > { %v2436_v43 = vpop.f32.mrf.mxu0 }
 0xd42   : > { %v3320_v44 = vadd.f32 %v1678_v42, %v3069_v23  ;;  %v2609_v23 = vld [vmem:[#allocation8 + $0x60] sm:$0xff]  }
 0xd43   : > { %v1680_v47 = vpop.f32.mrf.mxu0  ;;  %2310 = vmatprep.subr.bf16.mxu0 %v2609_v23 }
 0xd44   : > { %v1684_v48 = vpack.c.bf16 %v3320_v44, %v3320_v44  ;;  %2311 = vmatpush3.bf16.msra.mxu0 %v2610_v58 }
 0xd45   : > { %v2437_v49 = vpop.f32.mrf.mxu0  ;;  %2312 = vmatprep.subr.bf16.mxu0 %v2611_v59 }
 0xd46   : > { %1826 = vmatmul.mubr.bf16.vlgmr.msra.gmra.mxu1 %v1684_v48 }
 0xd48   : > { %2313 = vmatpush3.bf16.msra.mxu0 %v2612_v60 }
 0xd49   : > { %2314 = vmatprep.subr.bf16.mxu0 %v2613_v62 }
 0xd4c   : > { %2315 = vmatpush3.bf16.msra.mxu0 %v2614_v63 }
 0xd4d   : > { %2316 = vmatprep.subr.bf16.mxu0 %v2615_v2 }
 0xd50   : > { %2317 = vmatpush3.bf16.msra.mxu0 %v2616_v3 }
 0xd51   : > { %2318 = vmatprep.subr.bf16.mxu0 %v2617_v4 }
 0xd54   : > { %2319 = vmatpush3.bf16.msra.mxu0 %v2618_v61 }
 0xe06   : > { %v1827_v56 = vpop.f32.mrf.mxu1 }
 0xe07   : > { %v1828_v45 = vadd.f32 %v1827_v56, %v1706_v6 }
 0xe08   : > { %v1829_v0 = vpop.f32.mrf.mxu1 }
 0xe09   : > { %v2237_v8 = vadd.f32 -1.0, %v1828_v45  ;;  %v1830_v9 = vadd.f32 %v1829_v0, %v1710_v7 }
 0xe0a   : > { %v1831_v10 = vpop.f32.mrf.mxu1 }
 0xe0b   : > { %v2239_v11 = vmul.f32 -1.442695, %v2237_v8  ;;  %v2238_v12 = vadd.f32 -1.0, %v1830_v9 }
 0xe0c   : > { %v1832_v13 = vpop.f32.mrf.mxu1 }
 0xe0d   : > { %2635 = vpow2.f32 %v2239_v11  ;;  %v2240_v14 = vmul.f32 -1.442695, %v2238_v12 }
 0xe0f   : > { %2637 = vpow2.f32 %v2240_v14 }
 0xe1a   : > { %v2636_v15 = vpop.eup %2635 }
 0xe1b   : > { %v1842_v16 = vadd.f32 1.0, %v2636_v15 }
 0xe1c   : > { %v2638_v55 = vpop.eup %2637 }
 0xe1d   : > { %2639 = vrcp.f32 %v1842_v16  ;;  %v1843_v32 = vadd.f32 1.0, %v2638_v55 }
 0xe1f   : > { %2641 = vrcp.f32 %v1843_v32 }
 0xe2a   : > { %v2640_v31 = vpop.eup %2639 }
 0xe2b   : > { %v1848_v17 = vmul.f32 %v2640_v31, %v1828_v45 }
 0xe2c   : > { %v2642_v34 = vpop.eup %2641 }
 0xe2d   : > { %v1849_v18 = vmul.f32 %v2642_v34, %v1830_v9  ;;  %v1850_v19 = vpack.c.bf16 %v1848_v17, %v1848_v17 }
 0xe2f   : > { %v1851_v1 = vpack.c.bf16 %v1849_v18, %v1849_v18 }
 0xe31   : > { %2019 = vmatprep.mubr.bf16.mxu0 %v1851_v1 }
 0xe32   : > { %2020 = vmatmul.mubr.bf16.vlgmr.msra.gmra.mxu0 %v1850_v19 }
 0xef2   : > { %v2320_v20 = vpop.f32.mrf.mxu0 }
 0xef4   : > { %v2321_v22 = vpop.f32.mrf.mxu0 }
 0xef5   : > { %v2322_v24 = vadd.f32 %v2321_v22, %v2320_v20 }
 0xef6   : > { %v2323_v25 = vpop.f32.mrf.mxu0 }
 0xef7   : > { %v2022_v26 = vadd.f32 %v2322_v24, %v2241_v21 }
 0xef8   : > { %v2324_v27 = vpop.f32.mrf.mxu0 }
 0xef9   : > { %v2027_v28 = vadd.f32 %v2022_v26, %v3320_v44 }
 0xefb   : > { %v2028_v46 = vmul.f32 %v2027_v28, %v2027_v28 }
 0xefd   : > { %2029 = vadd.xlane.f32.xlu1 %v2028_v46 }
 0xf86   : > { %v2030_v29 = vpop.xlane.xlu1 %2029 }
 0xf87   : > { %v2032_v30 = vmul.f32 0.0078125, %v2030_v29 }
 0xf89   : > { %v2033_v33 = vadd.f32 0.25, %v2032_v30 }
 0xf8b   : > { %2643 = vrsqrt.f32 %v2033_v33 }
 0xf98   : > { %v2644_v35 = vpop.eup %2643 }
 0xf99   : > { %v2035_v36 = vmul.f32 %v2644_v35, %v2027_v28 }
 0xf9b   : > { %2036 = vst [vmem:[%s472_s20] sm:$0xff] %v2035_v36 }
 0xf9c   : > { %2764 = shalt.err (!%p2761_p9)
}
 0xf9d   : > { %s2765_s10 = scalar_lea.hbm %s2049_s21, 128  ;;  %s2769_s23 = scalar_lea.hbm %s3384_s12, 256 }
 0xf9e   : > { %p2766_p13 = scmp.ne.s32.totalorder %s2049_s21, %s2765_s10  ;;  %p2770_p2 = scmp.lt.s32.totalorder %s2049_s21, %s3384_s12 }
 0xf9f   : > { %p2771_p11 = scmp.lt.s32.totalorder %s2769_s23, %s2765_s10 }
 0xfa0   : > { %p2767_p4 = pnand %p2766_p13, %p3415_p0 }
 0xfa1   : > { %p2772_p7 = por %p2771_p11, %p2770_p2 }
 0xfa2   : > { %p2768_p8 = pneg %p2767_p4 }
 0xfa4   : > { %p2773_p12 = pnand %p2772_p7, %p2768_p8 }
 0xfa6   : > { %2776 = shalt.err (!%p2773_p12)
}
 0xfa7   : > { %2452 = dma.vmem_to_hbm [thread:$0]  (%p3415_p0), %s2052_s28, 128, %s2049_s21, %s2038_s18  }
 0xfa8 PF: > { %s3416_s19 = sld [smem:[#allocation15_spill]]  ;;  %p3419_p10 = scmp.ge.s32.totalorder %s2823_s24, 2 }
 0xfa9   : > { %s3417_s20 = sld [smem:[#allocation17_spill]] }
 0xfae   : > { %s2063_s30 = sand.u32 1, %s3416_s19  }
 0xfaf   : > { %p3418_p5 = scmp.ne.s32.totalorder %s3417_s20, 0  ;;  %s2064_s15 = scalar_lea.sflag [#allocation4], %s2063_s30 }
 0xfb1   : > { %p2469_p1 = pnand %p3419_p10, %p3418_p5 }
 0xfb3   : > { %p2470_p3 = pneg %p2469_p1 }
 0xfb5   : > { %2806 = dma.done.wait (%p2470_p3), %s2064_s15, 128  }
 0xfb6   : > { %2808 = vsyncadd (%p2470_p3), %s2064_s15, 4294967168  ;;  %s3420_s16 = sld [smem:[#allocation16_spill]]  ;;  %p27_p6 = scmp.ge.s32.totalorder %s2995_s26, 4  }
 0xfb7   : > { %s3421_s23 = sld [smem:[#allocation18_spill]]  ;;  %s3422_s21 = smov %s2815_s22 }
 0xfb8   : > { %s3424_s24 = smov %s2995_s26  ;;  %29 = sbr.rel (!%p27_p6) target bundleno = 11 (0xb), region = 128 }
 0xfbc   : > { %s3423_s22 = smov %s3420_s16 }
 0xfbd   :  { %2069 = vsyncpa [#allocation3], 1 }
 0xfbe   :  { %2071 = vsyncpa [#allocation3 + $0x1], 1 }
 0xfbf   :  { %2072 = vsyncpa [#allocation6], 1 }
 0xfc0   :  { %2073 = vsyncpa [#allocation9], 1 }
 0xfc1   :  { %2074 = vsyncpa [#allocation4], 1 }
 0xfc2   :  { %2076 = vsyncpa [#allocation4 + $0x1], 1 }

// kernel: tpu_custom_call.1
= control target key start
LH: loop header
LB: loop body
LE: loop exit
PB: predicated region body
PF: predicated region fallthrough
CT: control target
= control target key end

     0   :  { %s3372_s0 = inlined_call_operand.hbm [shape: f32[2,8,128], index: 0, kind: input, shape index: {}]   ;;  %s3373_s1 = inlined_call_operand.vmem [shape: bf16[4,15,32], index: 1, kind: input, shape index: {}]   ;;  %s3374_s2 = inlined_call_operand.hbm [shape: bf16[128,384], index: 2, kind: input, shape index: {}]   ;;  %s3375_s3 = inlined_call_operand.vmem [shape: f32[1,384], index: 3, kind: input, shape index: {}]   ;;  %s3376_s4 = inlined_call_operand.vmem [shape: f32[1,128], index: 4, kind: input, shape index: {}]   ;;  %s3377_s5 = inlined_call_operand.vmem [shape: f32[1,128], index: 5, kind: input, shape index: {}]   ;;  %s3378_s6 = inlined_call_operand.vmem [shape: bf16[128,128], index: 6, kind: input, shape index: {}]   ;;  %s3379_s7 = inlined_call_operand.vmem [shape: f32[1,128], index: 7, kind: input, shape index: {}]   ;;  %s3380_s8 = inlined_call_operand.hbm [shape: bf16[128,256], index: 8, kind: input, shape index: {}]   ;;  %s3381_s9 = inlined_call_operand.vmem [shape: f32[1,256], index: 9, kind: input, shape index: {}]   ;;  %s3382_s10 = inlined_call_operand.hbm [shape: bf16[256,128], index: 10, kind: input, shape index: {}]   ;;  %s3383_s11 = inlined_call_operand.vmem [shape: f32[1,128], index: 11, kind: input, shape index: {}]   ;;  %s3384_s12 = inlined_call_operand.hbm [shape: f32[2,8,128], index: 12, kind: output, shape index: {}]  }
   0x1   :  { %3392 = sst [smem:[#allocation19_spill]] %s3374_s2 }
   0x2   :  { %3393 = sst [smem:[#allocation20_spill]] %s3380_s8 }
   0x3   :  { %3394 = sst [smem:[#allocation21_spill]] %s3382_s10 }
   0x4   :  { %17 = vsyncpa [#allocation3], 0 }
   0x5   :  { %19 = vsyncpa [#allocation3 + $0x1], 0 }
   0x6   :  { %20 = vsyncpa [#allocation6], 0 }
   0x7   :  { %21 = vsyncpa [#allocation9], 0 }
   0x8   :  { %22 = vsyncpa [#allocation4], 0 }
   0x9   :  { %24 = vsyncpa [#allocation4 + $0x1], 0  ;;  %s2915_s21 = smov 0   ;;  %s2917_s22 = smov 0  }
   0xa   :  { %s2919_s23 = smov 0   ;;  %s2921_s24 = smov 0  }
   0xb LB: > { %3395 = sst [smem:[#allocation15_spill]] %s2811_s21  ;;  %s2936_s25 = sadd.s32 4294967295, %s2823_s24   ;;  %s2823_s24 = sphi %s2921_s24, %s3424_s24   ;;  %s2819_s23 = sphi %s2919_s23, %s3421_s23   ;;  %s2815_s22 = sphi %s2917_s22, %s3423_s22   ;;  %s2811_s21 = sphi %s2915_s21, %s3422_s21  }
   0xc   : > { %3396 = sst [smem:[#allocation16_spill]] %s2819_s23  ;;  %s2150_s26 = sadd.s32 4294967294, %s2823_s24  }
   0xd   : > { %p50_p0 = scmp.ne.s32.totalorder %s2815_s22, %s2811_s21  ;;  %p3385_p1 = scmp.eq.s32.totalorder %s2936_s25, 0 }
   0xe   : > { %p311_p3 = scmp.eq.s32.totalorder %s2150_s26, 1  ;;  %p2151_p5 = scmp.ge.s32.totalorder %s2823_s24, 1 }
   0xf   : > { %p2945_p4 = por %p3385_p1, %p50_p0  ;;  %p318_p7 = scmp.lt.s32.totalorder %s2823_s24, 3 }
  0x10   : > { %p2950_p6 = por %p311_p3, %p50_p0  ;;  %s2825_s30 = smov [#allocation5]  }
  0x11   : > { %s3397_s27 = scalar_select %p2945_p4, 1, 0 }
  0x12   : > { %s3398_s28 = scalar_select %p2950_p6, 1, 0 }
  0x13   : > { %p2955_p8 = pnand %p2151_p5, %p318_p7  ;;  %s333_s13 = sshll.u32 %s2825_s30, 4  ;;  %s334_s13 = int_to_ptr.vmem [resolvable:$true] %s333_s13 }
  0x14   : > { %3399 = sst [smem:[#allocation17_spill]] %s3398_s28  ;;  %s2826_s15 = smov [#allocation7]  }
  0x15   : > { %s3400_s29 = scalar_select %p2955_p8, 1, 0 }
  0x16   : > { %p2454_p9 = pneg %p2955_p8  ;;  %s361_s16 = sshll.u32 %s2826_s15, 4  ;;  %s362_s16 = int_to_ptr.vmem [resolvable:$true] %s361_s16 }
  0x17   : > { %s2656_s17 = scalar_lea.vmem %s334_s13, 3072  ;;  %p2664_p5 = scmp.lt.s32.totalorder %s334_s13, %s334_s13 }
  0x18   : > { %p2964_p11 = pnand %p2454_p9, %p3385_p1  ;;  %p2657_p13 = scmp.ne.s32.totalorder %s334_s13, %s2656_s17 }
  0x19   : > { %p2665_p7 = scmp.lt.s32.totalorder %s2656_s17, %s2656_s17 }
  0x1a   : > { %p2647_p12 = pneg %p2964_p11 }
  0x1b   : > { %p2666_p10 = por %p2665_p7, %p2664_p5 }
  0x1c   : > { %p2659_p0 = pnand %p2657_p13, %p2647_p12 }
  0x1e   : > { %p2660_p3 = pneg %p2659_p0 }
  0x20   : > { %p2667_p9 = pnand %p2666_p10, %p2660_p3 }
  0x22   : > { %2670 = shalt.err (!%p2667_p9)
}
  0x23   : > { %s2827_s18 = smov 192   ;;  %s2828_s19 = smov 12  }
  0x24   : > { %s3402_s2 = sld [smem:[#allocation19_spill]]  ;;  %s2682_s30 = scalar_lea.vmem %s362_s16, 2048 }
  0x25   : > { %p2683_p1 = scmp.ne.s32.totalorder %s362_s16, %s2682_s30  ;;  %p2690_p2 = scmp.lt.s32.totalorder %s362_s16, %s362_s16 }
  0x26   : > { %p2691_p6 = scmp.lt.s32.totalorder %s2682_s30, %s2682_s30 }
  0x27   : > { %p2685_p13 = pnand %p2683_p1, %p2647_p12 }
  0x28   : > { %p2692_p5 = por %p2691_p6, %p2690_p2 }
  0x29   : > { %p2686_p0 = pneg %p2685_p13 }
  0x2a   : > { %2457 = dma.hbm_to_vmem [thread:$0]  (!%p2964_p11), %s3402_s2, 3072, %s334_s13, [#allocation6], %s2827_s18, %s2827_s18, %s2828_s19  }
  0x2b   : > { %p2693_p10 = pnand %p2692_p5, %p2686_p0 }
  0x2d   : > { %2696 = shalt.err (!%p2693_p10)
}
  0x2e   : > { %s2829_s15 = smov 128   ;;  %s2830_s17 = smov 8  }
  0x2f   : > { %s3403_s8 = sld [smem:[#allocation20_spill]]  ;;  %s2831_s13 = smov [#allocation8]  }
  0x30   : > { %s377_s18 = sshll.u32 %s2831_s13, 4  ;;  %s378_s18 = int_to_ptr.vmem [resolvable:$true] %s377_s18 }
  0x31   : > { %s2708_s19 = scalar_lea.vmem %s378_s18, 2048  ;;  %p2716_p6 = scmp.lt.s32.totalorder %s378_s18, %s378_s18 }
  0x32   : > { %p2709_p1 = scmp.ne.s32.totalorder %s378_s18, %s2708_s19  ;;  %p2717_p7 = scmp.lt.s32.totalorder %s2708_s19, %s2708_s19 }
  0x34   : > { %p2711_p3 = pnand %p2709_p1, %p2647_p12  ;;  %p2718_p9 = por %p2717_p7, %p2716_p6 }
  0x35   : > { %2460 = dma.hbm_to_vmem [thread:$0]  (!%p2964_p11), %s3403_s8, 2048, %s362_s16, [#allocation6], %s2829_s15, %s2829_s15, %s2830_s17  }
  0x36   : > { %p2712_p2 = pneg %p2711_p3 }
  0x38   : > { %p2719_p13 = pnand %p2718_p9, %p2712_p2 }
  0x3a   : > { %2722 = shalt.err (!%p2719_p13)
}
  0x3b   : > { %s2832_s20 = smov 64   ;;  %s2833_s21 = smov 4  }
  0x3c   : > { %s3404_s10 = sld [smem:[#allocation21_spill]]  ;;  %s2995_s26 = sadd.s32 1, %s2823_s24  }
  0x3d   : > { %s34_s30 = ssub.s32 %s2823_s24, %s2995_s26  ;;  %s37_s15 = sadd.s32 1, %s2819_s23 }
  0x3e   : > { %p35_p12 = scmp.eq.s32.totalorder %s34_s30, 0  ;;  %p44_p0 = scmp.ne.s32.totalorder %s2819_s23, %s2815_s22 }
  0x3f   : > { %p45_p5 = scmp.eq.s32.totalorder %s2823_s24, 0  ;;  %p2475_p10 = scmp.lt.s32.totalorder %s2823_s24, 2 }
  0x40   : > { %s3005_s17 = scalar_select %p35_p12, %s2819_s23, %s37_s15  }
  0x41   : > { %p46_p1 = por %p45_p5, %p44_p0  ;;  %p3406_p3 = scmp.eq.s32.totalorder %s2936_s25, 1 }
  0x42   : > { %2463 = dma.hbm_to_vmem [thread:$0]  (!%p2964_p11), %s3404_s10, 2048, %s378_s18, [#allocation9], %s2832_s20, %s2832_s20, %s2833_s21  }
  0x43   : > { %3405 = sst [smem:[#allocation18_spill]] %s3005_s17  ;;  %p3009_p2 = por %p3406_p3, %p44_p0 }
  0x44   : > { %s394_s14 = sand.u32 1, %s2819_s23   ;;  %s2157_s19 = sshll.u32 %s2823_s24, 7 }
  0x45   : > { %s3407_s13 = scalar_select %p3009_p2, 1, 0 }
  0x46   : > { %s2156_s18 = sshll.u32 %s394_s14, 3  ;;  %s3018_s28 = scalar_lea.hbm %s3372_s0, %s2157_s19 }
  0x47   : > { %s398_s16 = scalar_lea.vmem [#allocation2], %s2156_s18  ;;  %p3020_p11 = pnand %p2475_p10, %p46_p1 }
  0x48   : > { %s405_s30 = sshll.u32 %s398_s16, 4  ;;  %s395_s2 = scalar_lea.sflag [#allocation3], %s394_s14  ;;  %s406_s30 = int_to_ptr.vmem [resolvable:$true] %s405_s30 }
  0x49   : > { %s2723_s8 = scalar_lea.hbm %s3018_s28, 128  ;;  %p2725_p7 = pneg %p3020_p11 }
  0x4a   : > { %p2724_p6 = scmp.ne.s32.totalorder %s3018_s28, %s2723_s8  ;;  %s2728_s21 = scalar_lea.hbm %s3372_s0, 256 }
  0x4b   : > { %p2729_p12 = scmp.lt.s32.totalorder %s3018_s28, %s3372_s0  ;;  %p2730_p0 = scmp.lt.s32.totalorder %s2728_s21, %s2723_s8 }
  0x4c   : > { %p2726_p9 = pnand %p2725_p7, %p2724_p6 }
  0x4d   : > { %p2731_p5 = por %p2730_p0, %p2729_p12 }
  0x4e   : > { %p2727_p13 = pneg %p2726_p9 }
  0x50   : > { %p2732_p10 = pnand %p2731_p5, %p2727_p13 }
  0x52   : > { %2735 = shalt.err (!%p2732_p10)
}
  0x53   : > { %s2736_s16 = scalar_lea.vmem %s406_s30, 128  ;;  %s2834_s14 = smov [#allocation2]  }
  0x54   : > { %p2737_p1 = scmp.ne.s32.totalorder %s406_s30, %s2736_s16  ;;  %s2741_s17 = sshll.u32 %s2834_s14, 4  ;;  %s2742_s17 = int_to_ptr.vmem [resolvable:$false] %s2741_s17 }
  0x55   : > { %s2743_s23 = scalar_lea.vmem %s2742_s17, 256  ;;  %p2744_p6 = scmp.lt.s32.totalorder %s406_s30, %s2742_s17 }
  0x56   : > { %p2739_p3 = pnand %p2737_p1, %p2725_p7  ;;  %p2745_p9 = scmp.lt.s32.totalorder %s2743_s23, %s2736_s16 }
  0x58   : > { %p2740_p2 = pneg %p2739_p3  ;;  %p2746_p4 = por %p2745_p9, %p2744_p6 }
  0x5a   : > { %p2747_p8 = pnand %p2746_p4, %p2740_p2 }
  0x5c   : > { %2750 = shalt.err (!%p2747_p8)
}
  0x5d   : > { %2467 = dma.hbm_to_vmem [thread:$0]  (!%p3020_p11), %s3018_s28, 128, %s406_s30, %s395_s2  }
  0x5e   : > { %p3409_p13 = scmp.ne.s32.totalorder %s3400_s29, 0 }
  0x5f   : > { %s3041_s8 = sand.u32 (!%p3409_p13), 1, %s2815_s22   ;;  %p3410_p4 = scmp.ne.s32.totalorder (!%p3409_p13), %s3397_s27, 0 }
  0x60   : > { %414 = sbr.rel (%p3409_p13) target bundleno = 4008 (0xfa8), region = 68  ;;  %s2159_s10 = sshll.u32 (!%p3409_p13), %s3041_s8, 3 }
  0x61   : > { %s417_s17 = scalar_lea.sflag (!%p3409_p13), [#allocation3], %s3041_s8  ;;  %s3047_s23 = scalar_lea.vmem (!%p3409_p13), [#allocation2], %s2159_s10 }
  0x65   : > { %2794 = dma.done.wait (%p3410_p4), %s417_s17, 128  }
  0x66   : > { %2796 = vsyncadd (%p3410_p4), %s417_s17, 4294967168  ;;  %p3411_p8 = scmp.eq.s32.totalorder %s2936_s25, 0 }
  0x68   : > { %2798 = dma.done.wait (%p3411_p8), [#allocation6], 5120   ;;  %p3412_p2 = pmov %p3411_p8 }
  0x6a   : > { %2800 = vsyncadd (%p3412_p2), [#allocation6], 4294962176  ;;  %p3413_p11 = pmov %p3412_p2 }
  0x6b   : > { %p3414_p7 = pmov %p3412_p2 }
  0x6c   : > { %2802 = dma.done.wait (%p3413_p11), [#allocation9], 2048  }
  0x6d   : > { %2804 = vsyncadd (%p3414_p7), [#allocation9], 4294965248  ;;  %v2835_v0 = vmov 0   ;;  %v2836_v1 = vmov 0.0   ;;  %vm2837_vm0 = vmmov 0   ;;  %v3069_v23 = vld [vmem:[%s3047_s23] sm:$0xff]  ;;  %v510_v30 = vlaneseq }
  0x6e   : > { %685 = vmatprep.mubr.bf16.mxu0 %v2835_v0  ;;  %2326 = vmatprep.subr.bf16.mxu1 %v2836_v1  ;;  %v2535_v2 = vld [vmem:[#allocation5 + $0xac] ss:$12 sps:$4 sm:$0xff]   ;;  %v2537_v3 = vld [vmem:[#allocation5 + $0xa8] ss:$12 sps:$4 sm:$0xff]   ;;  %v2540_v5 = vld [vmem:[#allocation5 + $0x90] ss:$12 sps:$4 sm:$0xff]   ;;  %v475_v26 = vpack.c.bf16 %v3069_v23, %v3069_v23 }
  0x6f   : > { %2342 = vmatprep.mubr.msk.bf16.mxu1 %vm2837_vm0, %v2836_v1  ;;  %653 = vmatprep.subr.bf16.mxu0 %v2535_v2  ;;  %v2538_v4 = vld [vmem:[#allocation5 + $0x94] ss:$12 sps:$4 sm:$0xff]   ;;  %v2541_v6 = vld [vmem:[#allocation5 + $0x7c] ss:$12 sps:$4 sm:$0xff]   ;;  %v2543_v7 = vld [vmem:[#allocation5 + $0x78] ss:$12 sps:$4 sm:$0xff]  }
  0x70   : > { %654 = vmatpush1.bf16.msra.mxu0 %v2537_v3  ;;  %v2544_v8 = vld [vmem:[#allocation5 + $0x64] ss:$12 sps:$4 sm:$0xff]   ;;  %v2546_v9 = vld [vmem:[#allocation5 + $0x60] ss:$12 sps:$4 sm:$0xff]   ;;  %v2549_v13 = vld [vmem:[#allocation5 + $0x48] ss:$12 sps:$4 sm:$0xff]  }
  0x71   : > { %655 = vmatprep.subr.bf16.mxu0 %v2538_v4  ;;  %v2559_v10 = vld [vmem:[#allocation5 + $0xb0] ss:$12 sps:$4 sm:$0xff]   ;;  %v2547_v11 = vld [vmem:[#allocation5 + $0x4c] ss:$12 sps:$4 sm:$0xff]   ;;  %v2550_v14 = vld [vmem:[#allocation5 + $0x34] ss:$12 sps:$4 sm:$0xff]  }
  0x72   : > { %2327 = vmatpush3.bf16.msra.mxu1 %v2559_v10  ;;  %v2560_v12 = vld [vmem:[#allocation5 + $0x98] ss:$12 sps:$4 sm:$0xff]   ;;  %v2561_v15 = vld [vmem:[#allocation5 + $0x80] ss:$12 sps:$4 sm:$0xff]   ;;  %v2552_v16 = vld [vmem:[#allocation5 + $0x30] ss:$12 sps:$4 sm:$0xff]  }
  0x73   : > { %2328 = vmatprep.subr.bf16.mxu1 %v2836_v1  ;;  %v2553_v17 = vld [vmem:[#allocation5 + $0x1c] ss:$12 sps:$4 sm:$0xff]   ;;  %v2555_v19 = vld [vmem:[#allocation5 + $0x18] ss:$12 sps:$4 sm:$0xff]   ;;  %v2558_v22 = vld [vmem:[#allocation5] ss:$12 sps:$4 sm:$0xff]  }
  0x74   : > { %656 = vmatpush1.bf16.msra.mxu0 %v2540_v5  ;;  %v2562_v18 = vld [vmem:[#allocation5 + $0x68] ss:$12 sps:$4 sm:$0xff]   ;;  %v2556_v20 = vld [vmem:[#allocation5 + $0x4] ss:$12 sps:$4 sm:$0xff]   ;;  %vm761_vm1 = vcmask 261120   ;;  %v3088_v31 = vshrl.u32 %v510_v30, 7 }
  0x75   : > { %657 = vmatprep.subr.bf16.mxu0 %v2541_v6  ;;  %v2563_v21 = vld [vmem:[#allocation5 + $0x50] ss:$12 sps:$4 sm:$0xff]   ;;  %v2564_v25 = vld [vmem:[#allocation5 + $0x38] ss:$12 sps:$4 sm:$0xff]   ;;  %v2565_v27 = vld [vmem:[#allocation5 + $0x20] ss:$12 sps:$4 sm:$0xff]  }
  0x76   : > { %2329 = vmatpush3.bf16.msra.mxu1 %v2560_v12  ;;  %v2567_v24 = vld [vmem:[%s3373_s1] sm:$0xff]   ;;  %v512_v32 = vsub.s32 0, %v3088_v31  ;;  %v516_v34 = vsub.s32 1, %v3088_v31  ;;  %v520_v43 = vsub.s32 2, %v3088_v31  ;;  %vm836_vm2 = vcmask 1043456   ;;  %s2838_s21 = smov 3  }
  0x77   : > { %2330 = vmatprep.subr.bf16.mxu1 %v2836_v1  ;;  %v766_v28 = vsel %vm761_vm1, %v2567_v24, 0  ;;  %v2566_v29 = vld [vmem:[#allocation5 + $0x8] ss:$12 sps:$4 sm:$0xff]   ;;  %v508_v33 = vld [vmem:[%s3375_s3] sm:$0x7]  ;;  %s2839_s18 = smov 1  }
  0x78   : > { %658 = vmatpush1.bf16.msra.mxu0 %v2543_v7  ;;  %v513_v35 = vrot.slane %v508_v33, %v512_v32  ;;  %v517_v36 = vrot.slane %v508_v33, %v516_v34  ;;  %v2189_v38 = vld [vmem:[%s3377_s5] ss:$0 sm:$0xff]  ;;  %v521_v50 = vrot.slane %v508_v33, %v520_v43  ;;  %s2840_s16 = smov 4   ;;  %s2841_s14 = smov 2   ;;  %vm830_vm3 = vcmask 1040384  }
  0x79   : > { %659 = vmatprep.subr.bf16.mxu0 %v2544_v8  ;;  %v2188_v47 = vld [vmem:[%s3376_s4] ss:$0 sm:$0xff]  ;;  %s2842_s17 = smov 6   ;;  %s2843_s23 = smov 5   ;;  %vm832_vm4 = vcmask 1041408   ;;  %vm834_vm5 = vcmask 1042432  }
  0x7a   : > { %2331 = vmatpush3.bf16.msra.mxu1 %v2561_v15  ;;  %s2844_s2 = smov 7   ;;  %vm838_vm6 = vcmask 1044480   ;;  %vm840_vm7 = vcmask 1045504   ;;  %vm842_vm8 = vcmask 1046528   ;;  %s2845_s27 = smov 121   ;;  %vm894_vm9 = vcmask 64512  }
  0x7b   : > { %2332 = vmatprep.subr.bf16.mxu1 %v2836_v1  ;;  %s2846_s29 = smov 96   ;;  %s2847_s20 = smov 64   ;;  %vm1567_vm10 = vcmask 523264   ;;  %vm1569_vm11 = vcmask 785408  }
  0x7c   : > { %660 = vmatpush1.bf16.msra.mxu0 %v2546_v9  ;;  %s2848_s15 = smov 32   ;;  %s2259_s19 = sshll.u32 %s2936_s25, 7 }
  0x7d   : > { %661 = vmatprep.subr.bf16.mxu0 %v2547_v11  ;;  %p3415_p0 = scmp.ne.s32.totalorder %s3407_s13, 0 }
  0x7e   : > { %2333 = vmatpush3.bf16.msra.mxu1 %v2562_v18 }
  0x7f   : > { %2334 = vmatprep.subr.bf16.mxu1 %v2836_v1 }
  0x80   : > { %662 = vmatpush1.bf16.msra.mxu0 %v2549_v13 }
  0x81   : > { %663 = vmatprep.subr.bf16.mxu0 %v2550_v14 }
  0x82   : > { %2335 = vmatpush3.bf16.msra.mxu1 %v2563_v21 }
  0x83   : > { %2336 = vmatprep.subr.bf16.mxu1 %v2836_v1 }
  0x84   : > { %664 = vmatpush1.bf16.msra.mxu0 %v2552_v16 }
  0x85   : > { %665 = vmatprep.subr.bf16.mxu0 %v2553_v17 }
  0x86   : > { %2337 = vmatpush3.bf16.msra.mxu1 %v2564_v25 }
  0x87   : > { %2338 = vmatprep.subr.bf16.mxu1 %v2836_v1 }
  0x88   : > { %666 = vmatpush1.bf16.msra.mxu0 %v2555_v19 }
  0x89   : > { %667 = vmatprep.subr.bf16.mxu0 %v2556_v20 }
  0x8a   : > { %2339 = vmatpush3.bf16.msra.mxu1 %v2565_v27 }
  0x8b   : > { %2340 = vmatprep.subr.bf16.mxu1 %v2836_v1 }
  0x8c   : > { %668 = vmatpush1.bf16.msra.mxu0 %v2558_v22 }
  0x8d   : > { %2370 = vmatprep.subr.bf16.mxu0 %v2836_v1 }
  0x8e   : > { %2341 = vmatpush3.bf16.msra.mxu1 %v2566_v29 }
  0x8f   : > { %686 = vmatmul.mubr.bf16.vlgmr.msra.gmra.mxu0 %v475_v26  ;;  %2346 = vmatprep.subr.bf16.mxu1 %v2836_v1 }
  0x90   : > { %2372 = vmatprep.mubr.msk.bf16.mxu0 %vm2837_vm0, %v2836_v1 }
  0x91   : > { %2343 = vmatmul.mubr.bf16.vlgmr.msra.gmra.mxu1 %v475_v26 }
  0x92   : > { %2347 = vmatpush3.bf16.xpose.msra.mxu1 %v766_v28  ;;  %2348 = vmatprep.mubr.msk.bf16.mxu1 %vm2837_vm0, %v2836_v1 }
  0x93   : > { %2352 = vmatprep.subr.bf16.mxu1 %v2836_v1 }
 0x14f   : > { %v687_v37 = vpop.f32.mrf.mxu0 }
 0x150   : > { %v688_v39 = vadd.f32 %v687_v37, %v513_v35  ;;  %v2568_v37 = vld [vmem:[%s3373_s1 + $0x8] sm:$0xff]  }
 0x151   : > { %v689_v40 = vpop.f32.mrf.mxu0  ;;  %v728_v52 = vpop.f32.mrf.mxu1 }
 0x152   : > { %v752_v41 = vadd.f32 %v2189_v38, %v688_v39  ;;  %v690_v42 = vadd.f32 %v689_v40, %v517_v36  ;;  %v743_v51 = vadd.f32 %v2188_v47, %v688_v39  ;;  %v729_v53 = vadd.f32 %v728_v52, %v521_v50 }
 0x153   : > { %v691_v44 = vpop.f32.mrf.mxu0  ;;  %v2344_v54 = vpop.f32.mrf.mxu1 }
 0x154   : > { %v3103_v45 = vpack.c.bf16 %v752_v41, %v752_v41  ;;  %v3105_v46 = vpack.c.bf16 %v690_v42, %v690_v42  ;;  %v3117_v55 = vpack.c.bf16 %v743_v51, %v743_v51  ;;  %v3119_v56 = vpack.c.bf16 %v729_v53, %v729_v53 }
 0x155   : > { %v692_v48 = vpop.f32.mrf.mxu0  ;;  %v731_v57 = vpop.f32.mrf.mxu1  ;;  %v968_v41 = vsel %vm761_vm1, %v2568_v37, 0 }
 0x156   : > { %2349 = vmatmul.mubr.msk.bf16.vlgmr.msra.gmra.mxu1 %vm761_vm1, %v3103_v45  ;;  %v852_v49 = vsel %vm761_vm1, %v3105_v46, 0  ;;  %v911_v58 = vsel %vm836_vm2, %v3119_v56, 0  ;;  %v2569_v57 = vld [vmem:[%s3373_s1 + $0x10] sm:$0xff]  }
 0x157   : > { %2353 = vmatpush3.bf16.xpose.msra.mxu1 %v852_v49  ;;  %2354 = vmatprep.mubr.msk.bf16.mxu1 %vm2837_vm0, %v2836_v1  ;;  %v2345_v59 = vpop.f32.mrf.mxu1 }
 0x158   : > { %2358 = vmatprep.subr.bf16.mxu1 %v2836_v1  ;;  %v1170_v59 = vsel %vm761_vm1, %v2569_v57, 0 }
 0x15e   : > { %2355 = vmatmul.mubr.msk.bf16.vlgmr.msra.gmra.mxu1 %vm761_vm1, %v3117_v55 }
 0x15f   : > { %2359 = vmatpush3.bf16.msra.mxu1 %v911_v58  ;;  %2360 = vmatprep.mubr.msk.bf16.mxu1 %vm2837_vm0, %v2836_v1 }
 0x160   : > { %2364 = vmatprep.subr.bf16.mxu1 %v2836_v1 }
 0x216   : > { %v802_v60 = vpop.f32.mrf.mxu1 }
 0x217   : > { %815 = vrot.lane.b32.xlu1 %v802_v60, %s2838_s21  ;;  %809 = vrot.lane.b32.xlu0 %v802_v60, %s2839_s18 }
 0x218   : > { %v2350_v61 = vpop.f32.mrf.mxu1 }
 0x21a   : > { %v805_v62 = vpop.f32.mrf.mxu1 }
 0x21b   : > { %818 = vrot.lane.b32.xlu1 %v802_v60, %s2840_s16  ;;  %812 = vrot.lane.b32.xlu0 %v802_v60, %s2841_s14 }
 0x21c   : > { %v2351_v63 = vpop.f32.mrf.mxu1 }
 0x21e   : > { %v888_v2 = vpop.f32.mrf.mxu1 }
 0x21f   : > { %824 = vrot.lane.b32.xlu1 %v802_v60, %s2842_s17  ;;  %821 = vrot.lane.b32.xlu0 %v802_v60, %s2843_s23 }
 0x220   : > { %v2356_v3 = vpop.f32.mrf.mxu1 }
 0x222   : > { %v891_v4 = vpop.f32.mrf.mxu1 }
 0x223   : > { %827 = vrot.lane.b32.xlu0 %v802_v60, %s2844_s2 }
 0x224   : > { %v2357_v5 = vpop.f32.mrf.mxu1 }
 0x289   : > { %v816_v6 = vpop.permute.xlu1 %815  ;;  %v810_v7 = vpop.permute.xlu0 %809 }
 0x28a   : > { %v831_v8 = vsel %vm830_vm3, %v802_v60, %v810_v7 }
 0x28d   : > { %v819_v9 = vpop.permute.xlu1 %818  ;;  %v813_v10 = vpop.permute.xlu0 %812 }
 0x28e   : > { %v833_v11 = vsel %vm832_vm4, %v831_v8, %v813_v10 }
 0x28f   : > { %v835_v12 = vsel %vm834_vm5, %v833_v11, %v816_v6 }
 0x290   : > { %v837_v13 = vsel %vm836_vm2, %v835_v12, %v819_v9 }
 0x291   : > { %v822_v14 = vpop.permute.xlu0 %821  ;;  %v825_v15 = vpop.permute.xlu1 %824 }
 0x292   : > { %v839_v16 = vsel %vm838_vm6, %v837_v13, %v822_v14 }
 0x293   : > { %v841_v18 = vsel %vm840_vm7, %v839_v16, %v825_v15 }
 0x295   : > { %v828_v17 = vpop.permute.xlu0 %827 }
 0x296   : > { %v843_v19 = vsel %vm842_vm8, %v841_v18, %v828_v17 }
 0x297   : > { %845 = vrot.lane.b32.xlu1 %v843_v19, %s2845_s27 }
 0x309   : > { %v846_v20 = vpop.permute.xlu1 %845 }
 0x30a   : > { %v889_v21 = vadd.f32 %v888_v2, %v846_v20 }
 0x30c   : > { %v895_v22 = vsel %vm894_vm9, %v889_v21, -inf }
 0x30d   : > { %896 = vmax.xlane.f32.xlu0 %v895_v22 }
 0x323   : > { %957 = vrot.lane.b32.xlu0 %v3103_v45, %s2846_s29 }
 0x327   : > { %1040 = vrot.lane.b32.xlu0 %v3117_v55, %s2846_s29 }
 0x396   : > { %v897_v24 = vpop.xlane.xlu0 %896 }
 0x397   : > { %v898_v25 = vsub.f32 %v889_v21, %v897_v24 }
 0x399   : > { %v899_v26 = vmul.f32 1.442695, %v898_v25 }
 0x39a   : > { %v958_v35 = vpop.permute.xlu0 %957 }
 0x39b   : > { %2619 = vpow2.f32 %v899_v26 }
 0x39e   : > { %v1041_v36 = vpop.permute.xlu0 %1040 }
 0x3a8   : > { %v2620_v27 = vpop.eup %2619 }
 0x3a9   : > { %v901_v28 = vsel %vm894_vm9, %v2620_v27, 0.0 }
 0x3aa   : > { %902 = vadd.xlane.f32.xlu1 %v901_v28 }
 0x3bb   : > { %1043 = vrot.lane.b32.xlu1 %v3105_v46, %s2846_s29 }
 0x433   : > { %v903_v29 = vpop.xlane.xlu1 %902 }
 0x434   : > { %2621 = vrcp.f32 %v903_v29 }
 0x437   : > { %v1044_v30 = vpop.permute.xlu1 %1043 }
 0x438   : > { %v1053_v33 = vsel %vm761_vm1, %v1044_v30, 0 }
 0x439   : > { %2371 = vmatpush3.bf16.xpose.msra.mxu0 %v1053_v33 }
 0x43a   : > { %2382 = vmatprep.subr.bf16.mxu0 %v2836_v1 }
 0x440   : > { %2373 = vmatmul.mubr.msk.bf16.vlgmr.msra.gmra.mxu0 %vm761_vm1, %v1041_v36 }
 0x441   : > { %v2622_v38 = vpop.eup %2621  ;;  %2384 = vmatprep.mubr.msk.bf16.mxu0 %vm2837_vm0, %v2836_v1  ;;  %2383 = vmatpush3.bf16.xpose.msra.mxu0 %v1170_v59 }
 0x442   : > { %v905_v39 = vmul.f32 %v2622_v38, %v2620_v27  ;;  %2394 = vmatprep.subr.bf16.mxu0 %v2836_v1 }
 0x444   : > { %v906_v40 = vpack.c.bf16 %v905_v39, %v905_v39 }
 0x446   : > { %2361 = vmatmul.mubr.msk.bf16.vlgmr.msra.gmra.mxu1 %vm894_vm9, %v906_v40 }
 0x447   : > { %2365 = vmatpush3.bf16.xpose.msra.mxu1 %v968_v41  ;;  %2366 = vmatprep.mubr.msk.bf16.mxu1 %vm2837_vm0, %v2836_v1 }
 0x448   : > { %2376 = vmatprep.subr.bf16.mxu1 %v2836_v1 }
 0x44e   : > { %2367 = vmatmul.mubr.msk.bf16.vlgmr.msra.gmra.mxu1 %vm761_vm1, %v958_v35 }
 0x44f   : > { %2378 = vmatprep.mubr.msk.bf16.mxu1 %vm2837_vm0, %v2836_v1 }
 0x500   : > { %v1089_v42 = vpop.f32.mrf.mxu0 }
 0x502   : > { %v2374_v43 = vpop.f32.mrf.mxu0 }
 0x504   : > { %v1092_v44 = vpop.f32.mrf.mxu0 }
 0x506   : > { %v3167_v47 = vpop.f32.mrf.mxu1  ;;  %v2375_v48 = vpop.f32.mrf.mxu0 }
 0x507   : > { %v2570_v48 = vld [vmem:[%s3373_s1 + $0x18] sm:$0xff]  }
 0x508   : > { %v2362_v49 = vpop.f32.mrf.mxu1 }
 0x50a   : > { %v950_v50 = vpop.f32.mrf.mxu1 }
 0x50c   : > { %v2363_v51 = vpop.f32.mrf.mxu1 }
 0x50e   : > { %v1004_v52 = vpop.f32.mrf.mxu1 }
 0x50f   : > { %1014 = vrot.lane.b32.xlu0 %v1004_v52, %s2841_s14  ;;  %1011 = vrot.lane.b32.xlu1 %v1004_v52, %s2839_s18 }
 0x510   : > { %v2368_v53 = vpop.f32.mrf.mxu1 }
 0x511   : > { %v1369_v53 = vsel %vm761_vm1, %v2570_v48, 0 }
 0x512   : > { %v1007_v54 = vpop.f32.mrf.mxu1 }
 0x513   : > { %1020 = vrot.lane.b32.xlu0 %v1004_v52, %s2840_s16  ;;  %1017 = vrot.lane.b32.xlu1 %v1004_v52, %s2838_s21 }
 0x514   : > { %v2369_v58 = vpop.f32.mrf.mxu1 }
 0x517   : > { %1026 = vrot.lane.b32.xlu0 %v1004_v52, %s2842_s17  ;;  %1023 = vrot.lane.b32.xlu1 %v1004_v52, %s2843_s23 }
 0x51b   : > { %1029 = vrot.lane.b32.xlu1 %v1004_v52, %s2844_s2 }
 0x581   : > { %v1015_v60 = vpop.permute.xlu0 %1014  ;;  %v1012_v61 = vpop.permute.xlu1 %1011 }
 0x582   : > { %v1032_v62 = vsel %vm830_vm3, %v1004_v52, %v1012_v61 }
 0x583   : > { %v1033_v2 = vsel %vm832_vm4, %v1032_v62, %v1015_v60 }
 0x585   : > { %v1021_v63 = vpop.permute.xlu0 %1020  ;;  %v1018_v3 = vpop.permute.xlu1 %1017 }
 0x586   : > { %v1034_v4 = vsel %vm834_vm5, %v1033_v2, %v1018_v3 }
 0x587   : > { %v1035_v5 = vsel %vm836_vm2, %v1034_v4, %v1021_v63 }
 0x589   : > { %v1024_v6 = vpop.permute.xlu1 %1023  ;;  %v1027_v7 = vpop.permute.xlu0 %1026 }
 0x58a   : > { %v1036_v8 = vsel %vm838_vm6, %v1035_v5, %v1024_v6 }
 0x58b   : > { %v1037_v10 = vsel %vm840_vm7, %v1036_v8, %v1027_v7 }
 0x58d   : > { %v1030_v9 = vpop.permute.xlu1 %1029 }
 0x58e   : > { %v1038_v11 = vsel %vm842_vm8, %v1037_v10, %v1030_v9 }
 0x58f   : > { %1046 = vrot.lane.b32.xlu0 %v1038_v11, %s2845_s27 }
 0x593   : > { %1159 = vrot.lane.b32.xlu0 %v3103_v45, %s2847_s20 }
 0x601   : > { %v1047_v12 = vpop.permute.xlu0 %1046 }
 0x602   : > { %v1090_v13 = vadd.f32 %v1089_v42, %v1047_v12 }
 0x604   : > { %v1095_v14 = vsel %vm894_vm9, %v1090_v13, -inf }
 0x605   : > { %1096 = vmax.xlane.f32.xlu1 %v1095_v14  ;;  %v1160_v15 = vpop.permute.xlu0 %1159 }
 0x606   : > { %2385 = vmatmul.mubr.msk.bf16.vlgmr.msra.gmra.mxu0 %vm761_vm1, %v1160_v15 }
 0x607   : > { %2396 = vmatprep.mubr.msk.bf16.mxu0 %vm2837_vm0, %v2836_v1 }
 0x616   : > { %1108 = vrot.lane.b32.xlu1 %v3119_v56, %s2846_s29 }
 0x61a   : > { %1241 = vrot.lane.b32.xlu1 %v3117_v55, %s2847_s20 }
 0x68e   : > { %v1097_v16 = vpop.xlane.xlu1 %1096 }
 0x68f   : > { %v1098_v17 = vsub.f32 %v1090_v13, %v1097_v16 }
 0x691   : > { %v1099_v18 = vmul.f32 1.442695, %v1098_v17 }
 0x692   : > { %v1109_v19 = vpop.permute.xlu1 %1108 }
 0x693   : > { %2623 = vpow2.f32 %v1099_v18  ;;  %v1114_v20 = vsel %vm836_vm2, %v1109_v19, 0 }
 0x694   : > { %2377 = vmatpush3.bf16.msra.mxu1 %v1114_v20 }
 0x695   : > { %2388 = vmatprep.subr.bf16.mxu1 %v2836_v1 }
 0x696   : > { %v1242_v29 = vpop.permute.xlu1 %1241 }
 0x6a0   : > { %v2624_v21 = vpop.eup %2623 }
 0x6a1   : > { %v1101_v22 = vsel %vm894_vm9, %v2624_v21, 0.0 }
 0x6a2   : > { %1102 = vadd.xlane.f32.xlu0 %v1101_v22 }
 0x6b8   : > { %1243 = vrot.lane.b32.xlu0 %v3105_v46, %s2847_s20 }
 0x6c6   : > { %v1206_v24 = vpop.f32.mrf.mxu0 }
 0x6c7   : > { %1216 = vrot.lane.b32.xlu0 %v1206_v24, %s2841_s14  ;;  %1213 = vrot.lane.b32.xlu1 %v1206_v24, %s2839_s18 }
 0x6c8   : > { %v2386_v25 = vpop.f32.mrf.mxu0 }
 0x6ca   : > { %v1209_v26 = vpop.f32.mrf.mxu0 }
 0x6cb   : > { %1222 = vrot.lane.b32.xlu0 %v1206_v24, %s2840_s16  ;;  %1219 = vrot.lane.b32.xlu1 %v1206_v24, %s2838_s21 }
 0x6cc   : > { %v2387_v27 = vpop.f32.mrf.mxu0 }
 0x6cf   : > { %1228 = vrot.lane.b32.xlu0 %v1206_v24, %s2842_s17  ;;  %1225 = vrot.lane.b32.xlu1 %v1206_v24, %s2843_s23 }
 0x6d3   : > { %1231 = vrot.lane.b32.xlu1 %v1206_v24, %s2844_s2 }
 0x72b   : > { %v1103_v28 = vpop.xlane.xlu0 %1102 }
 0x72c   : > { %2625 = vrcp.f32 %v1103_v28 }
 0x72f   : > { %v1244_v30 = vpop.permute.xlu0 %1243 }
 0x730   : > { %v1253_v43 = vsel %vm761_vm1, %v1244_v30, 0 }
 0x739   : > { %v2626_v33 = vpop.eup %2625  ;;  %v1214_v35 = vpop.permute.xlu1 %1213 }
 0x73a   : > { %v1217_v36 = vpop.permute.xlu0 %1216  ;;  %v1234_v37 = vsel %vm830_vm3, %v1206_v24, %v1214_v35  ;;  %v1105_v38 = vmul.f32 %v2626_v33, %v2624_v21 }
 0x73b   : > { %v1235_v40 = vsel %vm832_vm4, %v1234_v37, %v1217_v36 }
 0x73c   : > { %v1106_v39 = vpack.c.bf16 %v1105_v38, %v1105_v38 }
 0x73d   : > { %v1220_v41 = vpop.permute.xlu1 %1219 }
 0x73e   : > { %v1223_v42 = vpop.permute.xlu0 %1222  ;;  %v1236_v44 = vsel %vm834_vm5, %v1235_v40, %v1220_v41  ;;  %2379 = vmatmul.mubr.msk.bf16.vlgmr.msra.gmra.mxu1 %vm894_vm9, %v1106_v39 }
 0x73f   : > { %2389 = vmatpush3.bf16.xpose.msra.mxu1 %v1253_v43  ;;  %2390 = vmatprep.mubr.msk.bf16.mxu1 %vm2837_vm0, %v2836_v1  ;;  %v1237_v49 = vsel %vm836_vm2, %v1236_v44, %v1223_v42 }
 0x740   : > { %2400 = vmatprep.subr.bf16.mxu1 %v2836_v1 }
 0x741   : > { %v1226_v50 = vpop.permute.xlu1 %1225 }
 0x742   : > { %v1238_v51 = vsel %vm838_vm6, %v1237_v49, %v1226_v50  ;;  %v1229_v52 = vpop.permute.xlu0 %1228 }
 0x743   : > { %v1239_v54 = vsel %vm840_vm7, %v1238_v51, %v1229_v52 }
 0x745   : > { %v1232_v57 = vpop.permute.xlu1 %1231 }
 0x746   : > { %2391 = vmatmul.mubr.msk.bf16.vlgmr.msra.gmra.mxu1 %vm761_vm1, %v1242_v29  ;;  %v1240_v58 = vsel %vm842_vm8, %v1239_v54, %v1232_v57 }
 0x747   : > { %1246 = vrot.lane.b32.xlu0 %v1240_v58, %s2845_s27  ;;  %2401 = vmatpush3.bf16.xpose.msra.mxu1 %v1369_v53 }
 0x748   : > { %2402 = vmatprep.mubr.msk.bf16.mxu1 %vm2837_vm0, %v2836_v1  ;;  %2412 = vmatprep.subr.bf16.mxu1 %v2836_v1 }
 0x74b   : > { %1358 = vrot.lane.b32.xlu0 %v3103_v45, %s2848_s15 }
 0x7b9   : > { %v1247_v59 = vpop.permute.xlu0 %1246 }
 0x7bd   : > { %v1359_v60 = vpop.permute.xlu0 %1358 }
 0x7be   : > { %2403 = vmatmul.mubr.msk.bf16.vlgmr.msra.gmra.mxu1 %vm761_vm1, %v1359_v60 }
 0x7bf   : > { %2414 = vmatprep.mubr.msk.bf16.mxu1 %vm2837_vm0, %v2836_v1 }
 0x7fe   : > { %v3237_v61 = vpop.f32.mrf.mxu1 }
 0x800   : > { %v2380_v62 = vpop.f32.mrf.mxu1 }
 0x802   : > { %v1153_v63 = vpop.f32.mrf.mxu1 }
 0x804   : > { %v2381_v2 = vpop.f32.mrf.mxu1 }
 0x806   : > { %v1289_v3 = vpop.f32.mrf.mxu1 }
 0x807   : > { %v1290_v4 = vadd.f32 %v1289_v3, %v1247_v59 }
 0x808   : > { %v2392_v5 = vpop.f32.mrf.mxu1 }
 0x809   : > { %v1295_v6 = vsel %vm894_vm9, %v1290_v4, -inf }
 0x80a   : > { %1296 = vmax.xlane.f32.xlu1 %v1295_v6  ;;  %v1292_v7 = vpop.f32.mrf.mxu1 }
 0x80b   : > { %v2571_v7 = vld [vmem:[%s3378_s6 + $0x38] sm:$0xff]  }
 0x80c   : > { %v2393_v45 = vpop.f32.mrf.mxu1 }
 0x80d   : > { %v2573_v45 = vld [vmem:[%s3378_s6 + $0x28] sm:$0xff]  }
 0x81b   : > { %1307 = vrot.lane.b32.xlu1 %v3119_v56, %s2847_s20 }
 0x81f   : > { %1440 = vrot.lane.b32.xlu1 %v3117_v55, %s2848_s15 }
 0x87e   : > { %v1405_v8 = vpop.f32.mrf.mxu1 }
 0x87f   : > { %1412 = vrot.lane.b32.xlu1 %v1405_v8, %s2839_s18  ;;  %s2038_s18 = scalar_lea.sflag [#allocation4], %s3041_s8 }
 0x880   : > { %v2404_v9 = vpop.f32.mrf.mxu1 }
 0x881   : > { %v2576_v9 = vld [vmem:[%s3378_s6 + $0x10] sm:$0xff]  }
 0x882   : > { %v1408_v10 = vpop.f32.mrf.mxu1 }
 0x883   : > { %1418 = vrot.lane.b32.xlu1 %v1405_v8, %s2838_s21  ;;  %v2577_v10 = vld [vmem:[%s3378_s6 + $0x8] sm:$0xff]   ;;  %s2049_s21 = scalar_lea.hbm %s3384_s12, %s2259_s19 }
 0x884   : > { %v2405_v11 = vpop.f32.mrf.mxu1 }
 0x885   : > { %v2578_v11 = vld [vmem:[%s3378_s6] sm:$0xff]  }
 0x887   : > { %1424 = vrot.lane.b32.xlu1 %v1405_v8, %s2843_s23 }
 0x88b   : > { %1430 = vrot.lane.b32.xlu1 %v1405_v8, %s2844_s2 }
 0x893   : > { %v1297_v12 = vpop.xlane.xlu1 %1296 }
 0x894   : > { %v1298_v13 = vsub.f32 %v1290_v4, %v1297_v12  ;;  %v2579_v12 = vld [vmem:[#allocation7 + $0x70] ss:$8 sps:$4 sm:$0xff]  }
 0x896   : > { %v1299_v14 = vmul.f32 1.442695, %v1298_v13  ;;  %v2581_v13 = vld [vmem:[#allocation7 + $0x74] ss:$8 sps:$4 sm:$0xff]  }
 0x897   : > { %v1308_v15 = vpop.permute.xlu1 %1307 }
 0x898   : > { %2627 = vpow2.f32 %v1299_v14  ;;  %v1313_v16 = vsel %vm836_vm2, %v1308_v15, 0  ;;  %v2584_v14 = vld [vmem:[#allocation7 + $0x64] ss:$8 sps:$4 sm:$0xff]   ;;  %v2582_v15 = vld [vmem:[#allocation7 + $0x60] ss:$8 sps:$4 sm:$0xff]  }
 0x899   : > { %2395 = vmatpush3.bf16.msra.mxu0 %v1313_v16  ;;  %v2587_v16 = vld [vmem:[#allocation7 + $0x54] ss:$8 sps:$4 sm:$0xff]  }
 0x89a   : > { %2406 = vmatprep.subr.bf16.mxu0 %v2836_v1 }
 0x89b   : > { %v1441_v18 = vpop.permute.xlu1 %1440 }
 0x8a5   : > { %v2628_v55 = vpop.eup %2627 }
 0x8a6   : > { %v1301_v17 = vsel %vm894_vm9, %v2628_v55, 0.0 }
 0x8a7   : > { %1302 = vadd.xlane.f32.xlu0 %v1301_v17  ;;  %v2590_v17 = vld [vmem:[#allocation7 + $0x44] ss:$8 sps:$4 sm:$0xff]  }
 0x8bd   : > { %1442 = vrot.lane.b32.xlu0 %v3105_v46, %s2848_s15 }
 0x8c1   : > { %1415 = vrot.lane.b32.xlu0 %v1405_v8, %s2841_s14 }
 0x8c5   : > { %1421 = vrot.lane.b32.xlu0 %v1405_v8, %s2840_s16 }
 0x8c9   : > { %1427 = vrot.lane.b32.xlu0 %v1405_v8, %s2842_s17 }
 0x8f1   : > { %v1413_v19 = vpop.permute.xlu1 %1412 }
 0x8f2   : > { %v1433_v24 = vsel %vm830_vm3, %v1405_v8, %v1413_v19  ;;  %v2575_v8 = vld [vmem:[%s3378_s6 + $0x18] sm:$0xff]  }
 0x8f3   : > { %v2588_v19 = vld [vmem:[#allocation7 + $0x40] ss:$8 sps:$4 sm:$0xff]  }
 0x8f5   : > { %v1419_v22 = vpop.permute.xlu1 %1418 }
 0x8f9   : > { %v1425_v27 = vpop.permute.xlu1 %1424 }
 0x8fd   : > { %v1431_v37 = vpop.permute.xlu1 %1430 }
 0x930   : > { %v1303_v20 = vpop.xlane.xlu0 %1302 }
 0x931   : > { %2629 = vrcp.f32 %v1303_v20  ;;  %v2593_v20 = vld [vmem:[#allocation7 + $0x34] ss:$8 sps:$4 sm:$0xff]  }
 0x934   : > { %v1443_v21 = vpop.permute.xlu0 %1442 }
 0x935   : > { %v1452_v41 = vsel %vm761_vm1, %v1443_v21, 0 }
 0x938   : > { %v1416_v25 = vpop.permute.xlu0 %1415 }
 0x939   : > { %v1434_v26 = vsel %vm832_vm4, %v1433_v24, %v1416_v25  ;;  %v2591_v24 = vld [vmem:[#allocation7 + $0x30] ss:$8 sps:$4 sm:$0xff]   ;;  %v2596_v25 = vld [vmem:[#allocation7 + $0x24] ss:$8 sps:$4 sm:$0xff]  }
 0x93a   : > { %v1435_v46 = vsel %vm834_vm5, %v1434_v26, %v1419_v22  ;;  %v2594_v26 = vld [vmem:[#allocation7 + $0x20] ss:$8 sps:$4 sm:$0xff]  }
 0x93c   : > { %v1422_v28 = vpop.permute.xlu0 %1421 }
 0x93d   : > { %v1436_v29 = vsel %vm836_vm2, %v1435_v46, %v1422_v28  ;;  %v2597_v28 = vld [vmem:[#allocation7 + $0x10] ss:$8 sps:$4 sm:$0xff]  }
 0x93e   : > { %v2630_v30 = vpop.eup %2629  ;;  %v1437_v36 = vsel %vm838_vm6, %v1436_v29, %v1425_v27  ;;  %v2599_v27 = vld [vmem:[#allocation7 + $0x14] ss:$8 sps:$4 sm:$0xff]  }
 0x93f   : > { %v1305_v33 = vmul.f32 %v2630_v30, %v2628_v55  ;;  %v2585_v55 = vld [vmem:[#allocation7 + $0x50] ss:$8 sps:$4 sm:$0xff]  }
 0x940   : > { %v1428_v35 = vpop.permute.xlu0 %1427 }
 0x941   : > { %v1438_v38 = vsel %vm840_vm7, %v1437_v36, %v1428_v35  ;;  %v1306_v39 = vpack.c.bf16 %v1305_v33, %v1305_v33 }
 0x942   : > { %v1439_v40 = vsel %vm842_vm8, %v1438_v38, %v1431_v37  ;;  %v2602_v38 = vld [vmem:[#allocation7 + $0x4] ss:$8 sps:$4 sm:$0xff]  }
 0x943   : > { %2397 = vmatmul.mubr.msk.bf16.vlgmr.msra.gmra.mxu0 %vm894_vm9, %v1306_v39  ;;  %1445 = vrot.lane.b32.xlu0 %v1439_v40, %s2845_s27  ;;  %v2600_v39 = vld [vmem:[#allocation7] ss:$8 sps:$4 sm:$0xff]   ;;  %v2212_v40 = vld [vmem:[%s3379_s7] ss:$0 sm:$0xff] }
 0x944   : > { %2407 = vmatpush3.bf16.xpose.msra.mxu0 %v1452_v41  ;;  %2408 = vmatprep.mubr.msk.bf16.mxu0 %vm2837_vm0, %v2836_v1 }
 0x945   : > { %2418 = vmatprep.subr.bf16.mxu0 %v2836_v1 }
 0x94b   : > { %2409 = vmatmul.mubr.msk.bf16.vlgmr.msra.gmra.mxu0 %vm761_vm1, %v1441_v18 }
 0x94c   : > { %2434 = vmatprep.mubr.msk.bf16.mxu0 %vm2837_vm0, %v2836_v1  ;;  %2419 = vmatpush3.bf16.msra.mxu0 %v2571_v7 }
 0x94d   : > { %2420 = vmatprep.subr.bf16.mxu0 %v2836_v1 }
 0x9b5   : > { %v1446_v49 = vpop.permute.xlu0 %1445 }
 0xa03   : > { %v1349_v42 = vpop.f32.mrf.mxu0 }
 0xa05   : > { %v2398_v43 = vpop.f32.mrf.mxu0 }
 0xa07   : > { %v1352_v44 = vpop.f32.mrf.mxu0 }
 0xa09   : > { %v2399_v48 = vpop.f32.mrf.mxu0 }
 0xa0b   : > { %v1488_v50 = vpop.f32.mrf.mxu0 }
 0xa0c   : > { %v1489_v51 = vadd.f32 %v1488_v50, %v1446_v49  ;;  %v2603_v50 = vld [vmem:[#allocation8 + $0x78] sm:$0xff]  }
 0xa0d   : > { %v2410_v52 = vpop.f32.mrf.mxu0 }
 0xa0e   : > { %v1494_v53 = vsel %vm894_vm9, %v1489_v51, -inf  ;;  %v2605_v52 = vld [vmem:[#allocation8 + $0x70] sm:$0xff]  }
 0xa0f   : > { %v1491_v54 = vpop.f32.mrf.mxu0  ;;  %1495 = vmax.xlane.f32.xlu1 %v1494_v53  ;;  %v2606_v53 = vld [vmem:[#allocation8 + $0x30] sm:$0xff]  }
 0xa10   : > { %v2607_v54 = vld [vmem:[#allocation8 + $0x68] sm:$0xff]  }
 0xa11   : > { %v2411_v57 = vpop.f32.mrf.mxu0 }
 0xa12   : > { %v2608_v57 = vld [vmem:[#allocation8 + $0x28] sm:$0xff]  }
 0xa20   : > { %1555 = vrot.lane.b32.xlu1 %v3237_v61, %s2848_s15 }
 0xa24   : > { %1559 = vrot.lane.b32.xlu1 %v1349_v42, %s2847_s20  ;;  %s472_s20 = scalar_lea.vmem [#allocation10], %s2159_s10 }
 0xa25   : > { %s2051_s28 = sshll.u32 %s472_s20, 4  ;;  %s2052_s28 = int_to_ptr.vmem [resolvable:$true] %s2051_s28 }
 0xa26   : > { %s2751_s16 = scalar_lea.vmem %s2052_s28, 128 }
 0xa27   : > { %p2752_p12 = scmp.ne.s32.totalorder %s2052_s28, %s2751_s16 }
 0xa29   : > { %p2753_p5 = pnand %p2752_p12, %p3415_p0 }
 0xa2b   : > { %p2754_p10 = pneg %p2753_p5 }
 0xa98   : > { %v1496_v58 = vpop.xlane.xlu1 %1495 }
 0xa99   : > { %v1497_v59 = vsub.f32 %v1489_v51, %v1496_v58  ;;  %v2604_v51 = vld [vmem:[#allocation8 + $0x38] sm:$0xff]   ;;  %v2610_v58 = vld [vmem:[#allocation8 + $0x20] sm:$0xff]  }
 0xa9b   : > { %v1498_v60 = vmul.f32 1.442695, %v1497_v59  ;;  %v2611_v59 = vld [vmem:[#allocation8 + $0x58] sm:$0xff]  }
 0xa9c   : > { %v1556_v46 = vpop.permute.xlu1 %1555 }
 0xa9d   : > { %2631 = vpow2.f32 %v1498_v60  ;;  %v1566_v30 = vsel %vm761_vm1, %v3167_v47, %v1556_v46  ;;  %v2612_v60 = vld [vmem:[#allocation8 + $0x18] sm:$0xff]  }
 0xaa0   : > { %v1560_v29 = vpop.permute.xlu1 %1559 }
 0xaa1   : > { %v1568_v33 = vsel %vm1567_vm10, %v1566_v30, %v1560_v29 }
 0xaaa   : > { %v2632_v62 = vpop.eup %2631 }
 0xaab   : > { %v1500_v63 = vsel %vm894_vm9, %v2632_v62, 0.0 }
 0xaac   : > { %1501 = vadd.xlane.f32.xlu0 %v1500_v63  ;;  %v2614_v63 = vld [vmem:[#allocation8 + $0x10] sm:$0xff]  }
 0xac2   : > { %1506 = vrot.lane.b32.xlu0 %v3119_v56, %s2848_s15  ;;  %v2572_v56 = vld [vmem:[%s3378_s6 + $0x30] sm:$0xff]  }
 0xac3   : > { %2421 = vmatpush3.bf16.msra.mxu0 %v2572_v56 }
 0xac4   : > { %2422 = vmatprep.subr.bf16.mxu0 %v2836_v1 }
 0xac7   : > { %2423 = vmatpush3.bf16.msra.mxu0 %v2573_v45 }
 0xac8   : > { %2424 = vmatprep.subr.bf16.mxu0 %v2836_v1 }
 0xb35   : > { %v1502_v2 = vpop.xlane.xlu0 %1501 }
 0xb36   : > { %2633 = vrcp.f32 %v1502_v2  ;;  %v2615_v2 = vld [vmem:[#allocation8 + $0x48] sm:$0xff]  }
 0xb39   : > { %v1507_v3 = vpop.permute.xlu0 %1506 }
 0xb3a   : > { %v1512_v4 = vsel %vm836_vm2, %v1507_v3, 0  ;;  %v2616_v3 = vld [vmem:[#allocation8 + $0x8] sm:$0xff]  }
 0xb3b   : > { %2413 = vmatpush3.bf16.msra.mxu1 %v1512_v4  ;;  %v2617_v4 = vld [vmem:[#allocation8 + $0x40] sm:$0xff]  }
 0xb3c   : > { %1793 = vmatprep.subr.bf16.mxu1 %v2581_v13 }
 0xb43   : > { %v2634_v61 = vpop.eup %2633 }
 0xb44   : > { %v1504_v5 = vmul.f32 %v2634_v61, %v2632_v62  ;;  %v2613_v62 = vld [vmem:[#allocation8 + $0x50] sm:$0xff]   ;;  %v2618_v61 = vld [vmem:[#allocation8] sm:$0xff]  }
 0xb46   : > { %v1505_v6 = vpack.c.bf16 %v1504_v5, %v1504_v5  ;;  %v1701_v5 = vld [vmem:[%s3381_s9] sm:$0x3] }
 0xb47   : > { %v1710_v7 = vrot.slane %v1701_v5, %v516_v34 }
 0xb48   : > { %2415 = vmatmul.mubr.msk.bf16.vlgmr.msra.gmra.mxu1 %vm894_vm9, %v1505_v6  ;;  %v1706_v6 = vrot.slane %v1701_v5, %v512_v32 }
 0xb49   : > { %1825 = vmatprep.mubr.bf16.mxu1 %v2835_v0  ;;  %v2574_v0 = vld [vmem:[%s3378_s6 + $0x20] sm:$0xff]   ;;  %1794 = vmatpush1.bf16.msra.mxu1 %v2579_v12 }
 0xb4a   : > { %2425 = vmatpush3.bf16.msra.mxu0 %v2574_v0  ;;  %1795 = vmatprep.subr.bf16.mxu1 %v2584_v14 }
 0xb4b   : > { %2426 = vmatprep.subr.bf16.mxu0 %v2836_v1 }
 0xb4d   : > { %1796 = vmatpush1.bf16.msra.mxu1 %v2582_v15 }
 0xb4e   : > { %2427 = vmatpush3.bf16.msra.mxu0 %v2575_v8  ;;  %1797 = vmatprep.subr.bf16.mxu1 %v2587_v16 }
 0xb4f   : > { %2428 = vmatprep.subr.bf16.mxu0 %v2836_v1 }
 0xb51   : > { %1798 = vmatpush1.bf16.msra.mxu1 %v2585_v55 }
 0xb52   : > { %2429 = vmatpush3.bf16.msra.mxu0 %v2576_v9  ;;  %1799 = vmatprep.subr.bf16.mxu1 %v2590_v17 }
 0xb53   : > { %2430 = vmatprep.subr.bf16.mxu0 %v2836_v1 }
 0xb55   : > { %1800 = vmatpush1.bf16.msra.mxu1 %v2588_v19 }
 0xb56   : > { %2431 = vmatpush3.bf16.msra.mxu0 %v2577_v10  ;;  %1801 = vmatprep.subr.bf16.mxu1 %v2593_v20 }
 0xb57   : > { %2432 = vmatprep.subr.bf16.mxu0 %v2836_v1 }
 0xb59   : > { %1802 = vmatpush1.bf16.msra.mxu1 %v2591_v24 }
 0xb5a   : > { %2433 = vmatpush3.bf16.msra.mxu0 %v2578_v11  ;;  %1803 = vmatprep.subr.bf16.mxu1 %v2596_v25 }
 0xb5b   : > { %2304 = vmatprep.subr.bf16.mxu0 %v2603_v50 }
 0xb5d   : > { %1804 = vmatpush1.bf16.msra.mxu1 %v2594_v26 }
 0xb5e   : > { %1805 = vmatprep.subr.bf16.mxu1 %v2599_v27 }
 0xb61   : > { %1806 = vmatpush1.bf16.msra.mxu1 %v2597_v28 }
 0xb62   : > { %1807 = vmatprep.subr.bf16.mxu1 %v2602_v38 }
 0xb65   : > { %1808 = vmatpush1.bf16.msra.mxu1 %v2600_v39 }
 0xc08   : > { %v1548_v18 = vpop.f32.mrf.mxu1 }
 0xc09   : > { %1563 = vrot.lane.b32.xlu0 %v1548_v18, %s2846_s29  ;;  %s2849_s29 = smov [#allocation10]  }
 0xc0a   : > { %v2416_v1 = vpop.f32.mrf.mxu1  ;;  %s2755_s14 = sshll.u32 %s2849_s29, 4  ;;  %s2756_s14 = int_to_ptr.vmem [resolvable:$false] %s2755_s14 }
 0xc0b   : > { %s2757_s25 = scalar_lea.vmem %s2756_s14, 256  ;;  %p2758_p1 = scmp.lt.s32.totalorder %s2052_s28, %s2756_s14 }
 0xc0c   : > { %v1551_v21 = vpop.f32.mrf.mxu1  ;;  %p2759_p3 = scmp.lt.s32.totalorder %s2757_s25, %s2751_s16 }
 0xc0d   : > { %v2241_v21 = vld [vmem:[%s3383_s11] ss:$0 sm:$0xff] }
 0xc0e   : > { %v2417_v22 = vpop.f32.mrf.mxu1  ;;  %p2760_p6 = por %p2759_p3, %p2758_p1 }
 0xc10   : > { %p2761_p9 = pnand %p2760_p6, %p2754_p10 }
 0xc7b   : > { %v1564_v35 = vpop.permute.xlu0 %1563 }
 0xc7c   : > { %v1570_v36 = vsel %vm1569_vm11, %v1568_v33, %v1564_v35 }
 0xc7d   : > { %v1571_v37 = vpack.c.bf16 %v1570_v36, %v1570_v36 }
 0xc7f   : > { %2435 = vmatmul.mubr.bf16.vlgmr.msra.gmra.mxu0 %v1571_v37 }
 0xc80   : > { %2305 = vmatpush3.bf16.msra.mxu0 %v2604_v51 }
 0xc81   : > { %2306 = vmatprep.subr.bf16.mxu0 %v2605_v52 }
 0xc84   : > { %2307 = vmatpush3.bf16.msra.mxu0 %v2606_v53 }
 0xc85   : > { %2308 = vmatprep.subr.bf16.mxu0 %v2607_v54 }
 0xc88   : > { %2309 = vmatpush3.bf16.msra.mxu0 %v2608_v57 }
 0xd3f   : > { %v1677_v41 = vpop.f32.mrf.mxu0 }
 0xd40   : > { %v1678_v42 = vadd.f32 %v2212_v40, %v1677_v41 }
 0xd41   : > { %v2436_v43 = vpop.f32.mrf.mxu0 }
 0xd42   : > { %v3320_v44 = vadd.f32 %v1678_v42, %v3069_v23  ;;  %v2609_v23 = vld [vmem:[#allocation8 + $0x60] sm:$0xff]  }
 0xd43   : > { %v1680_v47 = vpop.f32.mrf.mxu0  ;;  %2310 = vmatprep.subr.bf16.mxu0 %v2609_v23 }
 0xd44   : > { %v1684_v48 = vpack.c.bf16 %v3320_v44, %v3320_v44  ;;  %2311 = vmatpush3.bf16.msra.mxu0 %v2610_v58 }
 0xd45   : > { %v2437_v49 = vpop.f32.mrf.mxu0  ;;  %2312 = vmatprep.subr.bf16.mxu0 %v2611_v59 }
 0xd46   : > { %1826 = vmatmul.mubr.bf16.vlgmr.msra.gmra.mxu1 %v1684_v48 }
 0xd48   : > { %2313 = vmatpush3.bf16.msra.mxu0 %v2612_v60 }
 0xd49   : > { %2314 = vmatprep.subr.bf16.mxu0 %v2613_v62 }
 0xd4c   : > { %2315 = vmatpush3.bf16.msra.mxu0 %v2614_v63 }
 0xd4d   : > { %2316 = vmatprep.subr.bf16.mxu0 %v2615_v2 }
 0xd50   : > { %2317 = vmatpush3.bf16.msra.mxu0 %v2616_v3 }
 0xd51   : > { %2318 = vmatprep.subr.bf16.mxu0 %v2617_v4 }
 0xd54   : > { %2319 = vmatpush3.bf16.msra.mxu0 %v2618_v61 }
 0xe06   : > { %v1827_v56 = vpop.f32.mrf.mxu1 }
 0xe07   : > { %v1828_v45 = vadd.f32 %v1827_v56, %v1706_v6 }
 0xe08   : > { %v1829_v0 = vpop.f32.mrf.mxu1 }
 0xe09   : > { %v2237_v8 = vadd.f32 -1.0, %v1828_v45  ;;  %v1830_v9 = vadd.f32 %v1829_v0, %v1710_v7 }
 0xe0a   : > { %v1831_v10 = vpop.f32.mrf.mxu1 }
 0xe0b   : > { %v2239_v11 = vmul.f32 -1.442695, %v2237_v8  ;;  %v2238_v12 = vadd.f32 -1.0, %v1830_v9 }
 0xe0c   : > { %v1832_v13 = vpop.f32.mrf.mxu1 }
 0xe0d   : > { %2635 = vpow2.f32 %v2239_v11  ;;  %v2240_v14 = vmul.f32 -1.442695, %v2238_v12 }
 0xe0f   : > { %2637 = vpow2.f32 %v2240_v14 }
 0xe1a   : > { %v2636_v15 = vpop.eup %2635 }
 0xe1b   : > { %v1842_v16 = vadd.f32 1.0, %v2636_v15 }
 0xe1c   : > { %v2638_v55 = vpop.eup %2637 }
 0xe1d   : > { %2639 = vrcp.f32 %v1842_v16  ;;  %v1843_v32 = vadd.f32 1.0, %v2638_v55 }
 0xe1f   : > { %2641 = vrcp.f32 %v1843_v32 }
 0xe2a   : > { %v2640_v31 = vpop.eup %2639 }
 0xe2b   : > { %v1848_v17 = vmul.f32 %v2640_v31, %v1828_v45 }
 0xe2c   : > { %v2642_v34 = vpop.eup %2641 }
 0xe2d   : > { %v1849_v18 = vmul.f32 %v2642_v34, %v1830_v9  ;;  %v1850_v19 = vpack.c.bf16 %v1848_v17, %v1848_v17 }
 0xe2f   : > { %v1851_v1 = vpack.c.bf16 %v1849_v18, %v1849_v18 }
 0xe31   : > { %2019 = vmatprep.mubr.bf16.mxu0 %v1851_v1 }
 0xe32   : > { %2020 = vmatmul.mubr.bf16.vlgmr.msra.gmra.mxu0 %v1850_v19 }
 0xef2   : > { %v2320_v20 = vpop.f32.mrf.mxu0 }
 0xef4   : > { %v2321_v22 = vpop.f32.mrf.mxu0 }
 0xef5   : > { %v2322_v24 = vadd.f32 %v2321_v22, %v2320_v20 }
 0xef6   : > { %v2323_v25 = vpop.f32.mrf.mxu0 }
 0xef7   : > { %v2022_v26 = vadd.f32 %v2322_v24, %v2241_v21 }
 0xef8   : > { %v2324_v27 = vpop.f32.mrf.mxu0 }
 0xef9   : > { %v2027_v28 = vadd.f32 %v2022_v26, %v3320_v44 }
 0xefb   : > { %v2028_v46 = vmul.f32 %v2027_v28, %v2027_v28 }
 0xefd   : > { %2029 = vadd.xlane.f32.xlu1 %v2028_v46 }
 0xf86   : > { %v2030_v29 = vpop.xlane.xlu1 %2029 }
 0xf87   : > { %v2032_v30 = vmul.f32 0.0078125, %v2030_v29 }
 0xf89   : > { %v2033_v33 = vadd.f32 0.25, %v2032_v30 }
 0xf8b   : > { %2643 = vrsqrt.f32 %v2033_v33 }
 0xf98   : > { %v2644_v35 = vpop.eup %2643 }
 0xf99   : > { %v2035_v36 = vmul.f32 %v2644_v35, %v2027_v28 }
 0xf9b   : > { %2036 = vst [vmem:[%s472_s20] sm:$0xff] %v2035_v36 }
 0xf9c   : > { %2764 = shalt.err (!%p2761_p9)
}
 0xf9d   : > { %s2765_s10 = scalar_lea.hbm %s2049_s21, 128  ;;  %s2769_s23 = scalar_lea.hbm %s3384_s12, 256 }
 0xf9e   : > { %p2766_p13 = scmp.ne.s32.totalorder %s2049_s21, %s2765_s10  ;;  %p2770_p2 = scmp.lt.s32.totalorder %s2049_s21, %s3384_s12 }
 0xf9f   : > { %p2771_p11 = scmp.lt.s32.totalorder %s2769_s23, %s2765_s10 }
 0xfa0   : > { %p2767_p4 = pnand %p2766_p13, %p3415_p0 }
 0xfa1   : > { %p2772_p7 = por %p2771_p11, %p2770_p2 }
 0xfa2   : > { %p2768_p8 = pneg %p2767_p4 }
 0xfa4   : > { %p2773_p12 = pnand %p2772_p7, %p2768_p8 }
 0xfa6   : > { %2776 = shalt.err (!%p2773_p12)
}
 0xfa7   : > { %2452 = dma.vmem_to_hbm [thread:$0]  (%p3415_p0), %s2052_s28, 128, %s2049_s21, %s2038_s18  }
 0xfa8 PF: > { %s3416_s19 = sld [smem:[#allocation15_spill]]  ;;  %p3419_p10 = scmp.ge.s32.totalorder %s2823_s24, 2 }
 0xfa9   : > { %s3417_s20 = sld [smem:[#allocation17_spill]] }
 0xfae   : > { %s2063_s30 = sand.u32 1, %s3416_s19  }
 0xfaf   : > { %p3418_p5 = scmp.ne.s32.totalorder %s3417_s20, 0  ;;  %s2064_s15 = scalar_lea.sflag [#allocation4], %s2063_s30 }
 0xfb1   : > { %p2469_p1 = pnand %p3419_p10, %p3418_p5 }
 0xfb3   : > { %p2470_p3 = pneg %p2469_p1 }
 0xfb5   : > { %2806 = dma.done.wait (%p2470_p3), %s2064_s15, 128  }
 0xfb6   : > { %2808 = vsyncadd (%p2470_p3), %s2064_s15, 4294967168  ;;  %s3420_s16 = sld [smem:[#allocation16_spill]]  ;;  %p27_p6 = scmp.ge.s32.totalorder %s2995_s26, 4  }
 0xfb7   : > { %s3421_s23 = sld [smem:[#allocation18_spill]]  ;;  %s3422_s21 = smov %s2815_s22 }
 0xfb8   : > { %s3424_s24 = smov %s2995_s26  ;;  %29 = sbr.rel (!%p27_p6) target bundleno = 11 (0xb), region = 128 }
 0xfbc   : > { %s3423_s22 = smov %s3420_s16 }
 0xfbd   :  { %2069 = vsyncpa [#allocation3], 1 }
 0xfbe   :  { %2071 = vsyncpa [#allocation3 + $0x1], 1 }
 0xfbf   :  { %2072 = vsyncpa [#allocation6], 1 }
 0xfc0   :  { %2073 = vsyncpa [#allocation9], 1 }
 0xfc1   :  { %2074 = vsyncpa [#allocation4], 1 }
 0xfc2   :  { %2076 = vsyncpa [#allocation4 + $0x1], 1 }

</bundles_post_ra>
